<compile_context>
chip_gen: v7x
topology: tpu7x:2x2x1
jax: 0.10.0
libtpu: 0.0.40
codegen_flags: <defaults>
</compile_context>

<pallas_src>
import functools

import jax
import jax.numpy as jnp
from jax.experimental import pallas as pl
from jax.experimental.pallas import tpu as pltpu

VMEM = pltpu.MemorySpace.VMEM
SMEM = pltpu.MemorySpace.SMEM

LANE = 128   # lane width: pad all feature dims to a multiple of this


def _vspec():
    return pl.BlockSpec(memory_space=VMEM)


def _round_up(x, m):
    return ((x + m - 1) // m) * m


def _pad2(a, rows, cols):
    return jnp.pad(a, ((0, rows - a.shape[0]), (0, cols - a.shape[1])))


def _corr_offdiag_mean(cov, d_logical):
    """mean(|corrcoef|) with zero diagonal; padded (zero-variance) dims masked."""
    d = cov.shape[0]
    ii = jax.lax.broadcasted_iota(jnp.int32, (d, d), 0)
    jj = jax.lax.broadcasted_iota(jnp.int32, (d, d), 1)
    eye = ii == jj
    diag = jnp.where(eye, cov, 0.0)
    var_col = jnp.sum(diag, axis=1, keepdims=True)          # (d, 1)
    var_row = jnp.sum(diag, axis=0, keepdims=True)          # (1, d)
    inv_col = jnp.where(var_col > 0, jax.lax.rsqrt(var_col), 0.0)
    inv_row = jnp.where(var_row > 0, jax.lax.rsqrt(var_row), 0.0)
    corr = cov * inv_col * inv_row
    corr_off = jnp.where(eye, 0.0, jnp.abs(corr))
    return jnp.sum(corr_off) / (d_logical * d_logical)      # matches .mean() over (D, D)


# ----------------------------------------------------------------------------------
# Kernel 1: per-view encoder (backbone stub + projection_MLP) + per-view batch stats
#           grid=(2,) over views, "parallel" -> one view per TensorCore on v7x.
# ----------------------------------------------------------------------------------
def encoder_stats_kernel(x_ref, wb_ref, bb_ref, w1_ref, b1_ref, w2_ref, b2_ref,
                         zc_ref, sig_ref, scal_ref, *, n_view, d_logical):
    # backbone stub: full-K bf16 MXU matmul, f32 accumulation (no K grid, no scratch)
    feat = jnp.dot(x_ref[...], wb_ref[...],
                   preferred_element_type=jnp.float32) + bb_ref[...]

    # projection_MLP.layer1: Linear -> BatchNorm1d (train stats over THIS view's
    # batch, eps=1e-5, gamma=1, beta=0) -> ReLU.  (f32 for reference fidelity.)
    h = jnp.dot(feat, w1_ref[...], preferred_element_type=jnp.float32) + b1_ref[...]
    m = jnp.mean(h, axis=0, keepdims=True)
    v = jnp.mean((h - m) ** 2, axis=0, keepdims=True)
    hn = jnp.maximum((h - m) * jax.lax.rsqrt(v + 1e-5), 0.0)

    # projection_MLP.layer2: Linear (no BN / ReLU)
    z = jnp.dot(hn, w2_ref[...], preferred_element_type=jnp.float32) + b2_ref[...]

    # center once; downstream whitening is (z - mean) @ Sigma^{-1/2}, so only the
    # centered z is ever needed -> no separate mu output (no masked (2,D) store).
    mu = jnp.mean(z, axis=0, keepdims=True)
    zc = z - mu
    zc_ref[...] = zc

    # biased covariance (DBN stats): zc.T @ zc / N via MXU transposed-LHS path
    cov = pl.dot(zc, zc, trans_a=True) * (1.0 / n_view)
    sig_ref[...] = cov

    # corr_in = corrcoef(z).abs().fill_diagonal_(0).mean()  (only view 0 is read)
    corr = _corr_offdiag_mean(cov, d_logical)
    scal_ref[...] = jnp.full(scal_ref.shape, corr, jnp.float32)


def encoder_stats(x_pad, p, *, n_view, d_logical):
    n2, k_pad = x_pad.shape
    dpb = p["wb"].shape[1]
    dph = p["w1"].shape[1]
    dpo = p["w2"].shape[1]
    kernel = functools.partial(encoder_stats_kernel,
                               n_view=n_view, d_logical=d_logical)
    return pl.pallas_call(
        kernel,
        out_shape=(
            jax.ShapeDtypeStruct((n2, dpo), jnp.float32),        # centered z (view0;view1)
            jax.ShapeDtypeStruct((2 * dpo, dpo), jnp.float32),   # Sigma1 ; Sigma2 (biased)
            jax.ShapeDtypeStruct((2 * 8, LANE), jnp.float32),    # per-view corr_in at [v*8, 0]
        ),
        grid_spec=pltpu.PrefetchScalarGridSpec(
            num_scalar_prefetch=0,
            grid=(2,),                                           # one view per grid step
            in_specs=[
                pl.BlockSpec((n_view, k_pad), lambda v: (v, 0)),  # this view's input (bf16)
                pl.BlockSpec((k_pad, dpb), lambda v: (0, 0)),     # weights: VMEM-resident
                pl.BlockSpec((1, dpb), lambda v: (0, 0)),
                pl.BlockSpec((dpb, dph), lambda v: (0, 0)),
                pl.BlockSpec((1, dph), lambda v: (0, 0)),
                pl.BlockSpec((dph, dpo), lambda v: (0, 0)),
                pl.BlockSpec((1, dpo), lambda v: (0, 0)),
            ],
            out_specs=(
                pl.BlockSpec((n_view, dpo), lambda v: (v, 0)),
                pl.BlockSpec((dpo, dpo), lambda v: (v, 0)),
                pl.BlockSpec((8, LANE), lambda v: (v, 0)),
            ),
        ),
        compiler_params=pltpu.CompilerParams(
            dimension_semantics=("parallel",)),                  # v7x: 1 view per TC
    )(x_pad, p["wb"], p["bb"], p["w1"], p["b1"], p["w2"], p["b2"])


# ----------------------------------------------------------------------------------
# Kernel 2: whitening application (both views) + whitened-z1 stats + loss
# ----------------------------------------------------------------------------------
def whiten_loss_kernel(zc_ref, w_ref, cov_ref, scal_ref, *, n_view, d_logical):
    zc = zc_ref[...]
    w = w_ref[...]
    dp = zc.shape[1]

    # DBN whitening: (z - mu) @ Sigma^{-1/2}   (zc is already centered per view)
    z1w = jnp.dot(zc[:n_view], w[:dp], preferred_element_type=jnp.float32)
    z2w = jnp.dot(zc[n_view:], w[dp:], preferred_element_type=jnp.float32)

    # stats of whitened z1 (corr_out, covariance for rank_out)
    m = jnp.mean(z1w, axis=0, keepdims=True)
    c = z1w - m
    cov = pl.dot(c, c, trans_a=True) * (1.0 / (n_view - 1))
    cov_ref[...] = cov
    corr_out = _corr_offdiag_mean(cov, d_logical)

    # loss = -cosine_similarity(z1w, z2w, dim=-1).mean(), eps = 1e-8
    eps = 1e-8
    s1 = jnp.sum(z1w * z1w, axis=-1, keepdims=True)
    s2 = jnp.sum(z2w * z2w, axis=-1, keepdims=True)
    dots = jnp.sum(z1w * z2w, axis=-1, keepdims=True)
    cos = dots * jax.lax.rsqrt(jnp.maximum(s1, eps * eps)) \
               * jax.lax.rsqrt(jnp.maximum(s2, eps * eps))

    scal_ref[0] = corr_out
    scal_ref[1] = -jnp.sum(cos) / n_view


def whiten_stats_loss(zc, w_cat, *, n_view, d_logical):
    dpo = zc.shape[1]
    kernel = functools.partial(whiten_loss_kernel,
                               n_view=n_view, d_logical=d_logical)
    return pl.pallas_call(
        kernel,
        out_shape=(
            jax.ShapeDtypeStruct((dpo, dpo), jnp.float32),   # cov of whitened z1
            jax.ShapeDtypeStruct((2,), jnp.float32),         # (corr_out, loss)
        ),
        in_specs=[_vspec(), _vspec()],
        out_specs=(_vspec(), pl.BlockSpec(memory_space=SMEM)),
    )(zc, w_cat)


# ----------------------------------------------------------------------------------
# plain-JAX glue
# ----------------------------------------------------------------------------------
def _rank_from_eigs(eigs, d_logical):
    # torch.matrix_rank default tolerance: S.max() * max(shape) * eps; for a
    # symmetric PSD matrix singular values == |eigenvalues|, so this is exact.
    ev = jnp.abs(eigs)
    tol = ev.max() * d_logical * jnp.finfo(jnp.float32).eps
    return jnp.sum(ev > tol).astype(jnp.int32)


def init_params(key, in_feat, backbone_dim, hidden_dim, out_dim, *, k_pad):
    # PyTorch-style Linear init U(-1/sqrt(fan_in), 1/sqrt(fan_in)); zero-padded
    # to lane-dense (multiple-of-128) widths. Zero padding is exact: padded
    # columns stay identically zero through Linear / BN / ReLU / Linear.
    def linear(k, fan_in, fan_out):
        bound = 1.0 / float(fan_in) ** 0.5
        kw, kb = jax.random.split(k)
        w = jax.random.uniform(kw, (fan_in, fan_out), jnp.float32, -bound, bound)
        b = jax.random.uniform(kb, (1, fan_out), jnp.float32, -bound, bound)
        return w, b

    k1, k2, k3 = jax.random.split(key, 3)
    wb, bb = linear(k1, in_feat, backbone_dim)     # backbone stub
    w1, b1 = linear(k2, backbone_dim, hidden_dim)  # projection_MLP.layer1 Linear
    w2, b2 = linear(k3, hidden_dim, out_dim)       # projection_MLP.layer2 Linear

    dpb = _round_up(backbone_dim, LANE)
    dph = _round_up(hidden_dim, LANE)
    dpo = _round_up(out_dim, LANE)
    return dict(
        wb=_pad2(wb, k_pad, dpb).astype(jnp.bfloat16),   # streamed bf16 MXU operand
        bb=_pad2(bb, 1, dpb),
        w1=_pad2(w1, dpb, dph), b1=_pad2(b1, 1, dph),
        w2=_pad2(w2, dph, dpo), b2=_pad2(b2, 1, dpo),
    )


def wmse_forward(params, x1, x2, out_dim):
    n = x1.shape[0]
    xf = jnp.concatenate([x1.reshape(n, -1), x2.reshape(n, -1)], axis=0)
    k_pad = params["wb"].shape[0]
    xf = jnp.pad(xf, ((0, 0), (0, k_pad - xf.shape[1]))).astype(jnp.bfloat16)
    dpo = params["w2"].shape[1]

    # kernel 1: per-view encoder + centered z + covariances + corr_in
    zc, sig_cat, scal1 = encoder_stats(xf, params, n_view=n, d_logical=out_dim)
    corr_in = scal1[0, 0]

    sig1 = sig_cat[:out_dim, :out_dim]                 # view-0 covariance (logical block)
    sig2 = sig_cat[dpo:dpo + out_dim, :out_dim]        # view-1 covariance

    # one batched eigh for both views (DBN affine=False, eps=0 -> exact Sigma^{-1/2}).
    # TODO(synk): eigh has no Pallas equivalent; kept in plain JAX (batched, single call).
    vals, vecs = jnp.linalg.eigh(jnp.stack([sig1, sig2]))
    rank_in = _rank_from_eigs(vals[0], out_dim)        # replaces torch.matrix_rank SVD
    inv_sqrt = jnp.einsum('bij,bj,bkj->bik', vecs, jax.lax.rsqrt(vals), vecs)
    w_cat = jnp.concatenate([_pad2(inv_sqrt[0], dpo, dpo),
                             _pad2(inv_sqrt[1], dpo, dpo)], axis=0)

    # kernel 2: whitening of both views + whitened-z1 stats + loss, fused
    cov1w, scal2 = whiten_stats_loss(zc, w_cat, n_view=n, d_logical=out_dim)
    rank_out = _rank_from_eigs(jnp.linalg.eigvalsh(cov1w[:out_dim, :out_dim]), out_dim)

    return {
        "loss": scal2[1],                # -cosine_similarity(z1w, z2w).mean()
        "corr_in": corr_in,
        "corr_out": scal2[0],
        "rank_in": rank_in,
        "rank_out": rank_out,
    }


if __name__ == "__main__":
    # Small shapes; batch must exceed output_dim so eps=0 DBN whitening is well posed.
    B, C, H, W = 32, 4, 16, 16
    BACKBONE_DIM, HIDDEN_DIM, OUT_DIM = 64, 96, 16     # logical dims (lane-padded to 128)
    in_feat = C * H * W
    k_pad = _round_up(in_feat, LANE)

    key = jax.random.PRNGKey(0)
    kp, ka, kb = jax.random.split(key, 3)
    params = init_params(kp, in_feat, BACKBONE_DIM, HIDDEN_DIM, OUT_DIM, k_pad=k_pad)
    x1 = jax.random.normal(ka, (B, C, H, W), jnp.float32)
    x2 = jax.random.normal(kb, (B, C, H, W), jnp.float32)

    fwd = jax.jit(functools.partial(wmse_forward, params, out_dim=OUT_DIM))
    out = jax.block_until_ready(fwd(x1, x2))
    print("KERNEL_OK")
</pallas_src>

<mosaic_0001>
module attributes {stable_mosaic.version = 11 : i64} {
  func.func @encoder_stats_kernel(%arg0: i32, %arg1: memref<32x1024xbf16, #tpu.memory_space<vmem>>, %arg2: memref<1024x128xbf16, #tpu.memory_space<vmem>>, %arg3: memref<1x128xf32, #tpu.memory_space<vmem>>, %arg4: memref<128x128xf32, #tpu.memory_space<vmem>>, %arg5: memref<1x128xf32, #tpu.memory_space<vmem>>, %arg6: memref<128x128xf32, #tpu.memory_space<vmem>>, %arg7: memref<1x128xf32, #tpu.memory_space<vmem>>, %arg8: memref<32x128xf32, #tpu.memory_space<vmem>>, %arg9: memref<128x128xf32, #tpu.memory_space<vmem>>, %arg10: memref<8x128xf32, #tpu.memory_space<vmem>>) attributes {dimension_semantics = [#tpu.dimension_semantics<parallel>], iteration_bounds = array<i64: 2>, scalar_prefetch = 0 : i64, scratch_operands = 0 : i64, tpu.core_type = #tpu.core_type<tc>, window_params = [{transform_indices = @transform_0, window_bounds = array<i64: 32, 1024>}, {pipeline_mode = #tpu.pipeline_mode<synchronous>, transform_indices = @transform_1, window_bounds = array<i64: 1024, 128>}, {pipeline_mode = #tpu.pipeline_mode<synchronous>, transform_indices = @transform_2, window_bounds = array<i64: 1, 128>}, {pipeline_mode = #tpu.pipeline_mode<synchronous>, transform_indices = @transform_3, window_bounds = array<i64: 128, 128>}, {pipeline_mode = #tpu.pipeline_mode<synchronous>, transform_indices = @transform_4, window_bounds = array<i64: 1, 128>}, {pipeline_mode = #tpu.pipeline_mode<synchronous>, transform_indices = @transform_5, window_bounds = array<i64: 128, 128>}, {pipeline_mode = #tpu.pipeline_mode<synchronous>, transform_indices = @transform_6, window_bounds = array<i64: 1, 128>}, {transform_indices = @transform_7, window_bounds = array<i64: 32, 128>}, {transform_indices = @transform_8, window_bounds = array<i64: 128, 128>}, {transform_indices = @transform_9, window_bounds = array<i64: 8, 128>}]} {
    %c0 = arith.constant 0 : index
    %c0_0 = arith.constant 0 : index
    %0 = vector.load %arg1[%c0, %c0_0] : memref<32x1024xbf16, #tpu.memory_space<vmem>>, vector<32x1024xbf16>
    %c0_1 = arith.constant 0 : index
    %c0_2 = arith.constant 0 : index
    %1 = vector.load %arg2[%c0_1, %c0_2] : memref<1024x128xbf16, #tpu.memory_space<vmem>>, vector<1024x128xbf16>
    %cst = arith.constant dense<0.000000e+00> : vector<32x128xf32>
    %2 = tpu.matmul %0, %1, %cst {dimension_numbers = #tpu.dot_dimension_numbers<[1], [0], [0], [1], [0, 0, 1, 1], [], []>} : vector<32x1024xbf16>, vector<1024x128xbf16>, vector<32x128xf32> -> vector<32x128xf32>
    %c0_3 = arith.constant 0 : index
    %c0_4 = arith.constant 0 : index
    %3 = vector.load %arg3[%c0_3, %c0_4] : memref<1x128xf32, #tpu.memory_space<vmem>>, vector<1x128xf32>
    %4 = vector.broadcast %3 : vector<1x128xf32> to vector<32x128xf32>
    %5 = arith.addf %2, %4 : vector<32x128xf32>
    %c0_5 = arith.constant 0 : index
    %c0_6 = arith.constant 0 : index
    %6 = vector.load %arg4[%c0_5, %c0_6] : memref<128x128xf32, #tpu.memory_space<vmem>>, vector<128x128xf32>
    %cst_7 = arith.constant dense<0.000000e+00> : vector<32x128xf32>
    %7 = tpu.matmul %5, %6, %cst_7 {dimension_numbers = #tpu.dot_dimension_numbers<[1], [0], [0], [1], [0, 0, 1, 1], [], []>} : vector<32x128xf32>, vector<128x128xf32>, vector<32x128xf32> -> vector<32x128xf32>
    %c0_8 = arith.constant 0 : index
    %c0_9 = arith.constant 0 : index
    %8 = vector.load %arg5[%c0_8, %c0_9] : memref<1x128xf32, #tpu.memory_space<vmem>>, vector<1x128xf32>
    %9 = vector.broadcast %8 : vector<1x128xf32> to vector<32x128xf32>
    %10 = arith.addf %7, %9 : vector<32x128xf32>
    %cst_10 = arith.constant dense<0.000000e+00> : vector<128xf32>
    %11 = vector.multi_reduction <add>, %10, %cst_10 [0] : vector<32x128xf32> to vector<128xf32>
    %12 = vector.shape_cast %11 : vector<128xf32> to vector<1x128xf32>
    %cst_11 = arith.constant 3.200000e+01 : f32
    %13 = vector.broadcast %cst_11 : f32 to vector<1x128xf32>
    %14 = arith.divf %12, %13 : vector<1x128xf32>
    %15 = vector.broadcast %14 : vector<1x128xf32> to vector<32x128xf32>
    %16 = arith.subf %10, %15 : vector<32x128xf32>
    %17 = arith.mulf %16, %16 : vector<32x128xf32>
    %cst_12 = arith.constant dense<0.000000e+00> : vector<128xf32>
    %18 = vector.multi_reduction <add>, %17, %cst_12 [0] : vector<32x128xf32> to vector<128xf32>
    %19 = vector.shape_cast %18 : vector<128xf32> to vector<1x128xf32>
    %cst_13 = arith.constant 3.200000e+01 : f32
    %20 = vector.broadcast %cst_13 : f32 to vector<1x128xf32>
    %21 = arith.divf %19, %20 : vector<1x128xf32>
    %22 = vector.broadcast %14 : vector<1x128xf32> to vector<32x128xf32>
    %23 = arith.subf %10, %22 : vector<32x128xf32>
    %cst_14 = arith.constant 9.99999974E-6 : f32
    %24 = vector.broadcast %cst_14 : f32 to vector<1x128xf32>
    %25 = arith.addf %21, %24 : vector<1x128xf32>
    %26 = math.rsqrt %25 : vector<1x128xf32>
    %27 = vector.broadcast %26 : vector<1x128xf32> to vector<32x128xf32>
    %28 = arith.mulf %23, %27 : vector<32x128xf32>
    %cst_15 = arith.constant 0.000000e+00 : f32
    %29 = vector.broadcast %cst_15 : f32 to vector<32x128xf32>
    %30 = arith.maximumf %28, %29 : vector<32x128xf32>
    %c0_16 = arith.constant 0 : index
    %c0_17 = arith.constant 0 : index
    %31 = vector.load %arg6[%c0_16, %c0_17] : memref<128x128xf32, #tpu.memory_space<vmem>>, vector<128x128xf32>
    %cst_18 = arith.constant dense<0.000000e+00> : vector<32x128xf32>
    %32 = tpu.matmul %30, %31, %cst_18 {dimension_numbers = #tpu.dot_dimension_numbers<[1], [0], [0], [1], [0, 0, 1, 1], [], []>} : vector<32x128xf32>, vector<128x128xf32>, vector<32x128xf32> -> vector<32x128xf32>
    %c0_19 = arith.constant 0 : index
    %c0_20 = arith.constant 0 : index
    %33 = vector.load %arg7[%c0_19, %c0_20] : memref<1x128xf32, #tpu.memory_space<vmem>>, vector<1x128xf32>
    %34 = vector.broadcast %33 : vector<1x128xf32> to vector<32x128xf32>
    %35 = arith.addf %32, %34 : vector<32x128xf32>
    %cst_21 = arith.constant dense<0.000000e+00> : vector<128xf32>
    %36 = vector.multi_reduction <add>, %35, %cst_21 [0] : vector<32x128xf32> to vector<128xf32>
    %37 = vector.shape_cast %36 : vector<128xf32> to vector<1x128xf32>
    %cst_22 = arith.constant 3.200000e+01 : f32
    %38 = vector.broadcast %cst_22 : f32 to vector<1x128xf32>
    %39 = arith.divf %37, %38 : vector<1x128xf32>
    %40 = vector.broadcast %39 : vector<1x128xf32> to vector<32x128xf32>
    %41 = arith.subf %35, %40 : vector<32x128xf32>
    %c0_23 = arith.constant 0 : index
    %c0_24 = arith.constant 0 : index
    %42 = vector.load %arg8[%c0_23, %c0_24] : memref<32x128xf32, #tpu.memory_space<vmem>>, vector<32x128xf32>
    tpu.vector_store %arg8[%c0_23, %c0_24], %41 {strides = array<i32>} : memref<32x128xf32, #tpu.memory_space<vmem>>, vector<32x128xf32>,
    %cst_25 = arith.constant dense<0.000000e+00> : vector<128x128xf32>
    %43 = tpu.matmul %41, %41, %cst_25 {dimension_numbers = #tpu.dot_dimension_numbers<[0], [0], [1], [1], [0, 1, 1, 1], [], []>} : vector<32x128xf32>, vector<32x128xf32>, vector<128x128xf32> -> vector<128x128xf32>
    %cst_26 = arith.constant 3.125000e-02 : f32
    %44 = vector.broadcast %cst_26 : f32 to vector<128x128xf32>
    %45 = arith.mulf %43, %44 : vector<128x128xf32>
    %c0_27 = arith.constant 0 : index
    %c0_28 = arith.constant 0 : index
    %46 = vector.load %arg9[%c0_27, %c0_28] : memref<128x128xf32, #tpu.memory_space<vmem>>, vector<128x128xf32>
    tpu.vector_store %arg9[%c0_27, %c0_28], %45 {strides = array<i32>} : memref<128x128xf32, #tpu.memory_space<vmem>>, vector<128x128xf32>,
    %47 = tpu.iota {dimensions = array<i32: 0>} : vector<128x128xi32>
    %48 = tpu.iota {dimensions = array<i32: 1>} : vector<128x128xi32>
    %49 = arith.cmpi eq, %47, %48 : vector<128x128xi32>
    %cst_29 = arith.constant 0.000000e+00 : f32
    %50 = vector.broadcast %cst_29 : f32 to vector<128x128xf32>
    %51 = arith.select %49, %45, %50 : vector<128x128xi1>, vector<128x128xf32>
    %cst_30 = arith.constant dense<0.000000e+00> : vector<128xf32>
    %52 = vector.multi_reduction <add>, %51, %cst_30 [1] : vector<128x128xf32> to vector<128xf32>
    %53 = vector.shape_cast %52 : vector<128xf32> to vector<128x1xf32>
    %cst_31 = arith.constant dense<0.000000e+00> : vector<128xf32>
    %54 = vector.multi_reduction <add>, %51, %cst_31 [0] : vector<128x128xf32> to vector<128xf32>
    %55 = vector.shape_cast %54 : vector<128xf32> to vector<1x128xf32>
    %cst_32 = arith.constant 0.000000e+00 : f32
    %56 = vector.broadcast %cst_32 : f32 to vector<128x1xf32>
    %57 = arith.cmpf ogt, %53, %56 : vector<128x1xf32>
    %58 = math.rsqrt %53 : vector<128x1xf32>
    %cst_33 = arith.constant 0.000000e+00 : f32
    %59 = vector.broadcast %cst_33 : f32 to vector<128x1xf32>
    %60 = arith.select %57, %58, %59 : vector<128x1xi1>, vector<128x1xf32>
    %cst_34 = arith.constant 0.000000e+00 : f32
    %61 = vector.broadcast %cst_34 : f32 to vector<1x128xf32>
    %62 = arith.cmpf ogt, %55, %61 : vector<1x128xf32>
    %63 = math.rsqrt %55 : vector<1x128xf32>
    %cst_35 = arith.constant 0.000000e+00 : f32
    %64 = vector.broadcast %cst_35 : f32 to vector<1x128xf32>
    %65 = arith.select %62, %63, %64 : vector<1x128xi1>, vector<1x128xf32>
    %66 = vector.broadcast %60 : vector<128x1xf32> to vector<128x128xf32>
    %67 = arith.mulf %45, %66 : vector<128x128xf32>
    %68 = vector.broadcast %65 : vector<1x128xf32> to vector<128x128xf32>
    %69 = arith.mulf %67, %68 : vector<128x128xf32>
    %70 = math.absf %69 : vector<128x128xf32>
    %cst_36 = arith.constant 0.000000e+00 : f32
    %71 = vector.broadcast %cst_36 : f32 to vector<128x128xf32>
    %72 = arith.select %49, %71, %70 : vector<128x128xi1>, vector<128x128xf32>
    %73 = vector.shape_cast %72 : vector<128x128xf32> to vector<1x128x128xf32>
    %cst_37 = arith.constant dense<0.000000e+00> : vector<1xf32>
    %74 = vector.multi_reduction <add>, %73, %cst_37 [1, 2] : vector<1x128x128xf32> to vector<1xf32>
    %75 = vector.shape_cast %74 : vector<1xf32> to vector<1x1x1xf32>
    %76 = vector.extract %75[0, 0, 0] : f32 from vector<1x1x1xf32>
    %cst_38 = arith.constant 2.560000e+02 : f32
    %77 = arith.divf %76, %cst_38 : f32
    %78 = vector.broadcast %77 : f32 to vector<8x128xf32>
    %c0_39 = arith.constant 0 : index
    %c0_40 = arith.constant 0 : index
    %79 = vector.load %arg10[%c0_39, %c0_40] : memref<8x128xf32, #tpu.memory_space<vmem>>, vector<8x128xf32>
    tpu.vector_store %arg10[%c0_39, %c0_40], %78 {strides = array<i32>} : memref<8x128xf32, #tpu.memory_space<vmem>>, vector<8x128xf32>,
    return
  }
  func.func @transform_0(%arg0: i32) -> (i32, i32) {
    %c0_i32 = arith.constant 0 : i32
    %c0_i32_0 = arith.constant 0 : i32
    return %arg0, %c0_i32 : i32, i32
  }
  func.func @transform_1(%arg0: i32) -> (i32, i32) {
    %c0_i32 = arith.constant 0 : i32
    %c0_i32_0 = arith.constant 0 : i32
    %c0_i32_1 = arith.constant 0 : i32
    return %c0_i32, %c0_i32_0 : i32, i32
  }
  func.func @transform_2(%arg0: i32) -> (i32, i32) {
    %c0_i32 = arith.constant 0 : i32
    %c0_i32_0 = arith.constant 0 : i32
    %c0_i32_1 = arith.constant 0 : i32
    return %c0_i32, %c0_i32_0 : i32, i32
  }
  func.func @transform_3(%arg0: i32) -> (i32, i32) {
    %c0_i32 = arith.constant 0 : i32
    %c0_i32_0 = arith.constant 0 : i32
    %c0_i32_1 = arith.constant 0 : i32
    return %c0_i32, %c0_i32_0 : i32, i32
  }
  func.func @transform_4(%arg0: i32) -> (i32, i32) {
    %c0_i32 = arith.constant 0 : i32
    %c0_i32_0 = arith.constant 0 : i32
    %c0_i32_1 = arith.constant 0 : i32
    return %c0_i32, %c0_i32_0 : i32, i32
  }
  func.func @transform_5(%arg0: i32) -> (i32, i32) {
    %c0_i32 = arith.constant 0 : i32
    %c0_i32_0 = arith.constant 0 : i32
    %c0_i32_1 = arith.constant 0 : i32
    return %c0_i32, %c0_i32_0 : i32, i32
  }
  func.func @transform_6(%arg0: i32) -> (i32, i32) {
    %c0_i32 = arith.constant 0 : i32
    %c0_i32_0 = arith.constant 0 : i32
    %c0_i32_1 = arith.constant 0 : i32
    return %c0_i32, %c0_i32_0 : i32, i32
  }
  func.func @transform_7(%arg0: i32) -> (i32, i32) {
    %c0_i32 = arith.constant 0 : i32
    %c0_i32_0 = arith.constant 0 : i32
    return %arg0, %c0_i32 : i32, i32
  }
  func.func @transform_8(%arg0: i32) -> (i32, i32) {
    %c0_i32 = arith.constant 0 : i32
    %c0_i32_0 = arith.constant 0 : i32
    return %arg0, %c0_i32 : i32, i32
  }
  func.func @transform_9(%arg0: i32) -> (i32, i32) {
    %c0_i32 = arith.constant 0 : i32
    %c0_i32_0 = arith.constant 0 : i32
    return %arg0, %c0_i32 : i32, i32
  }
}

module attributes {stable_mosaic.version = 11 : i64} {
  func.func @whiten_loss_kernel(%arg0: memref<64x128xf32, #tpu.memory_space<vmem>>, %arg1: memref<256x128xf32, #tpu.memory_space<vmem>>, %arg2: memref<128x128xf32, #tpu.memory_space<vmem>>, %arg3: memref<2xf32, #tpu.memory_space<smem>>) attributes {dimension_semantics = [], scalar_prefetch = 0 : i64, scratch_operands = 0 : i64, tpu.core_type = #tpu.core_type<tc>} {
    %c0 = arith.constant 0 : index
    %c0_0 = arith.constant 0 : index
    %0 = vector.load %arg0[%c0, %c0_0] : memref<64x128xf32, #tpu.memory_space<vmem>>, vector<64x128xf32>
    %c0_1 = arith.constant 0 : index
    %c0_2 = arith.constant 0 : index
    %1 = vector.load %arg1[%c0_1, %c0_2] : memref<256x128xf32, #tpu.memory_space<vmem>>, vector<256x128xf32>
    %2 = vector.extract_strided_slice %0 {offsets = [0, 0], sizes = [32, 128], strides = [1, 1]} : vector<64x128xf32> to vector<32x128xf32>
    %3 = vector.extract_strided_slice %1 {offsets = [0, 0], sizes = [128, 128], strides = [1, 1]} : vector<256x128xf32> to vector<128x128xf32>
    %cst = arith.constant dense<0.000000e+00> : vector<32x128xf32>
    %4 = tpu.matmul %2, %3, %cst {dimension_numbers = #tpu.dot_dimension_numbers<[1], [0], [0], [1], [0, 0, 1, 1], [], []>} : vector<32x128xf32>, vector<128x128xf32>, vector<32x128xf32> -> vector<32x128xf32>
    %5 = vector.extract_strided_slice %0 {offsets = [32, 0], sizes = [32, 128], strides = [1, 1]} : vector<64x128xf32> to vector<32x128xf32>
    %6 = vector.extract_strided_slice %1 {offsets = [128, 0], sizes = [128, 128], strides = [1, 1]} : vector<256x128xf32> to vector<128x128xf32>
    %cst_3 = arith.constant dense<0.000000e+00> : vector<32x128xf32>
    %7 = tpu.matmul %5, %6, %cst_3 {dimension_numbers = #tpu.dot_dimension_numbers<[1], [0], [0], [1], [0, 0, 1, 1], [], []>} : vector<32x128xf32>, vector<128x128xf32>, vector<32x128xf32> -> vector<32x128xf32>
    %cst_4 = arith.constant dense<0.000000e+00> : vector<128xf32>
    %8 = vector.multi_reduction <add>, %4, %cst_4 [0] : vector<32x128xf32> to vector<128xf32>
    %9 = vector.shape_cast %8 : vector<128xf32> to vector<1x128xf32>
    %cst_5 = arith.constant 3.200000e+01 : f32
    %10 = vector.broadcast %cst_5 : f32 to vector<1x128xf32>
    %11 = arith.divf %9, %10 : vector<1x128xf32>
    %12 = vector.broadcast %11 : vector<1x128xf32> to vector<32x128xf32>
    %13 = arith.subf %4, %12 : vector<32x128xf32>
    %cst_6 = arith.constant dense<0.000000e+00> : vector<128x128xf32>
    %14 = tpu.matmul %13, %13, %cst_6 {dimension_numbers = #tpu.dot_dimension_numbers<[0], [0], [1], [1], [0, 1, 1, 1], [], []>} : vector<32x128xf32>, vector<32x128xf32>, vector<128x128xf32> -> vector<128x128xf32>
    %cst_7 = arith.constant 0.0322580636 : f32
    %15 = vector.broadcast %cst_7 : f32 to vector<128x128xf32>
    %16 = arith.mulf %14, %15 : vector<128x128xf32>
    %c0_8 = arith.constant 0 : index
    %c0_9 = arith.constant 0 : index
    %17 = vector.load %arg2[%c0_8, %c0_9] : memref<128x128xf32, #tpu.memory_space<vmem>>, vector<128x128xf32>
    tpu.vector_store %arg2[%c0_8, %c0_9], %16 {strides = array<i32>} : memref<128x128xf32, #tpu.memory_space<vmem>>, vector<128x128xf32>,
    %18 = tpu.iota {dimensions = array<i32: 0>} : vector<128x128xi32>
    %19 = tpu.iota {dimensions = array<i32: 1>} : vector<128x128xi32>
    %20 = arith.cmpi eq, %18, %19 : vector<128x128xi32>
    %cst_10 = arith.constant 0.000000e+00 : f32
    %21 = vector.broadcast %cst_10 : f32 to vector<128x128xf32>
    %22 = arith.select %20, %16, %21 : vector<128x128xi1>, vector<128x128xf32>
    %cst_11 = arith.constant dense<0.000000e+00> : vector<128xf32>
    %23 = vector.multi_reduction <add>, %22, %cst_11 [1] : vector<128x128xf32> to vector<128xf32>
    %24 = vector.shape_cast %23 : vector<128xf32> to vector<128x1xf32>
    %cst_12 = arith.constant dense<0.000000e+00> : vector<128xf32>
    %25 = vector.multi_reduction <add>, %22, %cst_12 [0] : vector<128x128xf32> to vector<128xf32>
    %26 = vector.shape_cast %25 : vector<128xf32> to vector<1x128xf32>
    %cst_13 = arith.constant 0.000000e+00 : f32
    %27 = vector.broadcast %cst_13 : f32 to vector<128x1xf32>
    %28 = arith.cmpf ogt, %24, %27 : vector<128x1xf32>
    %29 = math.rsqrt %24 : vector<128x1xf32>
    %cst_14 = arith.constant 0.000000e+00 : f32
    %30 = vector.broadcast %cst_14 : f32 to vector<128x1xf32>
    %31 = arith.select %28, %29, %30 : vector<128x1xi1>, vector<128x1xf32>
    %cst_15 = arith.constant 0.000000e+00 : f32
    %32 = vector.broadcast %cst_15 : f32 to vector<1x128xf32>
    %33 = arith.cmpf ogt, %26, %32 : vector<1x128xf32>
    %34 = math.rsqrt %26 : vector<1x128xf32>
    %cst_16 = arith.constant 0.000000e+00 : f32
    %35 = vector.broadcast %cst_16 : f32 to vector<1x128xf32>
    %36 = arith.select %33, %34, %35 : vector<1x128xi1>, vector<1x128xf32>
    %37 = vector.broadcast %31 : vector<128x1xf32> to vector<128x128xf32>
    %38 = arith.mulf %16, %37 : vector<128x128xf32>
    %39 = vector.broadcast %36 : vector<1x128xf32> to vector<128x128xf32>
    %40 = arith.mulf %38, %39 : vector<128x128xf32>
    %41 = math.absf %40 : vector<128x128xf32>
    %cst_17 = arith.constant 0.000000e+00 : f32
    %42 = vector.broadcast %cst_17 : f32 to vector<128x128xf32>
    %43 = arith.select %20, %42, %41 : vector<128x128xi1>, vector<128x128xf32>
    %44 = vector.shape_cast %43 : vector<128x128xf32> to vector<1x128x128xf32>
    %cst_18 = arith.constant dense<0.000000e+00> : vector<1xf32>
    %45 = vector.multi_reduction <add>, %44, %cst_18 [1, 2] : vector<1x128x128xf32> to vector<1xf32>
    %46 = vector.shape_cast %45 : vector<1xf32> to vector<1x1x1xf32>
    %47 = vector.extract %46[0, 0, 0] : f32 from vector<1x1x1xf32>
    %cst_19 = arith.constant 2.560000e+02 : f32
    %48 = arith.divf %47, %cst_19 : f32
    %49 = arith.mulf %4, %4 : vector<32x128xf32>
    %cst_20 = arith.constant dense<0.000000e+00> : vector<32xf32>
    %50 = vector.multi_reduction <add>, %49, %cst_20 [1] : vector<32x128xf32> to vector<32xf32>
    %51 = vector.shape_cast %50 : vector<32xf32> to vector<32x1xf32>
    %52 = arith.mulf %7, %7 : vector<32x128xf32>
    %cst_21 = arith.constant dense<0.000000e+00> : vector<32xf32>
    %53 = vector.multi_reduction <add>, %52, %cst_21 [1] : vector<32x128xf32> to vector<32xf32>
    %54 = vector.shape_cast %53 : vector<32xf32> to vector<32x1xf32>
    %55 = arith.mulf %4, %7 : vector<32x128xf32>
    %cst_22 = arith.constant dense<0.000000e+00> : vector<32xf32>
    %56 = vector.multi_reduction <add>, %55, %cst_22 [1] : vector<32x128xf32> to vector<32xf32>
    %57 = vector.shape_cast %56 : vector<32xf32> to vector<32x1xf32>
    %cst_23 = arith.constant 1.000000e-16 : f32
    %58 = vector.broadcast %cst_23 : f32 to vector<32x1xf32>
    %59 = arith.maximumf %51, %58 : vector<32x1xf32>
    %60 = math.rsqrt %59 : vector<32x1xf32>
    %61 = arith.mulf %57, %60 : vector<32x1xf32>
    %cst_24 = arith.constant 1.000000e-16 : f32
    %62 = vector.broadcast %cst_24 : f32 to vector<32x1xf32>
    %63 = arith.maximumf %54, %62 : vector<32x1xf32>
    %64 = math.rsqrt %63 : vector<32x1xf32>
    %65 = arith.mulf %61, %64 : vector<32x1xf32>
    %c0_25 = arith.constant 0 : index
    %66 = memref.load %arg3[%c0_25] : memref<2xf32, #tpu.memory_space<smem>>
    memref.store %48, %arg3[%c0_25] : memref<2xf32, #tpu.memory_space<smem>>
    %67 = vector.shape_cast %65 : vector<32x1xf32> to vector<1x32x1xf32>
    %cst_26 = arith.constant dense<0.000000e+00> : vector<1xf32>
    %68 = vector.multi_reduction <add>, %67, %cst_26 [1, 2] : vector<1x32x1xf32> to vector<1xf32>
    %69 = vector.shape_cast %68 : vector<1xf32> to vector<1x1x1xf32>
    %70 = vector.extract %69[0, 0, 0] : f32 from vector<1x1x1xf32>
    %cst_27 = arith.constant 0.000000e+00 : f32
    %71 = arith.subf %cst_27, %70 : f32
    %cst_28 = arith.constant 3.200000e+01 : f32
    %72 = arith.divf %71, %cst_28 : f32
    %c1 = arith.constant 1 : index
    %73 = memref.load %arg3[%c1] : memref<2xf32, #tpu.memory_space<smem>>
    memref.store %72, %arg3[%c1] : memref<2xf32, #tpu.memory_space<smem>>
    return
  }
}

</mosaic_0001>

<bundles_post_ra>
// kernel: custom-call.5
= control target key start
LH: loop header
LB: loop body
LE: loop exit
PB: predicated region body
PF: predicated region fallthrough
CT: control target
= control target key end

     0   :  { %s1672_s30 = smov 0   ;;  %s1674_s10 = smov 0   ;;  %s1981_s0 = inlined_call_operand.vmem [shape: f32[2,8,8], index: 0, kind: input, shape index: {}]   ;;  %s1982_s1 = inlined_call_operand.vmem [shape: f32[2,8,8], index: 1, kind: input, shape index: {}]   ;;  %s1983_s2 = inlined_call_operand.vmem [shape: f32[2,8,8], index: 2, kind: input, shape index: {}]   ;;  %s1984_s3 = inlined_call_operand.vmem [shape: f32[2,8,8], index: 3, kind: input, shape index: {}]   ;;  %s1985_s4 = inlined_call_operand.vmem [shape: f32[2,8], index: 4, kind: output, shape index: {0}]   ;;  %s1986_s5 = inlined_call_operand.vmem [shape: f32[2,8], index: 5, kind: output, shape index: {1}]   ;;  %s1987_s6 = inlined_call_operand.vmem [shape: f32[2,8,8], index: 6, kind: output, shape index: {2}]   ;;  %s1988_s7 = inlined_call_operand.vmem [shape: f32[2,8,8], index: 7, kind: output, shape index: {3}]   ;;  %s1989_s8 = inlined_call_operand.vmem [shape: f32[2,8,8], index: 8, kind: output, shape index: {4}]   ;;  %s1990_s9 = inlined_call_operand.vmem [shape: f32[2,8,8], index: 9, kind: output, shape index: {5}]  }
   0x1   :  { %s1676_s11 = smov 0  }
   0x2 LB: > { %s1688_s12 = sadd.s32 4294967295, %s1609_s11   ;;  %s1691_s13 = sadd.s32 1, %s1609_s11   ;;  %s1609_s11 = sphi %s1676_s11, %s1999_s11   ;;  %s1605_s10 = sphi %s1674_s10, %s1998_s10   ;;  %s1601_s30 = sphi %s1672_s30, %s1997_s30  }
   0x3   : > { %s20_s14 = sshrl.u32 %s1609_s11, 3  ;;  %s21_s15 = sshrl.u32 %s1691_s13, 3 }
   0x4   : > { %s22_s16 = ssub.s32 %s20_s14, %s21_s15  ;;  %s25_s17 = sadd.s32 1, %s1605_s10 }
   0x5   : > { %p23_p0 = scmp.eq.s32.totalorder %s22_s16, 0  ;;  %p35_p1 = scmp.ne.s32.totalorder %s1605_s10, %s1601_s30 }
   0x6   : > { %p36_p2 = scmp.eq.s32.totalorder %s1688_s12, 1  ;;  %p1470_p4 = scmp.ge.s32.totalorder %s1609_s11, 2 }
   0x7   : > { %s1700_s18 = scalar_select %p23_p0, %s1605_s10, %s25_s17  }
   0x8   : > { %p1702_p3 = por %p36_p2, %p35_p1  ;;  %86 = sbr.rel (%p1470_p4) target bundleno = 17 (0x11), region = 16 }
   0x9   : > { %1991 = sst [smem:[#allocation25_spill]] %s1700_s18  ;;  %s88_s20 = sand.u32 (!%p1470_p4), 1, %s1609_s11  }
   0xa   : > { %s1472_s21 = sshll.u32 (!%p1470_p4), %s1609_s11, 3  ;;  %s1471_s22 = sshll.u32 (!%p1470_p4), %s88_s20, 3 }
   0xb   : > { %s92_s25 = scalar_lea.vmem (!%p1470_p4), %s1981_s0, %s1472_s21  ;;  %s90_s26 = scalar_lea.vmem (!%p1470_p4), [#allocation0], %s1471_s22 }
   0xc   : > { %v120_v0 = vld [vmem:[%s92_s25] sm:$0xff] (!%p1470_p4)  ;;  %s130_s29 = scalar_lea.vmem (!%p1470_p4), %s1982_s1, %s1472_s21  ;;  %s168_s16 = scalar_lea.vmem (!%p1470_p4), %s1983_s2, %s1472_s21 }
   0xd   : > { %121 = vst [vmem:[%s90_s26] sm:$0xff] (!%p1470_p4), %v120_v0  ;;  %v158_v1 = vld [vmem:[%s130_s29] sm:$0xff] (!%p1470_p4)  ;;  %s128_s17 = scalar_lea.vmem (!%p1470_p4), [#allocation1], %s1471_s22  ;;  %s206_s23 = scalar_lea.vmem (!%p1470_p4), %s1984_s3, %s1472_s21 }
   0xe   : > { %159 = vst [vmem:[%s128_s17] sm:$0xff] (!%p1470_p4), %v158_v1  ;;  %v196_v2 = vld [vmem:[%s168_s16] sm:$0xff] (!%p1470_p4)  ;;  %s166_s24 = scalar_lea.vmem (!%p1470_p4), [#allocation2], %s1471_s22  ;;  %s204_s25 = scalar_lea.vmem (!%p1470_p4), [#allocation3], %s1471_s22 }
   0xf   : > { %197 = vst [vmem:[%s166_s24] sm:$0xff] %v196_v2  ;;  %v234_v3 = vld [vmem:[%s206_s23] sm:$0xff] }
  0x10   : > { %235 = vst [vmem:[%s204_s25] sm:$0xff] %v234_v3 }
  0x11 PF: > { %p1479_p5 = scmp.ge.s32.totalorder %s1609_s11, 1  ;;  %p240_p6 = scmp.lt.s32.totalorder %s1609_s11, 3 }
  0x13   : > { %p241_p7 = pnand %p1479_p5, %p240_p6 }
  0x15   : > { %244 = sbr.rel (%p241_p7) target bundleno = 992 (0x3e0), region = 156 }
  0x1c   : > { %s247_s26 = sand.u32 1, %s1688_s12   ;;  %s281_s27 = sand.u32 1, %s1601_s30   ;;  %v325_v4 = vlaneseq  ;;  %v1619_v11 = vmov 0.0  }
  0x1d   : > { %s1480_s28 = sshll.u32 %s247_s26, 3  ;;  %s1725_s18 = sshll.u32 %s281_s27, 1 }
  0x1e   : > { %v1727_v5 = vand.u32 127, %v325_v4  ;;  %v1729_v6 = vshrl.u32 %v325_v4, 7  ;;  %s249_s21 = scalar_lea.vmem [#allocation0], %s1480_s28  ;;  %s253_s22 = scalar_lea.vmem [#allocation1], %s1480_s28 }
  0x1f   : > { %v309_v7 = vld [vmem:[%s249_s21] sm:$0xff]  ;;  %v312_v8 = vld [vmem:[%s253_s22] sm:$0xff]  ;;  %s257_s29 = scalar_lea.vmem [#allocation2], %s1480_s28  ;;  %s261_s11 = scalar_lea.vmem [#allocation3], %s1480_s28 }
  0x20   : > { %v315_v9 = vld [vmem:[%s257_s29] sm:$0xff]  ;;  %v318_v10 = vld [vmem:[%s261_s11] sm:$0xff]  ;;  %s1731_s14 = scalar_lea.vmem [#allocation8], %s1480_s28  ;;  %s1734_s30 = scalar_lea.vmem [#allocation9], %s1480_s28  ;;  %v327_v5 = vmov %v1727_v5  ;;  %v330_v6 = vmov %v1729_v6  ;;  %vm1359_vm2 = vcmp.lt.s32.totalorder %v1727_v5, 8 }
  0x21   : > { %320 = vst [vmem:[%s1731_s14] sm:$0xff] %v1619_v11  ;;  %321 = vst [vmem:[%s1734_s30] sm:$0xff] %v1619_v11  ;;  %s308_s15 = smov [#allocation12]  ;;  %s311_s16 = smov [#allocation13]  ;;  %v340_v5 = vmov %v1727_v5  ;;  %v343_v6 = vmov %v1729_v6  ;;  %vm334_vm0 = vcmp.eq.s32.totalorder %v330_v6, %v327_v5 }
  0x22   : > { %s1737_s17 = scalar_lea.vmem [#allocation10], %s1480_s28  ;;  %s1740_s20 = scalar_lea.vmem [#allocation11], %s1480_s28  ;;  %310 = vst [vmem:[%s308_s15] sm:$0xff] %v309_v7  ;;  %313 = vst [vmem:[%s311_s16] sm:$0xff] %v312_v8  ;;  %vm347_vm1 = vcmp.eq.s32.totalorder %v343_v6, %v340_v5  ;;  %v1351_v5 = vmov %v1727_v5  ;;  %v1354_v6 = vmov %v1729_v6 }
  0x23   : > { %322 = vst [vmem:[%s1737_s17] sm:$0xff] %v1619_v11  ;;  %323 = vst [vmem:[%s1740_s20] sm:$0xff] %v1619_v11  ;;  %s314_s23 = smov [#allocation14]  ;;  %s317_s24 = smov [#allocation15]  ;;  %vm1364_vm3 = vcmp.eq.s32.totalorder %v1354_v6, %v1351_v5  ;;  %v1402_v5 = vmov %v1727_v5  ;;  %v1371_v6 = vmov %v1729_v6 }
  0x24   : > { %316 = vst [vmem:[%s314_s23] sm:$0xff] %v315_v9  ;;  %319 = vst [vmem:[%s317_s24] sm:$0xff] %v318_v10  ;;  %s324_s14 = smov %s1731_s14  ;;  %s337_s20 = smov %s1740_s20  ;;  %v1368_v5 = vmov %v1727_v5  ;;  %v1405_v6 = vmov %v1729_v6 }
  0x25   : > { %s283_s25 = scalar_lea.vmem [#allocation5], %s1725_s18  ;;  %s1355_s27 = smov [#allocation12]  ;;  %v1385_v5 = vmov %v1727_v5  ;;  %v1388_v6 = vmov %v1729_v6  ;;  %vm1415_vm4 = vcmp.eq.s32.totalorder %v1405_v6, %v1402_v5 }
  0x26   : > { %s1372_s28 = smov [#allocation13]  ;;  %s1389_s21 = smov [#allocation14] }
  0x27   : > { %s1406_s22 = smov [#allocation15] }
  0x28   : > { %v331_v12 = vld [vmem:[%s324_s14] sm:$0xff] }
  0x29   : > { %v335_v13 = vsel %vm334_vm0, 1.0, %v331_v12  ;;  %v1361_v16 = vld [vmem:[%s1355_s27] sm:$0xff] }
  0x2a   : > { %v344_v14 = vld [vmem:[%s337_s20] sm:$0xff]  ;;  %336 = vst [vmem:[%s324_s14] sm:$0xff] %v335_v13  ;;  %v1362_v18 = vsel %vm1359_vm2, %v1361_v16, 0.0 }
  0x2b   : > { %v348_v15 = vsel %vm347_vm1, 1.0, %v344_v14  ;;  %v1378_v17 = vld [vmem:[%s1372_s28] sm:$0xff]  ;;  %v1363_v22 = vmul.f32 %v1362_v18, %v1362_v18 }
  0x2c   : > { %349 = vst [vmem:[%s337_s20] sm:$0xff] %v348_v15  ;;  %v1379_v19 = vsel %vm1359_vm2, %v1378_v17, 0.0  ;;  %v1395_v20 = vld [vmem:[%s1389_s21] sm:$0xff] }
  0x2d   : > { %v1412_v21 = vld [vmem:[%s1406_s22] sm:$0xff]  ;;  %v1380_v23 = vmul.f32 %v1379_v19, %v1379_v19  ;;  %v1396_v24 = vsel %vm1359_vm2, %v1395_v20, 0.0  ;;  %v1365_v29 = vsel %vm1364_vm3, 0.0, %v1363_v22 }
  0x2e   : > { %v1413_v25 = vsel %vm1359_vm2, %v1412_v21, 0.0  ;;  %v1397_v26 = vmul.f32 %v1396_v24, %v1396_v24 }
  0x2f   : > { %v1382_v27 = vadd.f32 %v1380_v23, %v1363_v22  ;;  %v1414_v28 = vmul.f32 %v1413_v25, %v1413_v25  ;;  %v1381_v30 = vadd.f32 %v1380_v23, %v1365_v29 }
  0x31   : > { %v1399_v31 = vadd.f32 %v1397_v26, %v1382_v27  ;;  %v1398_v32 = vadd.f32 %v1397_v26, %v1381_v30  ;;  %v1416_v33 = vsel %vm1415_vm4, 0.0, %v1414_v28 }
  0x33   : > { %v1418_v34 = vadd.f32 %v1414_v28, %v1399_v31  ;;  %v1417_v35 = vadd.f32 %v1416_v33, %v1398_v32 }
  0x35   : > { %1419 = vadd.xlane.f32.xlu0 %v1418_v34 }
  0x39   : > { %1427 = vadd.xlane.f32.xlu0 %v1417_v35 }
  0xc2   : > { %v1420_v36 = vpop.xlane.xlu0 %1419 }
  0xc3   : > { %v1421_v37 = vrot.slane %v1420_v36, 4 }
  0xc5   : > { %v1422_v38 = vadd.f32 %v1421_v37, %v1420_v36 }
  0xc6   : > { %v1428_v39 = vpop.xlane.xlu0 %1427 }
  0xc7   : > { %v1423_v40 = vrot.slane %v1422_v38, 2  ;;  %v1429_v41 = vrot.slane %v1428_v39, 4 }
  0xc9   : > { %v1430_v42 = vadd.f32 %v1429_v41, %v1428_v39  ;;  %v1424_v43 = vadd.f32 %v1423_v40, %v1422_v38 }
  0xcb   : > { %v1431_v44 = vrot.slane %v1430_v42, 2  ;;  %v1425_v46 = vrot.slane %v1424_v43, 1 }
  0xcd   : > { %v1432_v45 = vadd.f32 %v1431_v44, %v1430_v42  ;;  %v1426_v49 = vadd.f32 %v1425_v46, %v1424_v43 }
  0xcf   : > { %v1433_v47 = vrot.slane %v1432_v45, 1 }
  0xd1   : > { %v1434_v48 = vadd.f32 %v1433_v47, %v1432_v45 }
  0xd3   : > { %1520 = vpush %v1434_v48 }
  0xd4   : > { %1522 = vpush %v1426_v49 }
 0x104   : > { %s1521_s29 = spop %1520 }
 0x105   : > { %s1523_s11 = spop %1522 }
 0x106   : > { %s1437_s15 = smul.f32 1e-10, %s1523_s11 }
 0x108   : > { %p1438_p8 = scmp.le.f32.partialorder %s1521_s29, %s1437_s15 }
 0x109   : > { %s1769_s16 = smov (!%p1438_p8), 0  }
 0x10a   : > { %1441 = sbr.rel (%p1438_p8) target bundleno = 948 (0x3b4), region = 499 }
 0x111 LB: >> { %s1774_s23 = smov 0   ;;  %s1613_s16 = sphi %s1769_s16, %s1993_s16  }
 0x112 LB: >>> { %s454_s24 = smov [#allocation12]  ;;  %v458_v5 = vmov %v1727_v5  ;;  %v461_v6 = vmov %v1729_v6  ;;  %s474_s27 = smov [#allocation13]  ;;  %vm777_vm14 = vcmp.eq.s32.totalorder %v1729_v6, 0  ;;  %vm789_vm15 = vcmp.eq.s32.totalorder %v1729_v6, 7  ;;  %s1617_s23 = sphi %s1774_s23, %s453_s23  }
 0x113   : >>> { %v478_v5 = vmov %v1727_v5  ;;  %v481_v6 = vmov %v1729_v6  ;;  %v462_v50 = vld [vmem:[%s454_s24] sm:$0xff]  ;;  %vm465_vm5 = vcmp.eq.s32.totalorder %v461_v6, %v458_v5  ;;  %s494_s28 = smov [#allocation15]  ;;  %s455_s21 = smov [#allocation16] }
 0x114   : >>> { %vm485_vm6 = vcmp.eq.s32.totalorder %v481_v6, %v478_v5  ;;  %v498_v5 = vmov %v1727_v5  ;;  %v501_v6 = vmov %v1729_v6  ;;  %v466_v51 = vsel %vm465_vm5, %v462_v50, 0.0  ;;  %v482_v52 = vld [vmem:[%s474_s27] sm:$0xff]  ;;  %s475_s22 = smov [#allocation17]  ;;  %s495_s29 = smov [#allocation18] }
 0x115   : >>> { %vm505_vm7 = vcmp.eq.s32.totalorder %v501_v6, %v498_v5  ;;  %v467_v53 = vrot.slane %v466_v51, 4  ;;  %v486_v54 = vsel %vm485_vm6, %v482_v52, 0.0  ;;  %v502_v55 = vld [vmem:[%s494_s28] sm:$0xff]  ;;  %s518_s11 = smov [#allocation17]  ;;  %s516_s15 = smov [#allocation16]  ;;  %v567_v5 = vmov %v1727_v5 }
 0x116   : >>> { %v487_v56 = vrot.slane %v486_v54, 4  ;;  %v506_v57 = vsel %vm505_vm7, %v502_v55, 0.0  ;;  %s520_s24 = smov [#allocation18]  ;;  %s555_s27 = smov [#allocation19]  ;;  %v570_v6 = vmov %v1729_v6  ;;  %v582_v5 = vmov %v1727_v5 }
 0x117   : >>> { %v468_v58 = vadd.f32 %v467_v53, %v466_v51  ;;  %v507_v59 = vrot.slane %v506_v57, 4  ;;  %s557_s28 = smov [#allocation20]  ;;  %v585_v6 = vmov %v1729_v6  ;;  %vm572_vm12 = vcmp.eq.s32.totalorder %v570_v6, %v567_v5  ;;  %s1796_s14 = smov %s1731_s14 }
 0x118   : >>> { %v488_v60 = vadd.f32 %v487_v56, %v486_v54  ;;  %vm587_vm13 = vcmp.eq.s32.totalorder %v585_v6, %v582_v5  ;;  %s1799_s30 = smov %s1734_s30  ;;  %s1802_s17 = smov %s1737_s17  ;;  %v825_v52 = vld [vmem:[%s1796_s14] sm:$0xff]  ;;  %v680_v5 = vmov %v1727_v5  ;;  %v683_v6 = vmov %v1729_v6 }
 0x119   : >>> { %v469_v61 = vrot.slane %v468_v58, 2  ;;  %v508_v62 = vadd.f32 %v507_v59, %v506_v57  ;;  %s1806_s20 = smov %s1740_s20  ;;  %v826_v53 = vld [vmem:[%s1799_s30] sm:$0xff]  ;;  %s819_s26 = smov [#allocation24]  ;;  %v653_v5 = vmov %v1727_v5  ;;  %v656_v6 = vmov %v1729_v6 }
 0x11a   : >>> { %v489_v63 = vrot.slane %v488_v60, 2  ;;  %v827_v56 = vld [vmem:[%s1802_s17] sm:$0xff]  ;;  %v694_v5 = vmov %v1727_v5  ;;  %v697_v6 = vmov %v1729_v6  ;;  %vm687_vm0 = vcmp.eq.s32.totalorder %v683_v6, %v680_v5  ;;  %s453_s23 = sadd.s32 1, %s1617_s23  }
 0x11b   : >>> { %v470_v0 = vadd.f32 %v469_v61, %v468_v58  ;;  %v509_v1 = vrot.slane %v508_v62, 2  ;;  %v828_v57 = vld [vmem:[%s1806_s20] sm:$0xff]  ;;  %v667_v5 = vmov %v1727_v5  ;;  %v670_v6 = vmov %v1729_v6  ;;  %p450_p9 = scmp.ge.s32.totalorder %s453_s23, 15  }
 0x11c   : >>> { %v490_v2 = vadd.f32 %v489_v63, %v488_v60  ;;  %vm661_vm1 = vcmp.eq.s32.totalorder %v656_v6, %v653_v5  ;;  %vm702_vm3 = vcmp.eq.s32.totalorder %v697_v6, %v694_v5  ;;  %vm674_vm4 = vcmp.eq.s32.totalorder %v670_v6, %v667_v5 }
 0x11d   : >>> { %v471_v3 = vrot.slane %v470_v0, 1  ;;  %v510_v4 = vadd.f32 %v509_v1, %v508_v62  ;;  %vm716_vm5 = vcmp.eq.s32.totalorder %v1727_v5, 0  ;;  %vm720_vm6 = vcmp.eq.s32.totalorder %v1727_v5, 1 }
 0x11e   : >>> { %v491_v7 = vrot.slane %v490_v2, 1  ;;  %vm733_vm7 = vcmp.eq.s32.totalorder %v1727_v5, 7  ;;  %v354_v5 = vmov (%p450_p9), %v1727_v5  ;;  %v357_v6 = vmov (%p450_p9), %v1729_v6 }
 0x11f   : >>> { %v472_v8 = vadd.f32 %v471_v3, %v470_v0  ;;  %v511_v9 = vrot.slane %v510_v4, 1  ;;  %v407_v5 = vmov (%p450_p9), %v1727_v5 }
 0x120   : >>> { %v492_v10 = vadd.f32 %v491_v7, %v490_v2 }
 0x121   : >>> { %473 = vst [vmem:[%s455_s21] sm:$0x1] %v472_v8  ;;  %v512_v11 = vadd.f32 %v511_v9, %v510_v4  ;;  %s514_s21 = smov [#allocation21] }
 0x122   : >>> { %493 = vst [vmem:[%s475_s22] sm:$0x1] %v492_v10  ;;  %s515_s22 = smov [#allocation22]  ;;  %s559_s21 = smov %s514_s21 }
 0x123   : >>> { %513 = vst [vmem:[%s495_s29] sm:$0x1] %v512_v11  ;;  %s561_s22 = smov %s515_s22  ;;  %s563_s29 = smov [#allocation21] }
 0x128   : >>> { %v517_v14 = vld [vmem:[%s516_s15] sm:$0xff]  ;;  %s576_s15 = smov [#allocation23] }
 0x129   : >>> { %v519_v12 = vld [vmem:[%s518_s11] sm:$0xff]  ;;  %v540_v27 = vand.u32 2147483647, %v517_v14  ;;  %s578_s11 = smov [#allocation22] }
 0x12a   : >>> { %v523_v13 = vmul.f32 2.0, %v519_v12  ;;  %v521_v15 = vld [vmem:[%s520_s24] sm:$0xff]  ;;  %v541_v32 = vand.u32 2147483647, %v519_v12  ;;  %s593_s24 = smov [#allocation23] }
 0x12b   : >>> { %v522_v16 = vsub.f32 %v521_v15, %v517_v14  ;;  %v542_v28 = vand.u32 2147483647, %v521_v15 }
 0x12c   : >>> { %1571 = vrcp.f32 %v523_v13 }
 0x12d   : >>> { %v543_v31 = vmin.f32 %v540_v27, %v542_v28 }
 0x12f   : >>> { %v544_v33 = vmul.f32 1.1920929e-08, %v543_v31 }
 0x131   : >>> { %vm545_vm11 = vcmp.le.f32.partialorder %v541_v32, %v544_v33 }
 0x136   : >>> { %v1572_v17 = vpop.eup %1571 }
 0x137   : >>> { %v525_v18 = vmul.f32 %v1572_v17, %v522_v16 }
 0x139   : >>> { %v527_v19 = vmul.f32 %v525_v18, %v525_v18  ;;  %vm526_vm10 = vcmp.ge.f32.partialorder %v525_v18, 0.0 }
 0x13b   : >>> { %v528_v20 = vadd.f32 1.0, %v527_v19 }
 0x13d   : >>> { %1573 = vrsqrt.f32 %v528_v20  ;;  %vm531_vm8 = vcmp.eq.f32.partialorder %v528_v20, inf  ;;  %v534_v22 = vand.u32 2147483648, %v528_v20  ;;  %vm533_vm9 = vcmp.eq.f32.partialorder %v528_v20, 0.0 }
 0x147   : >>> { %v1574_v21 = vpop.eup %1573 }
 0x148   : >>> { %v530_v23 = vmul.f32 %v1574_v21, %v528_v20 }
 0x14a   : >>> { %v532_v24 = vsel %vm531_vm8, %v528_v20, %v530_v23  ;;  %vm369_vm8 = vcmp.eq.s32.totalorder (%p450_p9), %v357_v6, %v354_v5  ;;  %v410_v6 = vmov (%p450_p9), %v1729_v6  ;;  %v373_v5 = vmov (%p450_p9), %v1727_v5 }
 0x14b   : >>> { %v535_v25 = vsel %vm533_vm9, %v534_v22, %v532_v24  ;;  %v376_v6 = vmov (%p450_p9), %v1729_v6  ;;  %v390_v5 = vmov (%p450_p9), %v1727_v5  ;;  %vm422_vm9 = vcmp.eq.s32.totalorder (%p450_p9), %v410_v6, %v407_v5 }
 0x14c   : >>> { %v536_v26 = vxor.u32 2147483648, %v535_v25  ;;  %v393_v6 = vmov (%p450_p9), %v1729_v6 }
 0x14e   : >>> { %v537_v29 = vsel %vm526_vm10, %v535_v25, %v536_v26 }
 0x14f   : >>> { %v538_v30 = vadd.f32 %v537_v29, %v525_v18 }
 0x151   : >>> { %1575 = vrcp.f32 %v538_v30 }
 0x15b   : >>> { %v1576_v34 = vpop.eup %1575 }
 0x15c   : >>> { %v546_v35 = vsel %vm545_vm11, 0.0, %v1576_v34 }
 0x15d   : >>> { %v547_v36 = vmul.f32 %v546_v35, %v546_v35  ;;  %v551_v37 = vmul.f32 %v546_v35, %v519_v12 }
 0x15f   : >>> { %v548_v38 = vadd.f32 1.0, %v547_v36  ;;  %v552_v39 = vsub.f32 %v517_v14, %v551_v37  ;;  %v554_v40 = vadd.f32 %v551_v37, %v521_v15 }
 0x161   : >>> { %1577 = vrsqrt.f32 %v548_v38  ;;  %556 = vst [vmem:[%s555_s27] sm:$0xff] %v552_v39  ;;  %558 = vst [vmem:[%s557_s28] sm:$0xff] %v554_v40  ;;  %s1789_s27 = smov [#allocation12]  ;;  %s591_s28 = smov [#allocation24] }
 0x162   : >>> { %v601_v49 = vld [vmem:[%s1789_s27] sm:$0xff] }
 0x16b   : >>> { %v1578_v41 = vpop.eup %1577 }
 0x16c   : >>> { %560 = vst [vmem:[%s559_s21] sm:$0xff] %v1578_v41  ;;  %v550_v42 = vmul.f32 %v1578_v41, %v546_v35  ;;  %s1791_s21 = smov [#allocation13] }
 0x16d   : >>> { %v602_v50 = vld [vmem:[%s1791_s21] sm:$0xff] }
 0x16e   : >>> { %562 = vst [vmem:[%s561_s22] sm:$0xff] %v550_v42  ;;  %s1793_s22 = smov [#allocation15] }
 0x16f   : >>> { %v604_v51 = vld [vmem:[%s1793_s22] sm:$0xff] }
 0x173   : >>> { %v564_v43 = vld [vmem:[%s563_s29] ss:$0 sm:$0xff]  ;;  %s817_s29 = smov [#allocation23] }
 0x174   : >>> { %v573_v44 = vsel %vm572_vm12, %v564_v43, 0.0 }
 0x175   : >>> { %574 = vadd.xlane.f32.xlu0 %v573_v44  ;;  %v579_v45 = vld [vmem:[%s578_s11] ss:$0 sm:$0xff]  ;;  %s1808_s11 = smov [#allocation14] }
 0x176   : >>> { %v588_v46 = vsel %vm587_vm13, %v579_v45, 0.0  ;;  %v603_v58 = vld [vmem:[%s1808_s11] sm:$0xff] }
 0x179   : >>> { %589 = vadd.xlane.f32.xlu0 %v588_v46 }
 0x202   : >>> { %v575_v47 = vpop.xlane.xlu0 %574 }
 0x203   : >>> { %577 = vst [vmem:[%s576_s15] sm:$0xff] %v575_v47  ;;  %s595_s15 = smov [#allocation24] }
 0x206   : >>> { %v590_v48 = vpop.xlane.xlu0 %589 }
 0x207   : >>> { %592 = vst [vmem:[%s591_s28] sm:$0xff] %v590_v48  ;;  %s1835_s28 = smov [#allocation14] }
 0x20a   : >>> { %v594_v54 = vld [vmem:[%s593_s24] sm:$0xff]  ;;  %s623_s24 = smov [#allocation22] }
 0x20b   : >>> { %v818_v55 = vld [vmem:[%s817_s29] sm:$0xff]  ;;  %v605_v59 = vmul.f32 %v601_v49, %v594_v54  ;;  %v608_v60 = vmul.f32 %v602_v50, %v594_v54  ;;  %v615_v61 = vmul.f32 %v604_v51, %v594_v54  ;;  %v612_v4 = vmul.f32 %v603_v58, %v594_v54  ;;  %s650_s29 = smov [#allocation19] }
 0x20c   : >>> { %v829_v62 = vmul.f32 %v825_v52, %v818_v55  ;;  %v832_v63 = vmul.f32 %v826_v53, %v818_v55  ;;  %v836_v0 = vmul.f32 %v827_v56, %v818_v55  ;;  %v839_v1 = vmul.f32 %v828_v57, %v818_v55  ;;  %v624_v24 = vld [vmem:[%s623_s24] ss:$0 sm:$0xff]  ;;  %s690_s24 = smov [#allocation15] }
 0x20d   : >>> { %v657_v55 = vld [vmem:[%s650_s29] ss:$0 sm:$0xff]  ;;  %s706_s29 = smov [#allocation13] }
 0x20e   : >>> { %v596_v2 = vld [vmem:[%s595_s15] sm:$0xff]  ;;  %s677_s15 = smov [#allocation14] }
 0x20f   : >>> { %v820_v3 = vld [vmem:[%s819_s26] sm:$0xff]  ;;  %v609_v7 = vmul.f32 %v604_v51, %v596_v2  ;;  %v611_v8 = vmul.f32 %v601_v49, %v596_v2  ;;  %v614_v9 = vmul.f32 %v602_v50, %v596_v2  ;;  %v606_v14 = vmul.f32 %v603_v58, %v596_v2  ;;  %s621_s26 = smov [#allocation21] }
 0x210   : >>> { %v830_v10 = vmul.f32 %v827_v56, %v820_v3  ;;  %v833_v11 = vmul.f32 %v828_v57, %v820_v3  ;;  %v835_v12 = vmul.f32 %v825_v52, %v820_v3  ;;  %v838_v13 = vmul.f32 %v826_v53, %v820_v3  ;;  %v622_v23 = vld [vmem:[%s621_s26] ss:$0 sm:$0xff]  ;;  %s649_s26 = smov [#allocation12] }
 0x211   : >>> { %v610_v15 = vsub.f32 %v608_v60, %v609_v7  ;;  %v616_v16 = vadd.f32 %v615_v61, %v614_v9  ;;  %v613_v18 = vadd.f32 %v612_v4, %v611_v8  ;;  %v607_v22 = vsub.f32 %v605_v59, %v606_v14 }
 0x212   : >>> { %v831_v17 = vsub.f32 %v829_v62, %v830_v10  ;;  %v834_v19 = vsub.f32 %v832_v63, %v833_v11  ;;  %v837_v20 = vadd.f32 %v836_v0, %v835_v12  ;;  %v840_v21 = vadd.f32 %v839_v1, %v838_v13 }
 0x213   : >>> { %618 = vst [vmem:[%s1791_s21] sm:$0xff] %v610_v15  ;;  %620 = vst [vmem:[%s1793_s22] sm:$0xff] %v616_v16  ;;  %s1837_s21 = smov [#allocation15]  ;;  %s1841_s22 = smov [#allocation13] }
 0x214   : >>> { %841 = vst [vmem:[%s1796_s14] sm:$0xff] %v831_v17  ;;  %619 = vst [vmem:[%s1808_s11] sm:$0xff] %v613_v18  ;;  %s845_s14 = smov %s1731_s14  ;;  %s691_s11 = smov [#allocation20] }
 0x215   : >>> { %842 = vst [vmem:[%s1799_s30] sm:$0xff] %v834_v19  ;;  %843 = vst [vmem:[%s1802_s17] sm:$0xff] %v837_v20  ;;  %s846_s17 = smov %s1737_s17  ;;  %s1828_s30 = smov %s1734_s30  ;;  %v698_v56 = vld [vmem:[%s691_s11] ss:$0 sm:$0xff] }
 0x216   : >>> { %844 = vst [vmem:[%s1806_s20] sm:$0xff] %v840_v21  ;;  %617 = vst [vmem:[%s1789_s27] sm:$0xff] %v607_v22  ;;  %s1831_s20 = smov %s1740_s20  ;;  %s1839_s27 = smov [#allocation12] }
 0x217   : >>> { %s1621_s11 = smov 127  }
 0x21a   : >>> { %v632_v39 = vld [vmem:[%s1837_s21] sm:$0xff] }
 0x21b   : >>> { %v847_v25 = vld [vmem:[%s845_s14] ss:$0 sm:$0xff]  ;;  %v1499_v27 = vld [vmem:[%s845_s14 + $0x7] ss:$0 sm:$0xff]  ;;  %v640_v42 = vmul.f32 %v632_v39, %v624_v24  ;;  %v643_v46 = vmul.f32 %v632_v39, %v622_v23 }
 0x21c   : >>> { %v1498_v26 = vld [vmem:[%s845_s14 - $0x1] sm:$0xfe]  ;;  %v1503_v34 = vld [vmem:[%s1828_s30 + $0x7] ss:$0 sm:$0xff] }
 0x21d   : >>> { %v854_v28 = vsel %vm777_vm14, %v847_v25, %v1498_v26  ;;  %v858_v29 = vld [vmem:[%s846_s17] ss:$0 sm:$0xff]  ;;  %v1501_v30 = vld [vmem:[%s846_s17 + $0x1] sm:$0x7f] }
 0x21e   : >>> { %v871_v31 = vld [vmem:[%s1828_s30] ss:$0 sm:$0xff]  ;;  %857 = vst [vmem:[%s845_s14] sm:$0xff] %v854_v28  ;;  %v866_v32 = vsel %vm789_vm15, %v1499_v27, %v1501_v30  ;;  %v1505_v37 = vld [vmem:[%s1831_s20 + $0x1] sm:$0x7f] }
 0x21f   : >>> { %v1502_v33 = vld [vmem:[%s1828_s30 - $0x1] sm:$0xfe]  ;;  %1500 = vst [vmem:[%s845_s14 + $0x1] sm:$0x1] %v858_v29  ;;  %868 = vst [vmem:[%s846_s17] sm:$0xff] %v866_v32  ;;  %v890_v40 = vsel %vm789_vm15, %v1503_v34, %v1505_v37 }
 0x220   : >>> { %v882_v35 = vld [vmem:[%s1831_s20] ss:$0 sm:$0xff]  ;;  %v878_v36 = vsel %vm777_vm14, %v871_v31, %v1502_v33 }
 0x221   : >>> { %v631_v38 = vld [vmem:[%s1835_s28] sm:$0xff]  ;;  %881 = vst [vmem:[%s1828_s30] sm:$0xff] %v878_v36  ;;  %892 = vst [vmem:[%s1831_s20] sm:$0xff] %v890_v40 }
 0x222   : >>> { %v639_v41 = vmul.f32 %v631_v38, %v622_v23  ;;  %v642_v43 = vmul.f32 %v631_v38, %v624_v24  ;;  %v629_v44 = vld [vmem:[%s1839_s27] sm:$0xff]  ;;  %1504 = vst [vmem:[%s1828_s30 + $0x1] sm:$0x1] %v882_v35 }
 0x223   : >>> { %v630_v45 = vld [vmem:[%s1841_s22] sm:$0xff]  ;;  %v633_v47 = vmul.f32 %v629_v44, %v622_v23  ;;  %v636_v49 = vmul.f32 %v629_v44, %v624_v24 }
 0x224   : >>> { %v634_v48 = vmul.f32 %v630_v45, %v624_v24  ;;  %v641_v50 = vsub.f32 %v639_v41, %v640_v42  ;;  %v637_v51 = vmul.f32 %v630_v45, %v622_v23  ;;  %v644_v52 = vadd.f32 %v643_v46, %v642_v43 }
 0x226   : >>> { %v635_v53 = vsub.f32 %v633_v47, %v634_v48  ;;  %647 = vst [vmem:[%s1835_s28] sm:$0xff] %v641_v50  ;;  %v638_v54 = vadd.f32 %v637_v51, %v636_v49  ;;  %648 = vst [vmem:[%s1837_s21] sm:$0xff] %v644_v52  ;;  %s664_s28 = smov [#allocation13]  ;;  %s1875_s21 = smov [#allocation14] }
 0x228   : >>> { %645 = vst [vmem:[%s1839_s27] sm:$0xff] %v635_v53  ;;  %646 = vst [vmem:[%s1841_s22] sm:$0xff] %v638_v54  ;;  %s705_s27 = smov [#allocation12]  ;;  %s1620_s22 = smov 1  }
 0x22d   : >>> { %v684_v57 = vld [vmem:[%s677_s15] sm:$0xff] }
 0x22e   : >>> { %v688_v58 = vsel %vm687_vm0, 0.0, %v684_v57  ;;  %v699_v60 = vld [vmem:[%s690_s24] sm:$0xff] }
 0x22f   : >>> { %v658_v59 = vld [vmem:[%s649_s26] sm:$0xff]  ;;  %689 = vst [vmem:[%s677_s15] sm:$0xff] %v688_v58  ;;  %v703_v63 = vsel %vm702_vm3, %v698_v56, %v699_v60  ;;  %s1878_s15 = smov [#allocation15] }
 0x230   : >>> { %v662_v61 = vsel %vm661_vm1, %v657_v55, %v658_v59  ;;  %v671_v62 = vld [vmem:[%s664_s28] sm:$0xff]  ;;  %704 = vst [vmem:[%s690_s24] sm:$0xff] %v703_v63  ;;  %s793_s24 = smov [#allocation13] }
 0x231   : >>> { %663 = vst [vmem:[%s649_s26] sm:$0xff] %v662_v61  ;;  %v675_v0 = vsel %vm674_vm4, 0.0, %v671_v62  ;;  %s769_s26 = smov [#allocation12] }
 0x232   : >>> { %676 = vst [vmem:[%s664_s28] sm:$0xff] %v675_v0  ;;  %s770_s28 = smov [#allocation14] }
 0x236   : >>> { %v743_v1 = vld [vmem:[%s1875_s21] sm:$0xff] }
 0x237   : >>> { %744 = vrot.lane.b32.xlu0 %v743_v1, %s1620_s22  ;;  %v739_v4 = vld [vmem:[%s1878_s15] sm:$0xff] }
 0x238   : >>> { %v711_v2 = vld [vmem:[%s705_s27] sm:$0xff] }
 0x239   : >>> { %712 = vrot.lane.b32.xlu1 %v711_v2, %s1620_s22  ;;  %v707_v3 = vld [vmem:[%s706_s29] sm:$0xff] }
 0x23d   : >>> { %708 = vrot.lane.b32.xlu1 %v707_v3, %s1620_s22 }
 0x241   : >>> { %729 = vrot.lane.b32.xlu1 %v707_v3, %s1621_s11 }
 0x245   : >>> { %740 = vrot.lane.b32.xlu1 %v739_v4, %s1620_s22  ;;  %s358_s22 = smov (%p450_p9), [#allocation12] }
 0x249   : >>> { %761 = vrot.lane.b32.xlu1 %v739_v4, %s1621_s11  ;;  %s394_s11 = smov (%p450_p9), [#allocation14] }
 0x2a9   : >>> { %v745_v13 = vpop.permute.xlu0 %744 }
 0x2aa   : >>> { %v749_v15 = vsel %vm716_vm5, %v743_v1, %v745_v13 }
 0x2ab   : >>> { %v713_v7 = vpop.permute.xlu1 %712 }
 0x2ac   : >>> { %v717_v8 = vsel %vm716_vm5, %v711_v2, %v713_v7 }
 0x2af   : >>> { %v709_v9 = vpop.permute.xlu1 %708 }
 0x2b0   : >>> { %v721_v10 = vsel %vm720_vm6, %v709_v9, %v717_v8 }
 0x2b1   : >>> { %v727_v11 = vsel %vm1359_vm2, %v721_v10, 0.0 }
 0x2b2   : >>> { %735 = vst [vmem:[%s705_s27] sm:$0xff] %v727_v11  ;;  %s794_s27 = smov [#allocation15] }
 0x2b3   : >>> { %v730_v12 = vpop.permute.xlu1 %729 }
 0x2b4   : >>> { %v734_v14 = vsel %vm733_vm7, %v711_v2, %v730_v12 }
 0x2b5   : >>> { %736 = vst [vmem:[%s706_s29] sm:$0xff] %v734_v14  ;;  %s377_s29 = smov (%p450_p9), [#allocation13] }
 0x2b7   : >>> { %v741_v16 = vpop.permute.xlu1 %740 }
 0x2b8   : >>> { %v753_v17 = vsel %vm720_vm6, %v741_v16, %v749_v15 }
 0x2b9   : >>> { %v771_v18 = vld [vmem:[%s769_s26] ss:$0 sm:$0xff]  ;;  %v1491_v20 = vld [vmem:[%s769_s26 + $0x7] ss:$0 sm:$0xff]  ;;  %v759_v22 = vsel %vm1359_vm2, %v753_v17, 0.0 }
 0x2ba   : >>> { %v1490_v19 = vld [vmem:[%s769_s26 - $0x1] sm:$0xfe]  ;;  %767 = vst [vmem:[%s1875_s21] sm:$0xff] %v759_v22  ;;  %s893_s21 = sadd.s32 (%p450_p9), 1, %s1613_s16  }
 0x2bb   : >>> { %v778_v21 = vsel %vm777_vm14, %v771_v18, %v1490_v19  ;;  %v762_v23 = vpop.permute.xlu1 %761  ;;  %p446_p10 = scmp.ge.s32.totalorder (%p450_p9), %s893_s21, 15  ;;  %s1993_s16 = smov (%p450_p9), %s893_s21 }
 0x2bc   : >>> { %781 = vst [vmem:[%s769_s26] sm:$0xff] %v778_v21  ;;  %v795_v24 = vld [vmem:[%s793_s24] ss:$0 sm:$0xff]  ;;  %v1495_v26 = vld [vmem:[%s793_s24 + $0x7] ss:$0 sm:$0xff]  ;;  %v766_v27 = vsel %vm733_vm7, %v743_v1, %v762_v23 }
 0x2bd   : >>> { %v1494_v25 = vld [vmem:[%s793_s24 - $0x1] sm:$0xfe]  ;;  %768 = vst [vmem:[%s1878_s15] sm:$0xff] %v766_v27  ;;  %s411_s15 = smov (%p450_p9), [#allocation15] }
 0x2be   : >>> { %v802_v28 = vsel %vm777_vm14, %v795_v24, %v1494_v25 }
 0x2bf   : >>> { %805 = vst [vmem:[%s793_s24] sm:$0xff] %v802_v28 }
 0x2c1   : >>> { %v782_v29 = vld [vmem:[%s770_s28] ss:$0 sm:$0xff]  ;;  %v1493_v30 = vld [vmem:[%s770_s28 + $0x1] sm:$0x7f] }
 0x2c2   : >>> { %1492 = vst [vmem:[%s769_s26 + $0x1] sm:$0x1] %v782_v29  ;;  %v790_v31 = vsel %vm789_vm15, %v1491_v20, %v1493_v30  ;;  %452 = sbr.rel (!%p450_p9) target bundleno = 274 (0x112), region = 494 }
 0x2c3   : >>> { %792 = vst [vmem:[%s770_s28] sm:$0xff] %v790_v31 }
 0x2c4   : >>> { %v806_v32 = vld [vmem:[%s794_s27] ss:$0 sm:$0xff]  ;;  %v1497_v33 = vld [vmem:[%s794_s27 + $0x1] sm:$0x7f] }
 0x2c5   : >>> { %1496 = vst [vmem:[%s793_s24 + $0x1] sm:$0x1] %v806_v32  ;;  %v814_v34 = vsel %vm789_vm15, %v1495_v26, %v1497_v33 }
 0x2c6   : >>> { %816 = vst [vmem:[%s794_s27] sm:$0xff] %v814_v34 }
 0x2c9   : >> { %v364_v35 = vld [vmem:[%s358_s22] sm:$0xff] }
 0x2ca   : >> { %v365_v37 = vsel %vm1359_vm2, %v364_v35, 0.0  ;;  %v400_v39 = vld [vmem:[%s394_s11] sm:$0xff] }
 0x2cb   : >> { %v366_v41 = vmul.f32 %v365_v37, %v365_v37  ;;  %v401_v43 = vsel %vm1359_vm2, %v400_v39, 0.0 }
 0x2cc   : >> { %v383_v36 = vld [vmem:[%s377_s29] sm:$0xff]  ;;  %v402_v45 = vmul.f32 %v401_v43, %v401_v43 }
 0x2cd   : >> { %v384_v38 = vsel %vm1359_vm2, %v383_v36, 0.0  ;;  %v417_v40 = vld [vmem:[%s411_s15] sm:$0xff]  ;;  %v370_v48 = vsel %vm369_vm8, 0.0, %v366_v41 }
 0x2ce   : >> { %v385_v42 = vmul.f32 %v384_v38, %v384_v38  ;;  %v418_v44 = vsel %vm1359_vm2, %v417_v40, 0.0 }
 0x2cf   : >> { %v419_v47 = vmul.f32 %v418_v44, %v418_v44 }
 0x2d0   : >> { %v387_v46 = vadd.f32 %v385_v42, %v366_v41  ;;  %v386_v49 = vadd.f32 %v385_v42, %v370_v48 }
 0x2d1   : >> { %v423_v52 = vsel %vm422_vm9, 0.0, %v419_v47 }
 0x2d2   : >> { %v404_v50 = vadd.f32 %v402_v45, %v387_v46  ;;  %v403_v51 = vadd.f32 %v402_v45, %v386_v49 }
 0x2d4   : >> { %v425_v53 = vadd.f32 %v419_v47, %v404_v50  ;;  %v424_v54 = vadd.f32 %v423_v52, %v403_v51 }
 0x2d6   : >> { %426 = vadd.xlane.f32.xlu0 %v425_v53 }
 0x2da   : >> { %434 = vadd.xlane.f32.xlu0 %v424_v54 }
 0x363   : >> { %v427_v55 = vpop.xlane.xlu0 %426 }
 0x364   : >> { %v428_v56 = vrot.slane %v427_v55, 4 }
 0x366   : >> { %v429_v57 = vadd.f32 %v428_v56, %v427_v55 }
 0x367   : >> { %v435_v58 = vpop.xlane.xlu0 %434 }
 0x368   : >> { %v430_v59 = vrot.slane %v429_v57, 2  ;;  %v436_v60 = vrot.slane %v435_v58, 4 }
 0x36a   : >> { %v437_v61 = vadd.f32 %v436_v60, %v435_v58  ;;  %v431_v62 = vadd.f32 %v430_v59, %v429_v57 }
 0x36c   : >> { %v438_v63 = vrot.slane %v437_v61, 2  ;;  %v432_v1 = vrot.slane %v431_v62, 1 }
 0x36e   : >> { %v439_v0 = vadd.f32 %v438_v63, %v437_v61  ;;  %v433_v4 = vadd.f32 %v432_v1, %v431_v62 }
 0x370   : >> { %v440_v2 = vrot.slane %v439_v0, 1 }
 0x372   : >> { %v441_v3 = vadd.f32 %v440_v2, %v439_v0 }
 0x374   : >> { %1524 = vpush %v441_v3 }
 0x375   : >> { %1526 = vpush %v433_v4 }
 0x3a5   : >> { %s1525_s23 = spop %1524 }
 0x3a6   : >> { %s1527_s26 = spop %1526 }
 0x3a7   : >> { %s444_s24 = smul.f32 1e-10, %s1527_s26 }
 0x3a9   : >> { %p445_p11 = scmp.le.f32.partialorder %s1525_s23, %s444_s24 }
 0x3ab   : >> { %p447_p12 = por %p446_p10, %p445_p11 }
 0x3ad   : > { %895 = sbr.rel (!%p447_p12) target bundleno = 273 (0x111), region = 505 }
 0x3b4 PF: > { %s900_s28 = smov [#allocation12]  ;;  %v904_v5 = vmov %v1727_v5  ;;  %v907_v6 = vmov %v1729_v6  ;;  %s920_s27 = smov [#allocation15] }
 0x3b5   : > { %v924_v5 = vmov %v1727_v5  ;;  %v927_v6 = vmov %v1729_v6  ;;  %v908_v7 = vld [vmem:[%s900_s28] sm:$0xff]  ;;  %vm911_vm10 = vcmp.eq.s32.totalorder %v907_v6, %v904_v5  ;;  %s896_s16 = sand.u32 7, %s1688_s12   ;;  %s1994_s29 = scalar_lea.vmem [#allocation7], %s1725_s18 }
 0x3b6   : > { %vm931_vm11 = vcmp.eq.s32.totalorder %v927_v6, %v924_v5  ;;  %v912_v8 = vsel %vm911_vm10, %v908_v7, 0.0  ;;  %v928_v10 = vld [vmem:[%s920_s27] sm:$0xff]  ;;  %s897_s21 = scalar_lea.vmem [#allocation4], %s896_s16  ;;  %s899_s22 = scalar_lea.vmem [#allocation6], %s896_s16 }
 0x3b7   : > { %v913_v9 = vrot.slane %v912_v8, 4  ;;  %v932_v11 = vsel %vm931_vm11, %v928_v10, 0.0  ;;  %s901_s21 = smov %s897_s21  ;;  %s921_s22 = smov %s899_s22 }
 0x3b8   : > { %v933_v13 = vrot.slane %v932_v11, 4  ;;  %s979_s11 = sshrl.u32 (%p1702_p3), %s1688_s12, 3 }
 0x3b9   : > { %v914_v12 = vadd.f32 %v913_v9, %v912_v8  ;;  %s1512_s15 = sshll.u32 (%p1702_p3), %s979_s11, 1 }
 0x3ba   : > { %v934_v15 = vadd.f32 %v933_v13, %v932_v11  ;;  %s981_s24 = scalar_lea.vmem (%p1702_p3), %s1985_s4, %s1512_s15 }
 0x3bb   : > { %v915_v14 = vrot.slane %v914_v12, 2 }
 0x3bc   : > { %v935_v17 = vrot.slane %v934_v15, 2 }
 0x3bd   : > { %v916_v16 = vadd.f32 %v915_v14, %v914_v12 }
 0x3be   : > { %v936_v19 = vadd.f32 %v935_v17, %v934_v15 }
 0x3bf   : > { %v917_v18 = vrot.slane %v916_v16, 1 }
 0x3c0   : > { %v937_v5 = vrot.slane %v936_v19, 1 }
 0x3c1   : > { %v918_v20 = vadd.f32 %v917_v18, %v916_v16 }
 0x3c2   : > { %v938_v6 = vadd.f32 %v937_v5, %v936_v19 }
 0x3c3   : > { %919 = vst [vmem:[%s901_s21] sm:$0x1] %v918_v20 }
 0x3c4   : > { %939 = vst [vmem:[%s921_s22] sm:$0x1] %v938_v6 }
 0x3c6   : > { %978 = sbr.rel (!%p1702_p3) target bundleno = 980 (0x3d4), region = 174 }
 0x3ca   : > { %v943_v21 = vld [vmem:[#allocation4] sm:$0x3] }
 0x3cb   : > { %945 = vst [vmem:[%s283_s25] sm:$0x3] %v943_v21  ;;  %v949_v22 = vld [vmem:[#allocation6] sm:$0x3] }
 0x3cc   : > { %951 = vst [vmem:[%s1994_s29] sm:$0x3] %v949_v22 }
 0x3d2   : > { %v997_v23 = vld [vmem:[%s283_s25] sm:$0x3] }
 0x3d3   : > { %998 = vst [vmem:[%s981_s24] sm:$0x3] %v997_v23 }
 0x3d4 PF: > { %1015 = sbr.rel (!%p1702_p3) target bundleno = 988 (0x3dc), region = 208  ;;  %s1016_s28 = sshrl.u32 (%p1702_p3), %s1688_s12, 3 }
 0x3d5   : > { %s1995_s27 = scalar_lea.vmem (%p1702_p3), [#allocation7], %s1725_s18  ;;  %s1513_s16 = sshll.u32 (%p1702_p3), %s1016_s28, 1 }
 0x3d6   : > { %s1018_s25 = scalar_lea.vmem (%p1702_p3), %s1986_s5, %s1513_s16 }
 0x3da   : > { %v1034_v24 = vld [vmem:[%s1995_s27] sm:$0x3] (%p1702_p3) }
 0x3db   : > { %1035 = vst [vmem:[%s1018_s25] sm:$0x3] %v1034_v24 }
 0x3dc PF: > { %s1514_s29 = sshll.u32 %s1688_s12, 3  ;;  %v1079_v25 = vld [vmem:[%s1731_s14] sm:$0xff]  ;;  %v1113_v26 = vld [vmem:[%s1734_s30] sm:$0xff] }
 0x3dd   : > { %v1147_v27 = vld [vmem:[%s1737_s17] sm:$0xff]  ;;  %s1051_s18 = scalar_lea.vmem %s1987_s6, %s1514_s29  ;;  %s1085_s26 = scalar_lea.vmem %s1988_s7, %s1514_s29  ;;  %v1181_v28 = vld [vmem:[%s1740_s20] sm:$0xff] }
 0x3de   : > { %1080 = vst [vmem:[%s1051_s18] sm:$0xff] %v1079_v25  ;;  %1114 = vst [vmem:[%s1085_s26] sm:$0xff] %v1113_v26  ;;  %s1119_s27 = scalar_lea.vmem %s1989_s8, %s1514_s29  ;;  %s1153_s14 = scalar_lea.vmem %s1990_s9, %s1514_s29 }
 0x3df   : > { %1148 = vst [vmem:[%s1119_s27] sm:$0xff] %v1147_v27  ;;  %1182 = vst [vmem:[%s1153_s14] sm:$0xff] %v1181_v28 }
 0x3e0 PF: > { %s1996_s17 = sld [smem:[#allocation25_spill]]  ;;  %p13_p13 = scmp.ge.s32.totalorder %s1691_s13, 4  }
 0x3e1   : > { %s1997_s30 = smov %s1605_s10  ;;  %s1999_s11 = smov %s1691_s13 }
 0x3e2   :  { %15 = sbr.rel (!%p13_p13) target bundleno = 2 (0x2), region = 516 }
 0x3e6   : > { %s1998_s10 = smov %s1996_s17 }

// kernel: custom-call.6
= control target key start
LH: loop header
LB: loop body
LE: loop exit
PB: predicated region body
PF: predicated region fallthrough
CT: control target
= control target key end

     0   :  { %11 = vsyncpa [#allocation9], 0  ;;  %s2173_s0 = inlined_call_operand.vmem [shape: f32[8,8], index: 0, kind: input, shape index: {}]   ;;  %s2174_s1 = inlined_call_operand.vmem [shape: f32[8,8], index: 1, kind: input, shape index: {}]   ;;  %s2175_s2 = inlined_call_operand.vmem [shape: f32[8,8], index: 2, kind: input, shape index: {}]   ;;  %s2176_s3 = inlined_call_operand.vmem [shape: f32[8,8], index: 3, kind: input, shape index: {}]   ;;  %s2177_s4 = inlined_call_operand.vmem [shape: f32[8], index: 4, kind: output, shape index: {0}]   ;;  %s2178_s5 = inlined_call_operand.vmem [shape: f32[8], index: 5, kind: output, shape index: {1}]   ;;  %s2179_s6 = inlined_call_operand.hbm [shape: f32[8,8], index: 6, kind: output, shape index: {2}]   ;;  %s2180_s7 = inlined_call_operand.hbm [shape: f32[8,8], index: 7, kind: output, shape index: {3}]   ;;  %s2181_s8 = inlined_call_operand.hbm [shape: f32[8,8], index: 8, kind: output, shape index: {4}]   ;;  %s2182_s9 = inlined_call_operand.hbm [shape: f32[8,8], index: 9, kind: output, shape index: {5}]  }
   0x1   :  { %12 = vsyncpa [#allocation11], 0 }
   0x2   :  { %13 = vsyncpa [#allocation14], 0  ;;  %s1815_s30 = smov [#allocation0]   ;;  %s1819_s12 = smov %s2173_s0  }
   0x3 LB: > { %v61_v0 = vld [vmem:[%s1821_s12] sm:$0xff]  ;;  %s63_s12 = scalar_lea.vmem %s1821_s12, 8   ;;  %s1821_s12 = sphi %s1819_s12, %s63_s12   ;;  %s1817_s30 = sphi %s1815_s30, %s64_s30  }
   0x4   : > { %62 = vst [vmem:[%s1817_s30] sm:$0xff] %v61_v0  ;;  %s64_s30 = scalar_lea.vmem %s1817_s30, 8   ;;  %p58_p0 = scmp.gt.s32.totalorder %s63_s12, %s2173_s0 }
   0x5   :  { %s1823_s15 = smov (%p58_p0), [#allocation1]   ;;  %s1827_s18 = smov (%p58_p0), %s2174_s1  }
   0x6   :  { %60 = sbr.rel (!%p58_p0) target bundleno = 3 (0x3), region = 242 }
   0xd LB: > { %v123_v1 = vld [vmem:[%s1829_s18] sm:$0xff]  ;;  %s125_s18 = scalar_lea.vmem %s1829_s18, 8   ;;  %s1829_s18 = sphi %s1827_s18, %s125_s18   ;;  %s1825_s15 = sphi %s1823_s15, %s126_s15  }
   0xe   : > { %124 = vst [vmem:[%s1825_s15] sm:$0xff] %v123_v1  ;;  %s126_s15 = scalar_lea.vmem %s1825_s15, 8   ;;  %p120_p1 = scmp.gt.s32.totalorder %s125_s18, %s2174_s1 }
   0xf   :  { %s1831_s0 = smov (%p120_p1), [#allocation2]   ;;  %s1835_s23 = smov (%p120_p1), %s2175_s2  }
  0x10   :  { %122 = sbr.rel (!%p120_p1) target bundleno = 13 (0xd), region = 264 }
  0x17 LB: > { %v185_v2 = vld [vmem:[%s1837_s23] sm:$0xff]  ;;  %s187_s23 = scalar_lea.vmem %s1837_s23, 8   ;;  %s1837_s23 = sphi %s1835_s23, %s187_s23   ;;  %s1833_s0 = sphi %s1831_s0, %s188_s0  }
  0x18   : > { %186 = vst [vmem:[%s1833_s0] sm:$0xff] %v185_v2  ;;  %s188_s0 = scalar_lea.vmem %s1833_s0, 8   ;;  %p182_p2 = scmp.gt.s32.totalorder %s187_s23, %s2175_s2 }
  0x19   :  { %s1839_s1 = smov (%p182_p2), [#allocation3]   ;;  %s1843_s28 = smov (%p182_p2), %s2176_s3  }
  0x1a   :  { %184 = sbr.rel (!%p182_p2) target bundleno = 23 (0x17), region = 286 }
  0x21 LB: > { %v247_v3 = vld [vmem:[%s1845_s28] sm:$0xff]  ;;  %s249_s28 = scalar_lea.vmem %s1845_s28, 8   ;;  %s1845_s28 = sphi %s1843_s28, %s249_s28   ;;  %s1841_s1 = sphi %s1839_s1, %s250_s1  }
  0x22   : > { %248 = vst [vmem:[%s1841_s1] sm:$0xff] %v247_v3  ;;  %s250_s1 = scalar_lea.vmem %s1841_s1, 8   ;;  %p244_p3 = scmp.gt.s32.totalorder %s249_s28, %s2176_s3 }
  0x23   :  { %s262_s2 = smov (%p244_p3), [#allocation15]  ;;  %v263_v4 = vld [vmem:[#allocation0] sm:$0xff] (%p244_p3)  ;;  %s265_s10 = smov (%p244_p3), [#allocation16]  ;;  %v266_v5 = vld [vmem:[#allocation1] sm:$0xff] (%p244_p3)  ;;  %v269_v6 = vld [vmem:[#allocation2] sm:$0xff] (%p244_p3)  ;;  %v279_v7 = vlaneseq (%p244_p3)  ;;  %v1855_v9 = vmov (%p244_p3), 0.0  }
  0x24   :  { %246 = sbr.rel (!%p244_p3) target bundleno = 33 (0x21), region = 308  ;;  %264 = vst [vmem:[%s262_s2] sm:$0xff] (%p244_p3), %v263_v4  ;;  %267 = vst [vmem:[%s265_s10] sm:$0xff] (%p244_p3), %v266_v5  ;;  %s268_s11 = smov (%p244_p3), [#allocation17] }
  0x25   :  { %s271_s12 = smov (%p244_p3), [#allocation18]  ;;  %274 = vst [vmem:[#allocation8] sm:$0xff] (%p244_p3), %v1855_v9  ;;  %275 = vst [vmem:[#allocation10] sm:$0xff] (%p244_p3), %v1855_v9  ;;  %v1936_v10 = vand.u32 (%p244_p3), 127, %v279_v7  ;;  %v1938_v11 = vshrl.u32 (%p244_p3), %v279_v7, 7  ;;  %s278_s3 = smov (%p244_p3), [#allocation8] }
  0x26   :  { %276 = vst [vmem:[#allocation12] sm:$0xff] (%p244_p3), %v1855_v9  ;;  %277 = vst [vmem:[#allocation13] sm:$0xff] (%p244_p3), %v1855_v9  ;;  %s291_s13 = smov (%p244_p3), [#allocation13]  ;;  %s1179_s14 = smov (%p244_p3), [#allocation15] }
  0x27   :  { %270 = vst [vmem:[%s268_s11] sm:$0xff] (%p244_p3), %v269_v6  ;;  %v281_v10 = vmov (%p244_p3), %v1936_v10  ;;  %v284_v11 = vmov (%p244_p3), %v1938_v11  ;;  %vm1183_vm2 = vcmp.lt.s32.totalorder (%p244_p3), %v1936_v10, 8  ;;  %s1196_s15 = smov (%p244_p3), [#allocation16]  ;;  %s1213_s16 = smov (%p244_p3), [#allocation17] }
  0x28   :  { %v294_v10 = vmov (%p244_p3), %v1936_v10  ;;  %v297_v11 = vmov (%p244_p3), %v1938_v11  ;;  %vm288_vm0 = vcmp.eq.s32.totalorder (%p244_p3), %v284_v11, %v281_v10  ;;  %s1230_s17 = smov (%p244_p3), [#allocation18] }
  0x29   :  { %v272_v8 = vld [vmem:[#allocation3] sm:$0xff] (%p244_p3)  ;;  %vm301_vm1 = vcmp.eq.s32.totalorder (%p244_p3), %v297_v11, %v294_v10  ;;  %v1175_v10 = vmov (%p244_p3), %v1936_v10  ;;  %v1178_v11 = vmov (%p244_p3), %v1938_v11 }
  0x2a   :  { %273 = vst [vmem:[%s271_s12] sm:$0xff] (%p244_p3), %v272_v8  ;;  %vm1188_vm3 = vcmp.eq.s32.totalorder (%p244_p3), %v1178_v11, %v1175_v10  ;;  %v1226_v10 = vmov (%p244_p3), %v1936_v10  ;;  %v1195_v11 = vmov (%p244_p3), %v1938_v11 }
  0x2b   :  { %v1185_v16 = vld [vmem:[%s1179_s14] sm:$0xff]  ;;  %v1192_v10 = vmov %v1936_v10  ;;  %v1229_v11 = vmov %v1938_v11 }
  0x2c   :  { %v285_v12 = vld [vmem:[%s278_s3] sm:$0xff]  ;;  %v1186_v18 = vsel %vm1183_vm2, %v1185_v16, 0.0  ;;  %v1209_v10 = vmov %v1936_v10  ;;  %v1212_v11 = vmov %v1938_v11  ;;  %vm1239_vm4 = vcmp.eq.s32.totalorder %v1229_v11, %v1226_v10 }
  0x2d   :  { %v298_v13 = vld [vmem:[%s291_s13] sm:$0xff]  ;;  %v289_v14 = vsel %vm288_vm0, 1.0, %v285_v12  ;;  %v1187_v22 = vmul.f32 %v1186_v18, %v1186_v18 }
  0x2e   :  { %v302_v15 = vsel %vm301_vm1, 1.0, %v298_v13  ;;  %290 = vst [vmem:[%s278_s3] sm:$0xff] %v289_v14  ;;  %v1202_v17 = vld [vmem:[%s1196_s15] sm:$0xff] }
  0x2f   :  { %303 = vst [vmem:[%s291_s13] sm:$0xff] %v302_v15  ;;  %v1203_v19 = vsel %vm1183_vm2, %v1202_v17, 0.0  ;;  %v1219_v20 = vld [vmem:[%s1213_s16] sm:$0xff]  ;;  %v1189_v29 = vsel %vm1188_vm3, 0.0, %v1187_v22 }
  0x30   :  { %v1204_v23 = vmul.f32 %v1203_v19, %v1203_v19  ;;  %v1220_v24 = vsel %vm1183_vm2, %v1219_v20, 0.0 }
  0x31   :  { %v1236_v21 = vld [vmem:[%s1230_s17] sm:$0xff]  ;;  %v1221_v26 = vmul.f32 %v1220_v24, %v1220_v24 }
  0x32   :  { %v1237_v25 = vsel %vm1183_vm2, %v1236_v21, 0.0  ;;  %v1206_v27 = vadd.f32 %v1204_v23, %v1187_v22  ;;  %v1205_v30 = vadd.f32 %v1204_v23, %v1189_v29 }
  0x33   :  { %v1238_v28 = vmul.f32 %v1237_v25, %v1237_v25 }
  0x34   :  { %v1223_v31 = vadd.f32 %v1221_v26, %v1206_v27  ;;  %v1222_v32 = vadd.f32 %v1221_v26, %v1205_v30 }
  0x35   :  { %v1240_v33 = vsel %vm1239_vm4, 0.0, %v1238_v28 }
  0x36   :  { %v1242_v34 = vadd.f32 %v1238_v28, %v1223_v31  ;;  %v1241_v35 = vadd.f32 %v1240_v33, %v1222_v32 }
  0x38   :  { %1243 = vadd.xlane.f32.xlu0 %v1242_v34 }
  0x3c   :  { %1251 = vadd.xlane.f32.xlu0 %v1241_v35 }
  0xc5   :  { %v1244_v36 = vpop.xlane.xlu0 %1243 }
  0xc6   :  { %v1245_v37 = vrot.slane %v1244_v36, 4 }
  0xc8   :  { %v1246_v38 = vadd.f32 %v1245_v37, %v1244_v36 }
  0xc9   :  { %v1252_v39 = vpop.xlane.xlu0 %1251 }
  0xca   :  { %v1247_v40 = vrot.slane %v1246_v38, 2  ;;  %v1253_v41 = vrot.slane %v1252_v39, 4 }
  0xcc   :  { %v1254_v42 = vadd.f32 %v1253_v41, %v1252_v39  ;;  %v1248_v43 = vadd.f32 %v1247_v40, %v1246_v38 }
  0xce   :  { %v1255_v44 = vrot.slane %v1254_v42, 2  ;;  %v1249_v46 = vrot.slane %v1248_v43, 1 }
  0xd0   :  { %v1256_v45 = vadd.f32 %v1255_v44, %v1254_v42  ;;  %v1250_v49 = vadd.f32 %v1249_v46, %v1248_v43 }
  0xd2   :  { %v1257_v47 = vrot.slane %v1256_v45, 1 }
  0xd4   :  { %v1258_v48 = vadd.f32 %v1257_v47, %v1256_v45 }
  0xd6   :  { %1338 = vpush %v1258_v48 }
  0xd7   :  { %1340 = vpush %v1250_v49 }
 0x107   :  { %s1339_s18 = spop %1338 }
 0x108   :  { %s1341_s19 = spop %1340 }
 0x109   :  { %s1261_s20 = smul.f32 1e-10, %s1341_s19 }
 0x10b   :  { %p1262_p4 = scmp.le.f32.partialorder %s1339_s18, %s1261_s20 }
 0x10c   :  { %s1962_s0 = smov (!%p1262_p4), 0  }
 0x10d   :  { %1265 = sbr.rel (%p1262_p4) target bundleno = 951 (0x3b7), region = 324 }
 0x114 LB: > { %s1967_s21 = smov 0   ;;  %s1849_s0 = sphi %s1962_s0, %s2183_s0  }
 0x115 LB: >> { %s408_s22 = smov [#allocation15]  ;;  %v412_v10 = vmov %v1936_v10  ;;  %v415_v11 = vmov %v1938_v11  ;;  %s428_s23 = smov [#allocation16]  ;;  %vm731_vm14 = vcmp.eq.s32.totalorder %v1938_v11, 0  ;;  %vm743_vm15 = vcmp.eq.s32.totalorder %v1938_v11, 7  ;;  %s1853_s21 = sphi %s1967_s21, %s407_s21  }
 0x116   : >> { %v432_v10 = vmov %v1936_v10  ;;  %v435_v11 = vmov %v1938_v11  ;;  %v416_v50 = vld [vmem:[%s408_s22] sm:$0xff]  ;;  %vm419_vm5 = vcmp.eq.s32.totalorder %v415_v11, %v412_v10  ;;  %s448_s24 = smov [#allocation18]  ;;  %s409_s25 = smov [#allocation19] }
 0x117   : >> { %vm439_vm6 = vcmp.eq.s32.totalorder %v435_v11, %v432_v10  ;;  %v452_v10 = vmov %v1936_v10  ;;  %v455_v11 = vmov %v1938_v11  ;;  %v420_v51 = vsel %vm419_vm5, %v416_v50, 0.0  ;;  %v436_v52 = vld [vmem:[%s428_s23] sm:$0xff]  ;;  %s429_s1 = smov [#allocation20]  ;;  %s449_s26 = smov [#allocation21] }
 0x118   : >> { %vm459_vm7 = vcmp.eq.s32.totalorder %v455_v11, %v452_v10  ;;  %v421_v53 = vrot.slane %v420_v51, 4  ;;  %v440_v54 = vsel %vm439_vm6, %v436_v52, 0.0  ;;  %v456_v55 = vld [vmem:[%s448_s24] sm:$0xff]  ;;  %s472_s27 = smov [#allocation20]  ;;  %s470_s28 = smov [#allocation19]  ;;  %v521_v10 = vmov %v1936_v10 }
 0x119   : >> { %v441_v56 = vrot.slane %v440_v54, 4  ;;  %v460_v57 = vsel %vm459_vm7, %v456_v55, 0.0  ;;  %s474_s29 = smov [#allocation21]  ;;  %s509_s30 = smov [#allocation22]  ;;  %v524_v11 = vmov %v1938_v11  ;;  %v536_v10 = vmov %v1936_v10 }
 0x11a   : >> { %v422_v58 = vadd.f32 %v421_v53, %v420_v51  ;;  %v461_v59 = vrot.slane %v460_v57, 4  ;;  %s511_s2 = smov [#allocation23]  ;;  %s468_s10 = smov [#allocation24]  ;;  %v539_v11 = vmov %v1938_v11  ;;  %vm526_vm12 = vcmp.eq.s32.totalorder %v524_v11, %v521_v10 }
 0x11b   : >> { %v442_v60 = vadd.f32 %v441_v56, %v440_v54  ;;  %s469_s11 = smov [#allocation25]  ;;  %s513_s10 = smov %s468_s10  ;;  %vm541_vm13 = vcmp.eq.s32.totalorder %v539_v11, %v536_v10  ;;  %v634_v10 = vmov %v1936_v10  ;;  %v637_v11 = vmov %v1938_v11 }
 0x11c   : >> { %v423_v61 = vrot.slane %v422_v58, 2  ;;  %v462_v62 = vadd.f32 %v461_v59, %v460_v57  ;;  %s515_s11 = smov %s469_s11  ;;  %s517_s12 = smov [#allocation24]  ;;  %v607_v10 = vmov %v1936_v10  ;;  %v610_v11 = vmov %v1938_v11 }
 0x11d   : >> { %v443_v63 = vrot.slane %v442_v60, 2  ;;  %s532_s3 = smov [#allocation25]  ;;  %s530_s13 = smov [#allocation26]  ;;  %v648_v10 = vmov %v1936_v10  ;;  %v651_v11 = vmov %v1938_v11  ;;  %vm641_vm0 = vcmp.eq.s32.totalorder %v637_v11, %v634_v10 }
 0x11e   : >> { %v424_v0 = vadd.f32 %v423_v61, %v422_v58  ;;  %v463_v1 = vrot.slane %v462_v62, 2  ;;  %s547_s14 = smov [#allocation26]  ;;  %s1982_s15 = smov [#allocation15]  ;;  %v621_v10 = vmov %v1936_v10  ;;  %v624_v11 = vmov %v1938_v11 }
 0x11f   : >> { %v444_v2 = vadd.f32 %v443_v63, %v442_v60  ;;  %s545_s16 = smov [#allocation27]  ;;  %s1984_s17 = smov [#allocation16]  ;;  %v555_v49 = vld [vmem:[%s1982_s15] sm:$0xff]  ;;  %vm615_vm1 = vcmp.eq.s32.totalorder %v610_v11, %v607_v10  ;;  %vm656_vm3 = vcmp.eq.s32.totalorder %v651_v11, %v648_v10  ;;  %vm628_vm4 = vcmp.eq.s32.totalorder %v624_v11, %v621_v10 }
 0x120   : >> { %v425_v3 = vrot.slane %v424_v0, 1  ;;  %v464_v4 = vadd.f32 %v463_v1, %v462_v62  ;;  %s1986_s18 = smov [#allocation18]  ;;  %s771_s19 = smov [#allocation26]  ;;  %v556_v50 = vld [vmem:[%s1984_s17] sm:$0xff]  ;;  %vm670_vm5 = vcmp.eq.s32.totalorder %v1936_v10, 0  ;;  %vm674_vm6 = vcmp.eq.s32.totalorder %v1936_v10, 1 }
 0x121   : >> { %v445_v5 = vrot.slane %v444_v2, 1  ;;  %s1988_s20 = smov [#allocation8]  ;;  %s1990_s22 = smov [#allocation10]  ;;  %v558_v51 = vld [vmem:[%s1986_s18] sm:$0xff]  ;;  %vm687_vm7 = vcmp.eq.s32.totalorder %v1936_v10, 7 }
 0x122   : >> { %v426_v6 = vadd.f32 %v425_v3, %v424_v0  ;;  %v465_v7 = vrot.slane %v464_v4, 1  ;;  %s1992_s23 = smov [#allocation12]  ;;  %s1995_s24 = smov [#allocation13]  ;;  %v779_v52 = vld [vmem:[%s1988_s20] sm:$0xff] }
 0x123   : >> { %v446_v8 = vadd.f32 %v445_v5, %v444_v2  ;;  %v780_v53 = vld [vmem:[%s1990_s22] sm:$0xff]  ;;  %s407_s21 = sadd.s32 1, %s1853_s21  }
 0x124   : >> { %427 = vst [vmem:[%s409_s25] sm:$0x1] %v426_v6  ;;  %v466_v9 = vadd.f32 %v465_v7, %v464_v4  ;;  %s1997_s25 = smov [#allocation17]  ;;  %v781_v56 = vld [vmem:[%s1992_s23] sm:$0xff]  ;;  %p404_p5 = scmp.ge.s32.totalorder %s407_s21, 15  }
 0x125   : >> { %447 = vst [vmem:[%s429_s1] sm:$0x1] %v446_v8  ;;  %v782_v57 = vld [vmem:[%s1995_s24] sm:$0xff]  ;;  %s549_s1 = smov [#allocation27]  ;;  %v308_v10 = vmov (%p404_p5), %v1936_v10  ;;  %v311_v11 = vmov (%p404_p5), %v1938_v11 }
 0x126   : >> { %467 = vst [vmem:[%s449_s26] sm:$0x1] %v466_v9  ;;  %s773_s26 = smov [#allocation27]  ;;  %v557_v58 = vld [vmem:[%s1997_s25] sm:$0xff]  ;;  %v361_v10 = vmov (%p404_p5), %v1936_v10 }
 0x12b   : >> { %v471_v14 = vld [vmem:[%s470_s28] sm:$0xff]  ;;  %s800_s28 = smov [#allocation12] }
 0x12c   : >> { %v473_v12 = vld [vmem:[%s472_s27] sm:$0xff]  ;;  %v494_v27 = vand.u32 2147483647, %v471_v14  ;;  %s799_s27 = smov [#allocation8] }
 0x12d   : >> { %v477_v13 = vmul.f32 2.0, %v473_v12  ;;  %v475_v15 = vld [vmem:[%s474_s29] sm:$0xff]  ;;  %v495_v32 = vand.u32 2147483647, %v473_v12  ;;  %s575_s29 = smov [#allocation24] }
 0x12e   : >> { %v476_v16 = vsub.f32 %v475_v15, %v471_v14  ;;  %v496_v28 = vand.u32 2147483647, %v475_v15 }
 0x12f   : >> { %1593 = vrcp.f32 %v477_v13 }
 0x130   : >> { %v497_v31 = vmin.f32 %v494_v27, %v496_v28 }
 0x132   : >> { %v498_v33 = vmul.f32 1.1920929e-08, %v497_v31 }
 0x134   : >> { %vm499_vm11 = vcmp.le.f32.partialorder %v495_v32, %v498_v33 }
 0x139   : >> { %v1594_v17 = vpop.eup %1593 }
 0x13a   : >> { %v479_v18 = vmul.f32 %v1594_v17, %v476_v16 }
 0x13c   : >> { %v481_v19 = vmul.f32 %v479_v18, %v479_v18  ;;  %vm480_vm10 = vcmp.ge.f32.partialorder %v479_v18, 0.0 }
 0x13e   : >> { %v482_v20 = vadd.f32 1.0, %v481_v19 }
 0x140   : >> { %1595 = vrsqrt.f32 %v482_v20  ;;  %vm485_vm8 = vcmp.eq.f32.partialorder %v482_v20, inf  ;;  %v488_v22 = vand.u32 2147483648, %v482_v20  ;;  %vm487_vm9 = vcmp.eq.f32.partialorder %v482_v20, 0.0 }
 0x14a   : >> { %v1596_v21 = vpop.eup %1595 }
 0x14b   : >> { %v484_v23 = vmul.f32 %v1596_v21, %v482_v20 }
 0x14d   : >> { %v486_v24 = vsel %vm485_vm8, %v482_v20, %v484_v23  ;;  %vm323_vm8 = vcmp.eq.s32.totalorder (%p404_p5), %v311_v11, %v308_v10  ;;  %v364_v11 = vmov (%p404_p5), %v1938_v11  ;;  %v327_v10 = vmov (%p404_p5), %v1936_v10 }
 0x14e   : >> { %v489_v25 = vsel %vm487_vm9, %v488_v22, %v486_v24  ;;  %v330_v11 = vmov (%p404_p5), %v1938_v11  ;;  %v344_v10 = vmov (%p404_p5), %v1936_v10  ;;  %vm376_vm9 = vcmp.eq.s32.totalorder (%p404_p5), %v364_v11, %v361_v10 }
 0x14f   : >> { %v490_v26 = vxor.u32 2147483648, %v489_v25  ;;  %v347_v11 = vmov (%p404_p5), %v1938_v11 }
 0x151   : >> { %v491_v29 = vsel %vm480_vm10, %v489_v25, %v490_v26 }
 0x152   : >> { %v492_v30 = vadd.f32 %v491_v29, %v479_v18 }
 0x154   : >> { %1597 = vrcp.f32 %v492_v30 }
 0x15e   : >> { %v1598_v34 = vpop.eup %1597 }
 0x15f   : >> { %v500_v35 = vsel %vm499_vm11, 0.0, %v1598_v34 }
 0x160   : >> { %v501_v36 = vmul.f32 %v500_v35, %v500_v35  ;;  %v505_v37 = vmul.f32 %v500_v35, %v473_v12 }
 0x162   : >> { %v502_v38 = vadd.f32 1.0, %v501_v36  ;;  %v506_v39 = vsub.f32 %v471_v14, %v505_v37  ;;  %v508_v40 = vadd.f32 %v505_v37, %v475_v15 }
 0x164   : >> { %1599 = vrsqrt.f32 %v502_v38  ;;  %510 = vst [vmem:[%s509_s30] sm:$0xff] %v506_v39  ;;  %512 = vst [vmem:[%s511_s2] sm:$0xff] %v508_v40  ;;  %s577_s30 = smov [#allocation25]  ;;  %s2014_s2 = smov [#allocation10] }
 0x16e   : >> { %v1600_v41 = vpop.eup %1599 }
 0x16f   : >> { %514 = vst [vmem:[%s513_s10] sm:$0xff] %v1600_v41  ;;  %v504_v42 = vmul.f32 %v1600_v41, %v500_v35  ;;  %s2016_s10 = smov [#allocation13] }
 0x171   : >> { %516 = vst [vmem:[%s515_s11] sm:$0xff] %v504_v42  ;;  %s2020_s11 = smov [#allocation17] }
 0x176   : >> { %v518_v43 = vld [vmem:[%s517_s12] ss:$0 sm:$0xff]  ;;  %s2022_s12 = smov [#allocation18] }
 0x177   : >> { %v527_v44 = vsel %vm526_vm12, %v518_v43, 0.0  ;;  %v576_v23 = vld [vmem:[%s575_s29] ss:$0 sm:$0xff]  ;;  %s748_s29 = smov [#allocation18] }
 0x178   : >> { %528 = vadd.xlane.f32.xlu0 %v527_v44  ;;  %v533_v45 = vld [vmem:[%s532_s3] ss:$0 sm:$0xff]  ;;  %s2024_s3 = smov [#allocation15] }
 0x179   : >> { %v542_v46 = vsel %vm541_vm13, %v533_v45, 0.0  ;;  %v578_v24 = vld [vmem:[%s577_s30] ss:$0 sm:$0xff]  ;;  %s847_s30 = sadd.s32 (%p404_p5), 1, %s1849_s0  }
 0x17a   : > { %p400_p6 = scmp.ge.s32.totalorder (%p404_p5), %s847_s30, 15  ;;  %s2183_s0 = smov (%p404_p5), %s847_s30 }
 0x17c   : >> { %543 = vadd.xlane.f32.xlu0 %v542_v46 }
 0x205   : >> { %v529_v47 = vpop.xlane.xlu0 %528 }
 0x206   : >> { %531 = vst [vmem:[%s530_s13] sm:$0xff] %v529_v47  ;;  %s2026_s13 = smov [#allocation16] }
 0x209   : >> { %v544_v48 = vpop.xlane.xlu0 %543 }
 0x20a   : >> { %546 = vst [vmem:[%s545_s16] sm:$0xff] %v544_v48  ;;  %s631_s16 = smov [#allocation17] }
 0x20d   : >> { %v548_v54 = vld [vmem:[%s547_s14] sm:$0xff]  ;;  %s604_s14 = smov [#allocation22] }
 0x20e   : >> { %v772_v55 = vld [vmem:[%s771_s19] sm:$0xff]  ;;  %v559_v59 = vmul.f32 %v555_v49, %v548_v54  ;;  %v562_v60 = vmul.f32 %v556_v50, %v548_v54  ;;  %v569_v61 = vmul.f32 %v558_v51, %v548_v54  ;;  %v566_v4 = vmul.f32 %v557_v58, %v548_v54  ;;  %s618_s19 = smov [#allocation16] }
 0x20f   : >> { %v783_v62 = vmul.f32 %v779_v52, %v772_v55  ;;  %v786_v63 = vmul.f32 %v780_v53, %v772_v55  ;;  %v790_v0 = vmul.f32 %v781_v56, %v772_v55  ;;  %v793_v1 = vmul.f32 %v782_v57, %v772_v55  ;;  %v611_v55 = vld [vmem:[%s604_s14] ss:$0 sm:$0xff] }
 0x211   : >> { %v550_v2 = vld [vmem:[%s549_s1] sm:$0xff]  ;;  %s2063_s1 = smov [#allocation18] }
 0x212   : >> { %v774_v3 = vld [vmem:[%s773_s26] sm:$0xff]  ;;  %v563_v5 = vmul.f32 %v558_v51, %v550_v2  ;;  %v565_v6 = vmul.f32 %v555_v49, %v550_v2  ;;  %v568_v7 = vmul.f32 %v556_v50, %v550_v2  ;;  %v560_v14 = vmul.f32 %v557_v58, %v550_v2  ;;  %s723_s26 = smov [#allocation15] }
 0x213   : >> { %v784_v8 = vmul.f32 %v781_v56, %v774_v3  ;;  %v787_v9 = vmul.f32 %v782_v57, %v774_v3  ;;  %v789_v12 = vmul.f32 %v779_v52, %v774_v3  ;;  %v792_v13 = vmul.f32 %v780_v53, %v774_v3 }
 0x214   : >> { %v564_v15 = vsub.f32 %v562_v60, %v563_v5  ;;  %v570_v16 = vadd.f32 %v569_v61, %v568_v7  ;;  %v567_v18 = vadd.f32 %v566_v4, %v565_v6  ;;  %v561_v22 = vsub.f32 %v559_v59, %v560_v14 }
 0x215   : >> { %v785_v17 = vsub.f32 %v783_v62, %v784_v8  ;;  %v788_v19 = vsub.f32 %v786_v63, %v787_v9  ;;  %v791_v20 = vadd.f32 %v790_v0, %v789_v12  ;;  %v794_v21 = vadd.f32 %v793_v1, %v792_v13 }
 0x216   : >> { %572 = vst [vmem:[%s1984_s17] sm:$0xff] %v564_v15  ;;  %574 = vst [vmem:[%s1986_s18] sm:$0xff] %v570_v16  ;;  %s603_s17 = smov [#allocation15]  ;;  %s644_s18 = smov [#allocation18] }
 0x217   : >> { %795 = vst [vmem:[%s1988_s20] sm:$0xff] %v785_v17  ;;  %573 = vst [vmem:[%s1997_s25] sm:$0xff] %v567_v18  ;;  %s2060_s20 = smov [#allocation17]  ;;  %s1857_s25 = smov 127  }
 0x218   : >> { %796 = vst [vmem:[%s1990_s22] sm:$0xff] %v788_v19  ;;  %797 = vst [vmem:[%s1992_s23] sm:$0xff] %v791_v20  ;;  %s659_s22 = smov [#allocation15]  ;;  %s1856_s23 = smov 1  }
 0x219   : >> { %798 = vst [vmem:[%s1995_s24] sm:$0xff] %v794_v21  ;;  %571 = vst [vmem:[%s1982_s15] sm:$0xff] %v561_v22  ;;  %s645_s15 = smov [#allocation23]  ;;  %s660_s24 = smov [#allocation16] }
 0x21a   : >> { %v652_v56 = vld [vmem:[%s645_s15] ss:$0 sm:$0xff] }
 0x21d   : >> { %v586_v39 = vld [vmem:[%s2022_s12] sm:$0xff] }
 0x21e   : >> { %v801_v25 = vld [vmem:[%s799_s27] ss:$0 sm:$0xff]  ;;  %v1325_v27 = vld [vmem:[%s799_s27 + $0x7] ss:$0 sm:$0xff]  ;;  %v594_v42 = vmul.f32 %v586_v39, %v578_v24  ;;  %v597_v46 = vmul.f32 %v586_v39, %v576_v23 }
 0x21f   : >> { %v1324_v26 = vld [vmem:[%s799_s27 - $0x1] sm:$0xfe]  ;;  %v1329_v34 = vld [vmem:[%s2014_s2 + $0x7] ss:$0 sm:$0xff] }
 0x220   : >> { %v808_v28 = vsel %vm731_vm14, %v801_v25, %v1324_v26  ;;  %v812_v29 = vld [vmem:[%s800_s28] ss:$0 sm:$0xff]  ;;  %v1327_v30 = vld [vmem:[%s800_s28 + $0x1] sm:$0x7f] }
 0x221   : >> { %v825_v31 = vld [vmem:[%s2014_s2] ss:$0 sm:$0xff]  ;;  %811 = vst [vmem:[%s799_s27] sm:$0xff] %v808_v28  ;;  %v820_v32 = vsel %vm743_vm15, %v1325_v27, %v1327_v30  ;;  %v1331_v37 = vld [vmem:[%s2016_s10 + $0x1] sm:$0x7f] }
 0x222   : >> { %v1328_v33 = vld [vmem:[%s2014_s2 - $0x1] sm:$0xfe]  ;;  %1326 = vst [vmem:[%s799_s27 + $0x1] sm:$0x1] %v812_v29  ;;  %822 = vst [vmem:[%s800_s28] sm:$0xff] %v820_v32  ;;  %v844_v40 = vsel %vm743_vm15, %v1329_v34, %v1331_v37  ;;  %s747_s27 = smov [#allocation16]  ;;  %s724_s28 = smov [#allocation17] }
 0x223   : >> { %v836_v35 = vld [vmem:[%s2016_s10] ss:$0 sm:$0xff]  ;;  %v832_v36 = vsel %vm731_vm14, %v825_v31, %v1328_v33 }
 0x224   : >> { %v585_v38 = vld [vmem:[%s2020_s11] sm:$0xff]  ;;  %835 = vst [vmem:[%s2014_s2] sm:$0xff] %v832_v36  ;;  %846 = vst [vmem:[%s2016_s10] sm:$0xff] %v844_v40  ;;  %s331_s10 = smov (%p404_p5), [#allocation16] }
 0x225   : >> { %v593_v41 = vmul.f32 %v585_v38, %v576_v23  ;;  %v596_v43 = vmul.f32 %v585_v38, %v578_v24  ;;  %v583_v44 = vld [vmem:[%s2024_s3] sm:$0xff]  ;;  %1330 = vst [vmem:[%s2014_s2 + $0x1] sm:$0x1] %v836_v35  ;;  %s312_s2 = smov (%p404_p5), [#allocation15] }
 0x226   : >> { %v584_v45 = vld [vmem:[%s2026_s13] sm:$0xff]  ;;  %v587_v47 = vmul.f32 %v583_v44, %v576_v23  ;;  %v590_v49 = vmul.f32 %v583_v44, %v578_v24 }
 0x227   : >> { %v588_v48 = vmul.f32 %v584_v45, %v578_v24  ;;  %v595_v50 = vsub.f32 %v593_v41, %v594_v42  ;;  %v591_v51 = vmul.f32 %v584_v45, %v576_v23  ;;  %v598_v52 = vadd.f32 %v597_v46, %v596_v43 }
 0x229   : >> { %v589_v53 = vsub.f32 %v587_v47, %v588_v48  ;;  %601 = vst [vmem:[%s2020_s11] sm:$0xff] %v595_v50  ;;  %v592_v54 = vadd.f32 %v591_v51, %v590_v49  ;;  %602 = vst [vmem:[%s2022_s12] sm:$0xff] %v598_v52  ;;  %s348_s11 = smov (%p404_p5), [#allocation17]  ;;  %s365_s12 = smov (%p404_p5), [#allocation18] }
 0x22b   : >> { %599 = vst [vmem:[%s2024_s3] sm:$0xff] %v589_v53  ;;  %600 = vst [vmem:[%s2026_s13] sm:$0xff] %v592_v54 }
 0x230   : >> { %v638_v57 = vld [vmem:[%s631_s16] sm:$0xff] }
 0x231   : >> { %v642_v58 = vsel %vm641_vm0, 0.0, %v638_v57  ;;  %v653_v60 = vld [vmem:[%s644_s18] sm:$0xff] }
 0x232   : >> { %v612_v59 = vld [vmem:[%s603_s17] sm:$0xff]  ;;  %643 = vst [vmem:[%s631_s16] sm:$0xff] %v642_v58  ;;  %v657_v63 = vsel %vm656_vm3, %v652_v56, %v653_v60 }
 0x233   : >> { %v616_v61 = vsel %vm615_vm1, %v611_v55, %v612_v59  ;;  %v625_v62 = vld [vmem:[%s618_s19] sm:$0xff]  ;;  %658 = vst [vmem:[%s644_s18] sm:$0xff] %v657_v63 }
 0x234   : >> { %617 = vst [vmem:[%s603_s17] sm:$0xff] %v616_v61  ;;  %v629_v0 = vsel %vm628_vm4, 0.0, %v625_v62 }
 0x235   : >> { %630 = vst [vmem:[%s618_s19] sm:$0xff] %v629_v0 }
 0x239   : >> { %v697_v1 = vld [vmem:[%s2060_s20] sm:$0xff] }
 0x23a   : >> { %698 = vrot.lane.b32.xlu0 %v697_v1, %s1856_s23  ;;  %v693_v4 = vld [vmem:[%s2063_s1] sm:$0xff] }
 0x23b   : >> { %v665_v2 = vld [vmem:[%s659_s22] sm:$0xff] }
 0x23c   : >> { %666 = vrot.lane.b32.xlu1 %v665_v2, %s1856_s23  ;;  %v661_v3 = vld [vmem:[%s660_s24] sm:$0xff] }
 0x240   : >> { %662 = vrot.lane.b32.xlu1 %v661_v3, %s1856_s23 }
 0x244   : >> { %683 = vrot.lane.b32.xlu1 %v661_v3, %s1857_s25 }
 0x248   : >> { %694 = vrot.lane.b32.xlu1 %v693_v4, %s1856_s23 }
 0x24c   : >> { %715 = vrot.lane.b32.xlu1 %v693_v4, %s1857_s25 }
 0x2ac   : >> { %v699_v13 = vpop.permute.xlu0 %698 }
 0x2ad   : >> { %v703_v15 = vsel %vm670_vm5, %v697_v1, %v699_v13 }
 0x2ae   : >> { %v667_v5 = vpop.permute.xlu1 %666 }
 0x2af   : >> { %v671_v6 = vsel %vm670_vm5, %v665_v2, %v667_v5 }
 0x2b2   : >> { %v663_v7 = vpop.permute.xlu1 %662 }
 0x2b3   : >> { %v675_v8 = vsel %vm674_vm6, %v663_v7, %v671_v6 }
 0x2b4   : >> { %v681_v9 = vsel %vm1183_vm2, %v675_v8, 0.0 }
 0x2b5   : >> { %689 = vst [vmem:[%s659_s22] sm:$0xff] %v681_v9 }
 0x2b6   : >> { %v684_v12 = vpop.permute.xlu1 %683 }
 0x2b7   : >> { %v688_v14 = vsel %vm687_vm7, %v665_v2, %v684_v12 }
 0x2b8   : >> { %690 = vst [vmem:[%s660_s24] sm:$0xff] %v688_v14 }
 0x2ba   : >> { %v695_v16 = vpop.permute.xlu1 %694 }
 0x2bb   : >> { %v707_v17 = vsel %vm674_vm6, %v695_v16, %v703_v15 }
 0x2bc   : >> { %v725_v18 = vld [vmem:[%s723_s26] ss:$0 sm:$0xff]  ;;  %v1317_v20 = vld [vmem:[%s723_s26 + $0x7] ss:$0 sm:$0xff]  ;;  %v713_v22 = vsel %vm1183_vm2, %v707_v17, 0.0 }
 0x2bd   : >> { %v1316_v19 = vld [vmem:[%s723_s26 - $0x1] sm:$0xfe]  ;;  %721 = vst [vmem:[%s2060_s20] sm:$0xff] %v713_v22 }
 0x2be   : >> { %v732_v21 = vsel %vm731_vm14, %v725_v18, %v1316_v19  ;;  %v716_v23 = vpop.permute.xlu1 %715 }
 0x2bf   : >> { %735 = vst [vmem:[%s723_s26] sm:$0xff] %v732_v21  ;;  %v749_v24 = vld [vmem:[%s747_s27] ss:$0 sm:$0xff]  ;;  %v1321_v26 = vld [vmem:[%s747_s27 + $0x7] ss:$0 sm:$0xff]  ;;  %v720_v27 = vsel %vm687_vm7, %v697_v1, %v716_v23 }
 0x2c0   : >> { %v1320_v25 = vld [vmem:[%s747_s27 - $0x1] sm:$0xfe]  ;;  %722 = vst [vmem:[%s2063_s1] sm:$0xff] %v720_v27 }
 0x2c1   : >> { %v756_v28 = vsel %vm731_vm14, %v749_v24, %v1320_v25 }
 0x2c2   : >> { %759 = vst [vmem:[%s747_s27] sm:$0xff] %v756_v28 }
 0x2c4   : >> { %v736_v29 = vld [vmem:[%s724_s28] ss:$0 sm:$0xff]  ;;  %v1319_v30 = vld [vmem:[%s724_s28 + $0x1] sm:$0x7f] }
 0x2c5   : >> { %1318 = vst [vmem:[%s723_s26 + $0x1] sm:$0x1] %v736_v29  ;;  %v744_v31 = vsel %vm743_vm15, %v1317_v20, %v1319_v30  ;;  %406 = sbr.rel (!%p404_p5) target bundleno = 277 (0x115), region = 319 }
 0x2c6   : >> { %746 = vst [vmem:[%s724_s28] sm:$0xff] %v744_v31 }
 0x2c7   : >> { %v760_v32 = vld [vmem:[%s748_s29] ss:$0 sm:$0xff]  ;;  %v1323_v33 = vld [vmem:[%s748_s29 + $0x1] sm:$0x7f] }
 0x2c8   : >> { %1322 = vst [vmem:[%s747_s27 + $0x1] sm:$0x1] %v760_v32  ;;  %v768_v34 = vsel %vm743_vm15, %v1321_v26, %v1323_v33 }
 0x2c9   : >> { %770 = vst [vmem:[%s748_s29] sm:$0xff] %v768_v34 }
 0x2cc   : > { %v318_v35 = vld [vmem:[%s312_s2] sm:$0xff] }
 0x2cd   : > { %v319_v37 = vsel %vm1183_vm2, %v318_v35, 0.0  ;;  %v354_v39 = vld [vmem:[%s348_s11] sm:$0xff] }
 0x2ce   : > { %v320_v41 = vmul.f32 %v319_v37, %v319_v37  ;;  %v355_v43 = vsel %vm1183_vm2, %v354_v39, 0.0 }
 0x2cf   : > { %v337_v36 = vld [vmem:[%s331_s10] sm:$0xff]  ;;  %v356_v45 = vmul.f32 %v355_v43, %v355_v43 }
 0x2d0   : > { %v338_v38 = vsel %vm1183_vm2, %v337_v36, 0.0  ;;  %v371_v40 = vld [vmem:[%s365_s12] sm:$0xff]  ;;  %v324_v48 = vsel %vm323_vm8, 0.0, %v320_v41 }
 0x2d1   : > { %v339_v42 = vmul.f32 %v338_v38, %v338_v38  ;;  %v372_v44 = vsel %vm1183_vm2, %v371_v40, 0.0 }
 0x2d2   : > { %v373_v47 = vmul.f32 %v372_v44, %v372_v44 }
 0x2d3   : > { %v341_v46 = vadd.f32 %v339_v42, %v320_v41  ;;  %v340_v49 = vadd.f32 %v339_v42, %v324_v48 }
 0x2d4   : > { %v377_v52 = vsel %vm376_vm9, 0.0, %v373_v47 }
 0x2d5   : > { %v358_v50 = vadd.f32 %v356_v45, %v341_v46  ;;  %v357_v51 = vadd.f32 %v356_v45, %v340_v49 }
 0x2d7   : > { %v379_v53 = vadd.f32 %v373_v47, %v358_v50  ;;  %v378_v54 = vadd.f32 %v377_v52, %v357_v51 }
 0x2d9   : > { %380 = vadd.xlane.f32.xlu0 %v379_v53 }
 0x2dd   : > { %388 = vadd.xlane.f32.xlu0 %v378_v54 }
 0x366   : > { %v381_v55 = vpop.xlane.xlu0 %380 }
 0x367   : > { %v382_v56 = vrot.slane %v381_v55, 4 }
 0x369   : > { %v383_v57 = vadd.f32 %v382_v56, %v381_v55 }
 0x36a   : > { %v389_v58 = vpop.xlane.xlu0 %388 }
 0x36b   : > { %v384_v59 = vrot.slane %v383_v57, 2  ;;  %v390_v60 = vrot.slane %v389_v58, 4 }
 0x36d   : > { %v391_v61 = vadd.f32 %v390_v60, %v389_v58  ;;  %v385_v62 = vadd.f32 %v384_v59, %v383_v57 }
 0x36f   : > { %v392_v63 = vrot.slane %v391_v61, 2  ;;  %v386_v1 = vrot.slane %v385_v62, 1 }
 0x371   : > { %v393_v0 = vadd.f32 %v392_v63, %v391_v61  ;;  %v387_v4 = vadd.f32 %v386_v1, %v385_v62 }
 0x373   : > { %v394_v2 = vrot.slane %v393_v0, 1 }
 0x375   : > { %v395_v3 = vadd.f32 %v394_v2, %v393_v0 }
 0x377   : > { %1342 = vpush %v395_v3 }
 0x378   : > { %1344 = vpush %v387_v4 }
 0x3a8   : > { %s1343_s21 = spop %1342 }
 0x3a9   : > { %s1345_s3 = spop %1344 }
 0x3aa   : > { %s398_s13 = smul.f32 1e-10, %s1345_s3 }
 0x3ac   : > { %p399_p7 = scmp.le.f32.partialorder %s1343_s21, %s398_s13 }
 0x3ae   : > { %p401_p8 = por %p400_p6, %p399_p7 }
 0x3b0   :  { %849 = sbr.rel (!%p401_p8) target bundleno = 276 (0x114), region = 330 }
 0x3b7 PF:  { %s850_s14 = smov [#allocation15]  ;;  %v854_v10 = vmov %v1936_v10  ;;  %v857_v11 = vmov %v1938_v11  ;;  %s1858_s15 = smov [#allocation10]  }
 0x3b8   :  { %v874_v10 = vmov %v1936_v10  ;;  %v877_v11 = vmov %v1938_v11  ;;  %s1040_s16 = sshll.u32 %s1858_s15, 4  ;;  %v858_v5 = vld [vmem:[%s850_s14] sm:$0xff]  ;;  %vm861_vm10 = vcmp.eq.s32.totalorder %v857_v11, %v854_v10  ;;  %s870_s0 = smov [#allocation18]  ;;  %s1041_s16 = int_to_ptr.vmem [resolvable:$true] %s1040_s16 }
 0x3b9   :  { %vm881_vm11 = vcmp.eq.s32.totalorder %v877_v11, %v874_v10  ;;  %v862_v6 = vsel %vm861_vm10, %v858_v5, 0.0  ;;  %s1601_s17 = scalar_lea.vmem %s1041_s16, 128  ;;  %p1606_p10 = scmp.lt.s32.totalorder %s1041_s16, %s1041_s16 }
 0x3ba   :  { %p1602_p9 = scmp.ne.s32.totalorder %s1041_s16, %s1601_s17  ;;  %p1607_p11 = scmp.lt.s32.totalorder %s1601_s17, %s1601_s17 }
 0x3bc   :  { %p1608_p12 = por %p1607_p11, %p1606_p10 }
 0x3be   :  { %p1609_p13 = pnand %p1608_p12, %p1602_p9 }
 0x3c0   :  { %1612 = shalt.err (!%p1609_p13)
}
 0x3c1   :  { %s1613_s20 = scalar_lea.hbm %s2180_s7, 128 }
 0x3c2   :  { %p1614_p0 = scmp.ne.s32.totalorder %s2180_s7, %s1613_s20  ;;  %p1617_p1 = scmp.lt.u32.totalorder %s1613_s20, %s2180_s7 }
 0x3c4   :  { %p1619_p2 = pnand %p1617_p1, %p1614_p0 }
 0x3c6   :  { %1622 = shalt.err (!%p1619_p2)
}
 0x3c7   :  { %1043 = dma.vmem_to_hbm [thread:$0]  %s1041_s16, 128, %s2180_s7, [#allocation11]   ;;  %v863_v7 = vrot.slane %v862_v6, 4  ;;  %v878_v8 = vld [vmem:[%s870_s0] sm:$0xff] }
 0x3c8   :  { %v882_v9 = vsel %vm881_vm11, %v878_v8, 0.0  ;;  %s1859_s27 = smov [#allocation8]   ;;  %s1860_s29 = smov [#allocation12]  }
 0x3c9   :  { %v864_v12 = vadd.f32 %v863_v7, %v862_v6  ;;  %v883_v13 = vrot.slane %v882_v9, 4  ;;  %s1033_s28 = sshll.u32 %s1859_s27, 4  ;;  %s1047_s30 = sshll.u32 %s1860_s29, 4  ;;  %s1034_s28 = int_to_ptr.vmem [resolvable:$true] %s1033_s28  ;;  %s1048_s30 = int_to_ptr.vmem [resolvable:$true] %s1047_s30 }
 0x3ca   :  { %s1623_s2 = scalar_lea.vmem %s1034_s28, 128  ;;  %p1628_p4 = scmp.lt.s32.totalorder %s1034_s28, %s1034_s28 }
 0x3cb   :  { %v865_v14 = vrot.slane %v864_v12, 2  ;;  %v884_v15 = vadd.f32 %v883_v13, %v882_v9  ;;  %p1624_p3 = scmp.ne.s32.totalorder %s1034_s28, %s1623_s2  ;;  %p1629_p5 = scmp.lt.s32.totalorder %s1623_s2, %s1623_s2 }
 0x3cd   :  { %p1630_p6 = por %p1629_p5, %p1628_p4 }
 0x3cf   :  { %p1631_p7 = pnand %p1630_p6, %p1624_p3 }
 0x3d1   :  { %1634 = shalt.err (!%p1631_p7)
}
 0x3d2   :  { %s1635_s11 = scalar_lea.hbm %s2179_s6, 128 }
 0x3d3   :  { %p1636_p8 = scmp.ne.s32.totalorder %s2179_s6, %s1635_s11  ;;  %p1639_p9 = scmp.lt.u32.totalorder %s1635_s11, %s2179_s6 }
 0x3d5   :  { %p1641_p10 = pnand %p1639_p9, %p1636_p8 }
 0x3d7   :  { %1644 = shalt.err (!%p1641_p10)
}
 0x3d8   :  { %1036 = dma.vmem_to_hbm [thread:$0]  %s1034_s28, 128, %s2179_s6, [#allocation9]   ;;  %v866_v10 = vadd.f32 %v865_v14, %v864_v12  ;;  %v885_v11 = vrot.slane %v884_v15, 2 }
 0x3d9   :  { %s1645_s16 = scalar_lea.vmem %s1048_s30, 128  ;;  %p1650_p12 = scmp.lt.s32.totalorder %s1048_s30, %s1048_s30 }
 0x3da   :  { %p1646_p11 = scmp.ne.s32.totalorder %s1048_s30, %s1645_s16  ;;  %p1651_p13 = scmp.lt.s32.totalorder %s1645_s16, %s1645_s16 }
 0x3dc   :  { %p1652_p0 = por %p1651_p13, %p1650_p12 }
 0x3de   :  { %p1653_p1 = pnand %p1652_p0, %p1646_p11 }
 0x3e0   :  { %1656 = shalt.err (!%p1653_p1)
}
 0x3e1   :  { %s1657_s18 = scalar_lea.hbm %s2181_s8, 128 }
 0x3e2   :  { %p1658_p2 = scmp.ne.s32.totalorder %s2181_s8, %s1657_s18  ;;  %p1661_p3 = scmp.lt.u32.totalorder %s1657_s18, %s2181_s8 }
 0x3e4   :  { %p1663_p4 = pnand %p1661_p3, %p1658_p2 }
 0x3e6   :  { %1666 = shalt.err (!%p1663_p4)
}
 0x3e7   :  { %1050 = dma.vmem_to_hbm [thread:$0]  %s1048_s30, 128, %s2181_s8, [#allocation11]   ;;  %v867_v16 = vrot.slane %v866_v10, 1  ;;  %v886_v17 = vadd.f32 %v885_v11, %v884_v15 }
 0x3e8   :  { %s1861_s25 = smov [#allocation13]   ;;  %s851_s26 = smov [#allocation4] }
 0x3e9   :  { %s1054_s1 = sshll.u32 %s1861_s25, 4  ;;  %s1055_s1 = int_to_ptr.vmem [resolvable:$true] %s1054_s1 }
 0x3ea   :  { %s1667_s27 = scalar_lea.vmem %s1055_s1, 128  ;;  %p1672_p6 = scmp.lt.s32.totalorder %s1055_s1, %s1055_s1 }
 0x3eb   :  { %p1668_p5 = scmp.ne.s32.totalorder %s1055_s1, %s1667_s27  ;;  %p1673_p7 = scmp.lt.s32.totalorder %s1667_s27, %s1667_s27 }
 0x3ed   :  { %p1674_p8 = por %p1673_p7, %p1672_p6 }
 0x3ef   :  { %p1675_p9 = pnand %p1674_p8, %p1668_p5 }
 0x3f1   :  { %1678 = shalt.err (!%p1675_p9)
}
 0x3f2   :  { %s1679_s2 = scalar_lea.hbm %s2182_s9, 128 }
 0x3f3   :  { %p1680_p10 = scmp.ne.s32.totalorder %s2182_s9, %s1679_s2  ;;  %p1683_p11 = scmp.lt.u32.totalorder %s1679_s2, %s2182_s9 }
 0x3f5   :  { %p1685_p12 = pnand %p1683_p11, %p1680_p10 }
 0x3f7   :  { %1688 = shalt.err (!%p1685_p12)
}
 0x3f8   :  { %1057 = dma.vmem_to_hbm [thread:$0]  %s1055_s1, 128, %s2182_s9, [#allocation14]   ;;  %v868_v18 = vadd.f32 %v867_v16, %v866_v10  ;;  %v887_v19 = vrot.slane %v886_v17, 1 }
 0x3f9   :  { %s871_s21 = smov [#allocation6] }
 0x3fa   :  { %869 = vst [vmem:[%s851_s26] sm:$0x1] %v868_v18  ;;  %v888_v20 = vadd.f32 %v887_v19, %v886_v17 }
 0x3fc   :  { %889 = vst [vmem:[%s871_s21] sm:$0x1] %v888_v20 }
 0x401   :  { %v893_v21 = vld [vmem:[#allocation4] sm:$0x1] }
 0x402   :  { %895 = vst [vmem:[#allocation5] sm:$0x1] %v893_v21 }
 0x403   :  { %v899_v22 = vld [vmem:[#allocation6] sm:$0x1] }
 0x404   :  { %901 = vst [vmem:[#allocation7] sm:$0x1] %v899_v22 }
 0x409   :  { %v964_v23 = vld [vmem:[#allocation5] sm:$0x1] }
 0x40a   :  { %965 = vst [vmem:[%s2177_s4] sm:$0x1] %v964_v23 }
 0x40b   :  { %v1028_v24 = vld [vmem:[#allocation7] sm:$0x1] }
 0x40c   :  { %1029 = vst [vmem:[%s2178_s5] sm:$0x1] %v1028_v24 }
 0x40d   :  { %1809 = dma.done.wait [#allocation9], 128  }
 0x40e   :  { %1810 = vsyncadd [#allocation9], 4294967168 }
 0x40f   :  { %1811 = dma.done.wait [#allocation11], 256  }
 0x410   :  { %1812 = vsyncadd [#allocation11], 4294967040 }
 0x411   :  { %1813 = dma.done.wait [#allocation14], 128  }
 0x412   :  { %1814 = vsyncadd [#allocation14], 4294967168 }
 0x413   :  { %1066 = vsyncpa [#allocation9], 1 }
 0x414   :  { %1067 = vsyncpa [#allocation11], 1 }
 0x415   :  { %1068 = vsyncpa [#allocation14], 1 }

// kernel: wmse_forward.3
= control target key start
LH: loop header
LB: loop body
LE: loop exit
PB: predicated region body
PF: predicated region fallthrough
CT: control target
= control target key end

     0   :  { %s1748_s0 = inlined_call_operand.vmem [shape: f32[64,128], index: 0, kind: input, shape index: {}]   ;;  %s1749_s1 = inlined_call_operand.vmem [shape: f32[256,128], index: 1, kind: input, shape index: {}]   ;;  %s1750_s2 = inlined_call_operand.vmem [shape: f32[128,128], index: 2, kind: output, shape index: {0}]   ;;  %s1751_s3 = inlined_call_operand.vmem [shape: f32[2], index: 3, kind: output, shape index: {1}]  }
   0x1   :  { %v22_v0 = vld [vmem:[%s1749_s1] sm:$0xff]  ;;  %v23_v1 = vld [vmem:[%s1749_s1 + $0x8] sm:$0xff]  ;;  %v24_v5 = vld [vmem:[%s1749_s1 + $0x10] sm:$0xff] }
   0x2   :  { %v38_v2 = vld [vmem:[%s1749_s1 + $0x80] sm:$0xff]  ;;  %v1031_v3 = vpack.c.bf16 %v23_v1, %v22_v0  ;;  %v39_v4 = vld [vmem:[%s1749_s1 + $0x88] sm:$0xff]  ;;  %v25_v6 = vld [vmem:[%s1749_s1 + $0x18] sm:$0xff] }
   0x3   :  { %v1063_v7 = vpack.c.bf16 %v39_v4, %v38_v2  ;;  %v1035_v8 = vpack.c.bf16 %v25_v6, %v24_v5  ;;  %v40_v9 = vld [vmem:[%s1749_s1 + $0x90] sm:$0xff]  ;;  %v41_v10 = vld [vmem:[%s1749_s1 + $0x98] sm:$0xff]  ;;  %v26_v11 = vld [vmem:[%s1749_s1 + $0x20] sm:$0xff] }
   0x4   :  { %1032 = vmatprep.subr.bf16.mxu0 %v1031_v3  ;;  %v1067_v12 = vpack.c.bf16 %v41_v10, %v40_v9  ;;  %v27_v13 = vld [vmem:[%s1749_s1 + $0x28] sm:$0xff]  ;;  %v42_v14 = vld [vmem:[%s1749_s1 + $0xa0] sm:$0xff]  ;;  %v28_v18 = vld [vmem:[%s1749_s1 + $0x30] sm:$0xff] }
   0x5   :  { %v43_v15 = vld [vmem:[%s1749_s1 + $0xa8] sm:$0xff]  ;;  %1064 = vmatprep.subr.bf16.mxu1 %v1063_v7  ;;  %1034 = vmatpush3.bf16.msra.mxu0 %v1031_v3  ;;  %v1039_v16 = vpack.c.bf16 %v27_v13, %v26_v11  ;;  %v29_v19 = vld [vmem:[%s1749_s1 + $0x38] sm:$0xff]  ;;  %v44_v20 = vld [vmem:[%s1749_s1 + $0xb0] sm:$0xff] }
   0x6   :  { %1066 = vmatpush3.bf16.msra.mxu1 %v1063_v7  ;;  %1036 = vmatprep.subr.bf16.mxu0 %v1035_v8  ;;  %v1071_v17 = vpack.c.bf16 %v43_v15, %v42_v14  ;;  %v45_v21 = vld [vmem:[%s1749_s1 + $0xb8] sm:$0xff]  ;;  %v1043_v22 = vpack.c.bf16 %v29_v19, %v28_v18  ;;  %v30_v24 = vld [vmem:[%s1749_s1 + $0x40] sm:$0xff]  ;;  %v31_v25 = vld [vmem:[%s1749_s1 + $0x48] sm:$0xff] }
   0x7   :  { %1068 = vmatprep.subr.bf16.mxu1 %v1067_v12  ;;  %v1075_v23 = vpack.c.bf16 %v45_v21, %v44_v20  ;;  %v14_v26 = vld [vmem:[%s1748_s0] sm:$0xff]  ;;  %v47_v28 = vld [vmem:[%s1749_s1 + $0xc8] sm:$0xff]  ;;  %v1047_v30 = vpack.c.bf16 %v31_v25, %v30_v24 }
   0x8   :  { %v46_v27 = vld [vmem:[%s1749_s1 + $0xc0] sm:$0xff]  ;;  %955 = vmatprep.mubr.f32.mxu0 %v14_v26 }
   0x9   :  { %1038 = vmatpush3.bf16.msra.mxu0 %v1035_v8  ;;  %v18_v29 = vld [vmem:[%s1748_s0 + $0x20] sm:$0xff] }
   0xa   :  { %1070 = vmatpush3.bf16.msra.mxu1 %v1067_v12  ;;  %1040 = vmatprep.subr.bf16.mxu0 %v1039_v16 }
   0xb   :  { %1072 = vmatprep.subr.bf16.mxu1 %v1071_v17  ;;  %993 = vmatprep.mubr.f32.mxu1 %v18_v29 }
   0xd   :  { %1042 = vmatpush3.bf16.msra.mxu0 %v1039_v16 }
   0xe   :  { %1074 = vmatpush3.bf16.msra.mxu1 %v1071_v17  ;;  %1044 = vmatprep.subr.bf16.mxu0 %v1043_v22 }
   0xf   :  { %9 = vsyncpa [#allocation3], 0  ;;  %1076 = vmatprep.subr.bf16.mxu1 %v1075_v23  ;;  %v1079_v31 = vpack.c.bf16 %v47_v28, %v46_v27  ;;  %v32_v32 = vld [vmem:[%s1749_s1 + $0x50] sm:$0xff]  ;;  %v33_v33 = vld [vmem:[%s1749_s1 + $0x58] sm:$0xff]  ;;  %vm271_vm0 = vcmask 261120   ;;  %s836_s14 = sshll.u32 %s1751_s3, 4  ;;  %s837_s14 = int_to_ptr.vmem [resolvable:$true] %s836_s14 }
  0x10   :  { %v48_v34 = vld [vmem:[%s1749_s1 + $0xd0] sm:$0xff]  ;;  %v49_v35 = vld [vmem:[%s1749_s1 + $0xd8] sm:$0xff]  ;;  %v1051_v36 = vpack.c.bf16 %v33_v33, %v32_v32  ;;  %v34_v38 = vld [vmem:[%s1749_s1 + $0x60] sm:$0xff]  ;;  %s1163_s19 = scalar_lea.vmem %s837_s14, 16  ;;  %p1168_p1 = scmp.lt.s32.totalorder %s837_s14, %s837_s14 }
  0x11   :  { %1046 = vmatpush3.bf16.msra.mxu0 %v1043_v22  ;;  %v1083_v37 = vpack.c.bf16 %v49_v35, %v48_v34  ;;  %v35_v39 = vld [vmem:[%s1749_s1 + $0x68] sm:$0xff]  ;;  %v50_v40 = vld [vmem:[%s1749_s1 + $0xe0] sm:$0xff]  ;;  %v36_v44 = vld [vmem:[%s1749_s1 + $0x70] sm:$0xff]  ;;  %p1164_p0 = scmp.ne.s32.totalorder %s837_s14, %s1163_s19  ;;  %p1169_p2 = scmp.lt.s32.totalorder %s1163_s19, %s1163_s19 }
  0x12   :  { %1078 = vmatpush3.bf16.msra.mxu1 %v1075_v23  ;;  %1048 = vmatprep.subr.bf16.mxu0 %v1047_v30  ;;  %v51_v41 = vld [vmem:[%s1749_s1 + $0xe8] sm:$0xff]  ;;  %v1055_v42 = vpack.c.bf16 %v35_v39, %v34_v38  ;;  %v37_v45 = vld [vmem:[%s1749_s1 + $0x78] sm:$0xff]  ;;  %v52_v46 = vld [vmem:[%s1749_s1 + $0xf0] sm:$0xff] }
  0x13   :  { %1080 = vmatprep.subr.bf16.mxu1 %v1079_v31  ;;  %v1087_v43 = vpack.c.bf16 %v51_v41, %v50_v40  ;;  %v53_v47 = vld [vmem:[%s1749_s1 + $0xf8] sm:$0xff]  ;;  %v1059_v48 = vpack.c.bf16 %v37_v45, %v36_v44  ;;  %v15_v50 = vld [vmem:[%s1748_s0 + $0x8] sm:$0xff]  ;;  %v16_v52 = vld [vmem:[%s1748_s0 + $0x10] sm:$0xff]  ;;  %p1170_p3 = por %p1169_p2, %p1168_p1 }
  0x14   :  { %v1091_v49 = vpack.c.bf16 %v53_v47, %v52_v46  ;;  %v19_v51 = vld [vmem:[%s1748_s0 + $0x28] sm:$0xff]  ;;  %v20_v53 = vld [vmem:[%s1748_s0 + $0x30] sm:$0xff]  ;;  %v17_v54 = vld [vmem:[%s1748_s0 + $0x18] sm:$0xff] }
  0x15   :  { %1050 = vmatpush3.bf16.msra.mxu0 %v1047_v30  ;;  %v21_v55 = vld [vmem:[%s1748_s0 + $0x38] sm:$0xff]  ;;  %p1171_p4 = pnand %p1170_p3, %p1164_p0 }
  0x16   :  { %1082 = vmatpush3.bf16.msra.mxu1 %v1079_v31  ;;  %1052 = vmatprep.subr.bf16.mxu0 %v1051_v36 }
  0x17   :  { %1084 = vmatprep.subr.bf16.mxu1 %v1083_v37 }
  0x19   :  { %1054 = vmatpush3.bf16.msra.mxu0 %v1051_v36  ;;  %v497_v36 = vlaneseq }
  0x1a   :  { %1086 = vmatpush3.bf16.msra.mxu1 %v1083_v37  ;;  %1056 = vmatprep.subr.bf16.mxu0 %v1055_v42 }
  0x1b   :  { %1088 = vmatprep.subr.bf16.mxu1 %v1087_v43  ;;  %v1374_v37 = vshrl.u32 %v497_v36, 7  ;;  %v1376_v38 = vand.u32 127, %v497_v36 }
  0x1d   :  { %1058 = vmatpush3.bf16.msra.mxu0 %v1055_v42  ;;  %v1379_v39 = vadd.s32 64, %v1374_v37  ;;  %v1384_v40 = vadd.s32 80, %v1374_v37  ;;  %v1387_v41 = vadd.s32 88, %v1374_v37  ;;  %v1394_v42 = vadd.s32 96, %v1374_v37 }
  0x1e   :  { %1090 = vmatpush3.bf16.msra.mxu1 %v1087_v43  ;;  %1060 = vmatprep.subr.bf16.mxu0 %v1059_v48  ;;  %v1397_v43 = vadd.s32 104, %v1374_v37  ;;  %v1404_v44 = vadd.s32 112, %v1374_v37  ;;  %v1407_v45 = vadd.s32 120, %v1374_v37  ;;  %v1414_v46 = vadd.s32 8, %v1374_v37 }
  0x1f   :  { %1092 = vmatprep.subr.bf16.mxu1 %v1091_v49  ;;  %vm524_vm1 = vcmp.eq.s32.totalorder %v1379_v39, %v1376_v38  ;;  %vm526_vm2 = vcmp.eq.s32.totalorder %v1384_v40, %v1376_v38  ;;  %vm527_vm3 = vcmp.eq.s32.totalorder %v1387_v41, %v1376_v38  ;;  %vm528_vm4 = vcmp.eq.s32.totalorder %v1394_v42, %v1376_v38 }
  0x20   :  { %vm1754_vm5 = vcmp.eq.s32.totalorder %v1397_v43, %v1376_v38  ;;  %vm1753_vm6 = vcmp.eq.s32.totalorder %v1404_v44, %v1376_v38  ;;  %vm1752_vm7 = vcmp.eq.s32.totalorder %v1407_v45, %v1376_v38  ;;  %vm517_vm8 = vcmp.eq.s32.totalorder %v1414_v46, %v1376_v38 }
  0x21   :  { %1062 = vmatpush3.bf16.msra.mxu0 %v1059_v48  ;;  %vm516_vm9 = vcmp.eq.s32.totalorder %v1374_v37, %v1376_v38 }
  0x22   :  { %1094 = vmatpush3.bf16.msra.mxu1 %v1091_v49 }
  0x24   :  { %956 = vmatmul.mubr.f32.vlgmr.msra.gmra.mrb[0].mxu0 %v15_v50 }
  0x25   :  { %994 = vmatmul.mubr.f32.vlgmr.msra.gmra.mrb[0].mxu1 %v19_v51  ;;  %958 = vmatprep.mubr.f32.mxu0 %v16_v52 }
  0x26   :  { %996 = vmatprep.mubr.f32.mxu1 %v20_v53  ;;  %v1441_v53 = vadd.s32 24, %v1374_v37 }
  0x28   :  { %959 = vmatmul.mubr.f32.gmra.mrb[2].mxu0 %v17_v54  ;;  %vm519_vm10 = vcmp.eq.s32.totalorder %v1441_v53, %v1376_v38 }
  0x29   :  { %997 = vmatmul.mubr.f32.gmra.mrb[2].mxu1 %v21_v55  ;;  %v1444_v55 = vadd.s32 16, %v1374_v37 }
  0x2b   :  { %vm518_vm11 = vcmp.eq.s32.totalorder %v1444_v55, %v1376_v38 }
  0xf7   :  { %v1318_v56 = vpop.f32.mrb[0].mxu0 }
  0xf8   :  { %v1320_v57 = vpop.f32.mrb[0].mxu1  ;;  %v1322_v58 = vpop.f32.mrb[1].mxu0 }
  0xf9   :  { %v224_v59 = vadd.f32 %v1318_v56, %v1322_v58  ;;  %v1326_v60 = vpop.f32.mrb[1].mxu1  ;;  %v1330_v61 = vmul.f32 %v1320_v57, %v1318_v56 }
  0xfa   :  { %v1334_v62 = vmul.f32 %v1326_v60, %v1322_v58 }
  0xfb   :  { %v1336_v63 = vpop.f32.mrb[2].mxu0 }
  0xfc   :  { %v1338_v0 = vpop.f32.mrb[2].mxu1  ;;  %v1340_v1 = vpop.f32.mrb[3].mxu0 }
  0xfd   :  { %v225_v2 = vadd.f32 %v224_v59, %v1340_v1  ;;  %v1343_v3 = vpop.f32.mrb[3].mxu1  ;;  %v1347_v4 = vmul.f32 %v1338_v0, %v1336_v63 }
  0xfe   :  { %v1351_v5 = vmul.f32 %v1343_v3, %v1340_v1 }
  0xff   :  { %v226_v6 = vadd.f32 %v1336_v63, %v225_v2 }
 0x101   :  { %v227_v7 = vrot.slane %v226_v6, 4 }
 0x103   :  { %v228_v8 = vadd.f32 %v227_v7, %v226_v6 }
 0x105   :  { %v229_v9 = vrot.slane %v228_v8, 2 }
 0x107   :  { %v230_v10 = vadd.f32 %v229_v9, %v228_v8 }
 0x109   :  { %v231_v11 = vrot.slane %v230_v10, 1 }
 0x10b   :  { %v232_v12 = vadd.f32 %v231_v11, %v230_v10  ;;  %v1471_v10 = vadd.s32 40, %v1374_v37 }
 0x10d   :  { %v234_v13 = vmul.f32 0.03125, %v232_v12  ;;  %v1474_v12 = vadd.s32 32, %v1374_v37  ;;  %vm521_vm12 = vcmp.eq.s32.totalorder %v1471_v10, %v1376_v38 }
 0x10f   :  { %v237_v14 = vsub.f32 %v1340_v1, %v234_v13  ;;  %v235_v15 = vsub.f32 %v1322_v58, %v234_v13  ;;  %v236_v16 = vsub.f32 %v1318_v56, %v234_v13  ;;  %v238_v17 = vsub.f32 %v1336_v63, %v234_v13 }
 0x110   :  { %vm520_vm13 = vcmp.eq.s32.totalorder %v1474_v12, %v1376_v38 }
 0x111   :  { %239 = vxpose.xlu0.b32.start [1/4] (short) %v235_v15, 128  ;;  %v1095_v18 = vpack.c.bf16 %v236_v16, %v235_v15  ;;  %v1099_v19 = vpack.c.bf16 %v238_v17, %v237_v14 }
 0x113   :  { %1096 = vmatprep.subr.bf16.mxu0 %v1095_v18  ;;  %1103 = vmatprep.subr.bf16.mxu1 %v1095_v18 }
 0x114   :  { %1098 = vmatpush3.bf16.msra.mxu0 %v1095_v18  ;;  %1105 = vmatpush3.bf16.msra.mxu1 %v1095_v18 }
 0x115   :  { %240 = vxpose.xlu0.b32.cont [2/4] (short) %v236_v16, 128  ;;  %1100 = vmatprep.subr.bf16.mxu0 %v1099_v19 }
 0x116   :  { %1104 = vmatprep.subr.bf16.mxu1 %v1099_v19 }
 0x118   :  { %1102 = vmatpush3.bf16.msra.mxu0 %v1099_v19  ;;  %1106 = vmatpush3.bf16.msra.mxu1 %v1099_v19 }
 0x119   :  { %241 = vxpose.xlu0.b32.cont [3/4] (short) %v237_v14, 128 }
 0x11d   :  { %242 = vxpose.xlu0.b32.end [4/4] (short) %v238_v17, 128 }
 0x191   :  { %v255_v20 = vpop.trf.xlu0 }
 0x192   :  { %1007 = vmatprep.mubr.msk.f32.mxu0 %vm271_vm0, %v255_v20 }
 0x195   :  { %v256_v21 = vpop.trf.xlu0 }
 0x196   :  { %1008 = vmatmul.mubr.msk.f32.vlgmr.msra.gmra.mrb[4].mxu0 %vm271_vm0, %v256_v21  ;;  %v1501_v21 = vadd.s32 56, %v1374_v37 }
 0x198   :  { %vm523_vm14 = vcmp.eq.s32.totalorder %v1501_v21, %v1376_v38 }
 0x199   :  { %v257_v22 = vpop.trf.xlu0 }
 0x19a   :  { %1010 = vmatprep.mubr.msk.f32.mxu0 %vm271_vm0, %v257_v22  ;;  %v1504_v22 = vadd.s32 48, %v1374_v37 }
 0x19c   :  { %vm522_vm15 = vcmp.eq.s32.totalorder %v1504_v22, %v1376_v38 }
 0x19d   :  { %v258_v23 = vpop.trf.xlu0 }
 0x19e   :  { %1011 = vmatmul.mubr.msk.f32.gmra.mrb[6].mxu0 %vm271_vm0, %v258_v23  ;;  %v743_v23 = vmul.f32 %v1322_v58, %v1322_v58 }
 0x1a1   :  { %v259_v24 = vpop.trf.xlu0 }
 0x1a2   :  { %1013 = vmatprep.mubr.msk.f32.mxu0 %vm271_vm0, %v259_v24 }
 0x1a5   :  { %v260_v25 = vpop.trf.xlu0 }
 0x1a6   :  { %1014 = vmatmul.mubr.msk.f32.gmra.mrb[8].mxu0 %vm271_vm0, %v260_v25 }
 0x1a9   :  { %v261_v26 = vpop.trf.xlu0 }
 0x1aa   :  { %1016 = vmatprep.mubr.msk.f32.mxu0 %vm271_vm0, %v261_v26 }
 0x1ad   :  { %v262_v27 = vpop.trf.xlu0 }
 0x1ae   :  { %1017 = vmatmul.mubr.msk.f32.gmra.mrb[10].mxu0 %vm271_vm0, %v262_v27 }
 0x1b1   :  { %v263_v28 = vpop.trf.xlu0 }
 0x1b2   :  { %1019 = vmatprep.mubr.msk.f32.mxu1 %vm271_vm0, %v263_v28 }
 0x1b5   :  { %v264_v29 = vpop.trf.xlu0 }
 0x1b6   :  { %1020 = vmatmul.mubr.msk.f32.vlgmr.msra.gmra.mrb[4].mxu1 %vm271_vm0, %v264_v29  ;;  %v744_v29 = vmul.f32 %v1318_v56, %v1318_v56 }
 0x1b9   :  { %v265_v30 = vpop.trf.xlu0 }
 0x1ba   :  { %1022 = vmatprep.mubr.msk.f32.mxu1 %vm271_vm0, %v265_v30 }
 0x1bd   :  { %v266_v31 = vpop.trf.xlu0 }
 0x1be   :  { %1023 = vmatmul.mubr.msk.f32.gmra.mrb[6].mxu1 %vm271_vm0, %v266_v31  ;;  %v1535_v31 = vadd.s32 72, %v1374_v37 }
 0x1c1   :  { %v267_v32 = vpop.trf.xlu0 }
 0x1c2   :  { %1025 = vmatprep.mubr.msk.f32.mxu1 %vm271_vm0, %v267_v32  ;;  %v745_v32 = vmul.f32 %v1340_v1, %v1340_v1 }
 0x1c5   :  { %v268_v33 = vpop.trf.xlu0 }
 0x1c6   :  { %1026 = vmatmul.mubr.msk.f32.gmra.mrb[8].mxu1 %vm271_vm0, %v268_v33 }
 0x1c9   :  { %v269_v34 = vpop.trf.xlu0 }
 0x1ca   :  { %1028 = vmatprep.mubr.msk.f32.mxu1 %vm271_vm0, %v269_v34 }
 0x1cd   :  { %v270_v35 = vpop.trf.xlu0 }
 0x1ce   :  { %1029 = vmatmul.mubr.msk.f32.gmra.mrb[10].mxu1 %vm271_vm0, %v270_v35  ;;  %v755_v35 = vmul.f32 %v1326_v60, %v1326_v60  ;;  %vm525_vm0 = vcmp.eq.s32.totalorder %v1535_v31, %v1376_v38 }
 0x269   :  { %v1009_v47 = vpop.f32.mrb[4].mxu0 }
 0x26a   :  { %v1418_v48 = vmul.f32 0.032258064, %v1009_v47  ;;  %v386_v49 = vpop.f32.mrb[5].mxu0 }
 0x26b   :  { %v1422_v50 = vmul.f32 0.032258064, %v386_v49 }
 0x26c   :  { %482 = vst [vmem:[%s1750_s2 + $0x8] sm:$0xff] %v1418_v48  ;;  %v533_v51 = vsel %vm517_vm8, %v1418_v48, 0.0 }
 0x26d   :  { %481 = vst [vmem:[%s1750_s2] sm:$0xff] %v1422_v50  ;;  %550 = vadd.xlane.f32.xlu1 %v533_v51  ;;  %v532_v52 = vsel %vm516_vm9, %v1422_v50, 0.0 }
 0x26e   :  { %v580_v54 = vadd.f32 %v533_v51, %v532_v52 }
 0x271   :  { %548 = vadd.xlane.f32.xlu1 %v532_v52  ;;  %v1012_v59 = vpop.f32.mrb[6].mxu0  ;;  %v756_v52 = vmul.f32 %v1320_v57, %v1320_v57  ;;  %v757_v57 = vmul.f32 %v1343_v3, %v1343_v3  ;;  %v758_v3 = vmul.f32 %v1338_v0, %v1338_v0 }
 0x272   :  { %v1448_v2 = vmul.f32 0.032258064, %v1012_v59  ;;  %v396_v6 = vpop.f32.mrb[7].mxu0 }
 0x273   :  { %v1452_v7 = vmul.f32 0.032258064, %v396_v6 }
 0x274   :  { %484 = vst [vmem:[%s1750_s2 + $0x18] sm:$0xff] %v1448_v2  ;;  %v535_v8 = vsel %vm519_vm10, %v1448_v2, 0.0 }
 0x275   :  { %483 = vst [vmem:[%s1750_s2 + $0x10] sm:$0xff] %v1452_v7  ;;  %554 = vadd.xlane.f32.xlu1 %v535_v8  ;;  %v534_v9 = vsel %vm518_vm11, %v1452_v7, 0.0 }
 0x276   :  { %v581_v11 = vadd.f32 %v580_v54, %v534_v9 }
 0x278   :  { %v582_v13 = vadd.f32 %v581_v11, %v535_v8  ;;  %v746_v11 = vmul.f32 %v1336_v63, %v1336_v63 }
 0x279   :  { %552 = vadd.xlane.f32.xlu1 %v534_v9  ;;  %v1015_v14 = vpop.f32.mrb[8].mxu0 }
 0x27a   :  { %v1478_v15 = vmul.f32 0.032258064, %v1015_v14  ;;  %v406_v16 = vpop.f32.mrb[9].mxu0 }
 0x27b   :  { %v1482_v17 = vmul.f32 0.032258064, %v406_v16 }
 0x27c   :  { %486 = vst [vmem:[%s1750_s2 + $0x28] sm:$0xff] %v1478_v15  ;;  %v537_v18 = vsel %vm521_vm12, %v1478_v15, 0.0 }
 0x27d   :  { %485 = vst [vmem:[%s1750_s2 + $0x20] sm:$0xff] %v1482_v17  ;;  %558 = vadd.xlane.f32.xlu1 %v537_v18  ;;  %v536_v19 = vsel %vm520_vm13, %v1482_v17, 0.0 }
 0x27e   :  { %556 = vadd.xlane.f32.xlu0 %v536_v19  ;;  %v583_v20 = vadd.f32 %v582_v13, %v536_v19 }
 0x280   :  { %v584_v24 = vadd.f32 %v583_v20, %v537_v18 }
 0x281   :  { %747 = vadd.xlane.f32.xlu1 %v743_v23  ;;  %v1018_v25 = vpop.f32.mrb[10].mxu0 }
 0x282   :  { %v1508_v26 = vmul.f32 0.032258064, %v1018_v25  ;;  %v416_v27 = vpop.f32.mrb[11].mxu0 }
 0x283   :  { %v1514_v28 = vmul.f32 0.032258064, %v416_v27 }
 0x284   :  { %488 = vst [vmem:[%s1750_s2 + $0x38] sm:$0xff] %v1508_v26  ;;  %v539_v58 = vsel %vm523_vm14, %v1508_v26, 0.0 }
 0x285   :  { %487 = vst [vmem:[%s1750_s2 + $0x30] sm:$0xff] %v1514_v28  ;;  %749 = vadd.xlane.f32.xlu1 %v744_v29  ;;  %v538_v56 = vsel %vm522_vm15, %v1514_v28, 0.0 }
 0x286   :  { %v585_v30 = vadd.f32 %v584_v24, %v538_v56 }
 0x288   :  { %v586_v33 = vadd.f32 %v585_v30, %v539_v58 }
 0x289   :  { %v1021_v34 = vpop.f32.mrb[4].mxu1  ;;  %751 = vadd.xlane.f32.xlu1 %v745_v32 }
 0x28a   :  { %v1541_v36 = vmul.f32 0.032258064, %v1021_v34  ;;  %v426_v47 = vpop.f32.mrb[5].mxu1 }
 0x28b   :  { %v1545_v49 = vmul.f32 0.032258064, %v426_v47 }
 0x28c   :  { %490 = vst [vmem:[%s1750_s2 + $0x48] sm:$0xff] %v1541_v36  ;;  %v541_v60 = vsel %vm525_vm0, %v1541_v36, 0.0 }
 0x28d   :  { %489 = vst [vmem:[%s1750_s2 + $0x40] sm:$0xff] %v1545_v49  ;;  %759 = vadd.xlane.f32.xlu1 %v755_v35  ;;  %v540_v1 = vsel %vm524_vm1, %v1545_v49, 0.0 }
 0x28e   :  { %v587_v51 = vadd.f32 %v586_v33, %v540_v1 }
 0x290   :  { %v588_v54 = vadd.f32 %v587_v51, %v541_v60 }
 0x291   :  { %v1024_v59 = vpop.f32.mrb[6].mxu1  ;;  %761 = vadd.xlane.f32.xlu1 %v756_v52 }
 0x292   :  { %v1565_v6 = vmul.f32 0.032258064, %v1024_v59  ;;  %v436_v8 = vpop.f32.mrb[7].mxu1 }
 0x293   :  { %v1567_v9 = vmul.f32 0.032258064, %v436_v8 }
 0x294   :  { %492 = vst [vmem:[%s1750_s2 + $0x58] sm:$0xff] %v1565_v6  ;;  %v543_v13 = vsel %vm527_vm3, %v1565_v6, 0.0 }
 0x295   :  { %491 = vst [vmem:[%s1750_s2 + $0x50] sm:$0xff] %v1567_v9  ;;  %753 = vadd.xlane.f32.xlu1 %v746_v11  ;;  %v542_v63 = vsel %vm526_vm2, %v1567_v9, 0.0 }
 0x296   :  { %v589_v14 = vadd.f32 %v588_v54, %v542_v63 }
 0x298   :  { %v590_v16 = vadd.f32 %v589_v14, %v543_v13 }
 0x299   :  { %v1027_v18 = vpop.f32.mrb[8].mxu1  ;;  %763 = vadd.xlane.f32.xlu1 %v757_v57 }
 0x29a   :  { %v1589_v19 = vmul.f32 0.032258064, %v1027_v18  ;;  %v446_v20 = vpop.f32.mrb[9].mxu1 }
 0x29b   :  { %v1591_v23 = vmul.f32 0.032258064, %v446_v20 }
 0x29c   :  { %494 = vst [vmem:[%s1750_s2 + $0x68] sm:$0xff] %v1589_v19  ;;  %v545_v24 = vsel %vm1754_vm5, %v1589_v19, 0.0 }
 0x29d   :  { %493 = vst [vmem:[%s1750_s2 + $0x60] sm:$0xff] %v1591_v23  ;;  %765 = vadd.xlane.f32.xlu1 %v758_v3  ;;  %v544_v0 = vsel %vm528_vm4, %v1591_v23, 0.0 }
 0x29e   :  { %v591_v25 = vadd.f32 %v590_v16, %v544_v0 }
 0x2a0   :  { %v592_v27 = vadd.f32 %v591_v25, %v545_v24 }
 0x2a1   :  { %v1030_v29 = vpop.f32.mrb[10].mxu1  ;;  %562 = vadd.xlane.f32.xlu1 %v539_v58 }
 0x2a2   :  { %v1611_v30 = vmul.f32 0.032258064, %v1030_v29  ;;  %v456_v32 = vpop.f32.mrb[11].mxu1 }
 0x2a3   :  { %v1613_v33 = vmul.f32 0.032258064, %v456_v32 }
 0x2a4   :  { %496 = vst [vmem:[%s1750_s2 + $0x78] sm:$0xff] %v1611_v30  ;;  %v547_v58 = vsel %vm1752_vm7, %v1611_v30, 0.0 }
 0x2a5   :  { %495 = vst [vmem:[%s1750_s2 + $0x70] sm:$0xff] %v1613_v33  ;;  %560 = vadd.xlane.f32.xlu1 %v538_v56  ;;  %v546_v34 = vsel %vm1753_vm6, %v1613_v33, 0.0 }
 0x2a6   :  { %v593_v35 = vadd.f32 %v592_v27, %v546_v34 }
 0x2a8   :  { %v594_v47 = vadd.f32 %v593_v35, %v547_v58 }
 0x2a9   :  { %566 = vadd.xlane.f32.xlu1 %v541_v60 }
 0x2aa   :  { %v595_v56 = vrot.slane %v594_v47, 4 }
 0x2ac   :  { %v596_v51 = vadd.f32 %v595_v56, %v594_v47 }
 0x2ad   :  { %564 = vadd.xlane.f32.xlu1 %v540_v1 }
 0x2ae   :  { %v597_v52 = vrot.slane %v596_v51, 2 }
 0x2b0   :  { %v598_v54 = vadd.f32 %v597_v52, %v596_v51 }
 0x2b1   :  { %570 = vadd.xlane.f32.xlu1 %v543_v13 }
 0x2b2   :  { %v599_v60 = vrot.slane %v598_v54, 1 }
 0x2b4   :  { %v600_v1 = vadd.f32 %v599_v60, %v598_v54 }
 0x2b5   :  { %568 = vadd.xlane.f32.xlu1 %v542_v63 }
 0x2b6   :  { %1113 = vrsqrt.f32 %v600_v1  ;;  %vm649_vm6 = vcmp.gt.f32.partialorder %v600_v1, 0.0 }
 0x2b9   :  { %574 = vadd.xlane.f32.xlu1 %v545_v24 }
 0x2bd   :  { %572 = vadd.xlane.f32.xlu1 %v544_v0 }
 0x2c1   :  { %578 = vadd.xlane.f32.xlu1 %v547_v58 }
 0x2c5   :  { %576 = vadd.xlane.f32.xlu1 %v546_v34 }
 0x2c9   :  { %771 = vadd.xlane.f32.xlu1 %v1334_v62  ;;  %v1114_v62 = vpop.eup %1113 }
 0x2ca   :  { %v1636_v13 = vsel %vm649_vm6, %v1114_v62, 0.0 }
 0x2cd   :  { %773 = vadd.xlane.f32.xlu1 %v1330_v61 }
 0x2d1   :  { %775 = vadd.xlane.f32.xlu1 %v1351_v5 }
 0x2d5   :  { %777 = vadd.xlane.f32.xlu1 %v1347_v4 }
 0x2fa   :  { %v551_v59 = vpop.xlane.xlu1 %550 }
 0x2fb   :  { %1115 = vrsqrt.f32 %v551_v59  ;;  %vm602_vm7 = vcmp.gt.f32.partialorder %v551_v59, 0.0 }
 0x2fe   :  { %v549_v8 = vpop.xlane.xlu1 %548 }
 0x2ff   :  { %1117 = vrsqrt.f32 %v549_v8  ;;  %vm601_vm5 = vcmp.gt.f32.partialorder %v549_v8, 0.0 }
 0x302   :  { %v555_v11 = vpop.xlane.xlu1 %554 }
 0x303   :  { %1119 = vrsqrt.f32 %v555_v11 }
 0x305   :  { %v1116_v57 = vpop.eup %1115 }
 0x306   :  { %v634_v61 = vsel %vm602_vm7, %v1116_v57, 0.0  ;;  %v553_v5 = vpop.xlane.xlu1 %552  ;;  %vm604_vm7 = vcmp.gt.f32.partialorder %v555_v11, 0.0 }
 0x307   :  { %v653_v4 = vmul.f32 %v634_v61, %v1418_v48  ;;  %1121 = vrsqrt.f32 %v553_v5 }
 0x309   :  { %v1118_v63 = vpop.eup %1117  ;;  %v669_v14 = vmul.f32 %v653_v4, %v1636_v13 }
 0x30a   :  { %v633_v16 = vsel %vm601_vm5, %v1118_v63, 0.0  ;;  %v559_v18 = vpop.xlane.xlu1 %558  ;;  %vm603_vm5 = vcmp.gt.f32.partialorder %v553_v5, 0.0 }
 0x30b   :  { %v652_v20 = vmul.f32 %v633_v16, %v1422_v50  ;;  %1123 = vrsqrt.f32 %v559_v18  ;;  %v557_v3 = vpop.xlane.xlu0 %556  ;;  %v685_v0 = vand.u32 2147483647, %v669_v14  ;;  %vm606_vm6 = vcmp.gt.f32.partialorder %v559_v18, 0.0 }
 0x30c   :  { %1125 = vrsqrt.f32 %v557_v3 }
 0x30d   :  { %v1120_v24 = vpop.eup %1119  ;;  %v668_v25 = vmul.f32 %v652_v20, %v1636_v13  ;;  %v701_v34 = vsel %vm517_vm8, 0.0, %v685_v0  ;;  %vm605_vm8 = vcmp.gt.f32.partialorder %v557_v3, 0.0 }
 0x30e   :  { %v636_v48 = vsel %vm604_vm7, %v1120_v24, 0.0  ;;  %v1641_v27 = vpop.xlane.xlu1 %747  ;;  %vm1755_vm7 = vcmp.eq.s32.totalorder %v1397_v43, %v1376_v38 }
 0x30f   :  { %v684_v29 = vand.u32 2147483647, %v668_v25  ;;  %v655_v32 = vmul.f32 %v636_v48, %v1448_v2  ;;  %v779_v22 = vmax.f32 %v1641_v27, 1e-16 }
 0x311   :  { %v1122_v58 = vpop.eup %1121  ;;  %v700_v50 = vsel %vm516_vm9, 0.0, %v684_v29  ;;  %v671_v35 = vmul.f32 %v655_v32, %v1636_v13 }
 0x312   :  { %v716_v47 = vadd.f32 %v701_v34, %v700_v50  ;;  %v635_v56 = vsel %vm603_vm5, %v1122_v58, 0.0  ;;  %v1651_v51 = vpop.xlane.xlu1 %749  ;;  %vm1757_vm5 = vcmp.eq.s32.totalorder %v1407_v45, %v1376_v38 }
 0x313   :  { %v654_v52 = vmul.f32 %v635_v56, %v1452_v7  ;;  %v687_v37 = vand.u32 2147483647, %v671_v35  ;;  %v780_v21 = vmax.f32 %v1651_v51, 1e-16 }
 0x315   :  { %v1124_v54 = vpop.eup %1123  ;;  %v670_v2 = vmul.f32 %v654_v52, %v1636_v13  ;;  %v703_v63 = vsel %vm519_vm10, 0.0, %v687_v37 }
 0x316   :  { %v1126_v60 = vpop.eup %1125  ;;  %v638_v46 = vsel %vm606_vm6, %v1124_v54, 0.0  ;;  %v1655_v1 = vpop.xlane.xlu1 %751 }
 0x317   :  { %v686_v59 = vand.u32 2147483647, %v670_v2  ;;  %v657_v8 = vmul.f32 %v638_v46, %v1478_v15  ;;  %v637_v11 = vsel %vm605_vm8, %v1126_v60, 0.0  ;;  %v781_v39 = vmax.f32 %v1655_v1, 1e-16 }
 0x318   :  { %v656_v62 = vmul.f32 %v637_v11, %v1482_v17 }
 0x319   :  { %v702_v7 = vsel %vm518_vm11, 0.0, %v686_v59  ;;  %v673_v57 = vmul.f32 %v657_v8, %v1636_v13 }
 0x31a   :  { %v717_v61 = vadd.f32 %v716_v47, %v702_v7  ;;  %v672_v5 = vmul.f32 %v656_v62, %v1636_v13  ;;  %v1664_v4 = vpop.xlane.xlu1 %759 }
 0x31b   :  { %v689_v14 = vand.u32 2147483647, %v673_v57 }
 0x31c   :  { %v688_v15 = vand.u32 2147483647, %v672_v5  ;;  %v718_v16 = vadd.f32 %v717_v61, %v703_v63 }
 0x31d   :  { %v705_v20 = vsel %vm521_vm12, 0.0, %v689_v14 }
 0x31e   :  { %v704_v17 = vsel %vm520_vm13, 0.0, %v688_v15  ;;  %v1672_v55 = vpop.xlane.xlu1 %761 }
 0x31f   :  { %v719_v18 = vadd.f32 %v718_v16, %v704_v17  ;;  %v792_v27 = vmax.f32 %v1672_v55, 1e-16 }
 0x321   :  { %v720_v3 = vadd.f32 %v719_v18, %v705_v20 }
 0x322   :  { %v1677_v24 = vpop.xlane.xlu1 %753 }
 0x326   :  { %v1679_v0 = vpop.xlane.xlu1 %763 }
 0x32a   :  { %v1681_v53 = vpop.xlane.xlu1 %765 }
 0x32e   :  { %v563_v25 = vpop.xlane.xlu1 %562 }
 0x32f   :  { %1127 = vrsqrt.f32 %v563_v25  ;;  %vm608_vm9 = vcmp.gt.f32.partialorder %v563_v25, 0.0 }
 0x332   :  { %v561_v48 = vpop.xlane.xlu1 %560 }
 0x333   :  { %1129 = vrsqrt.f32 %v561_v48  ;;  %vm607_vm10 = vcmp.gt.f32.partialorder %v561_v48, 0.0 }
 0x336   :  { %v567_v12 = vpop.xlane.xlu1 %566 }
 0x337   :  { %1131 = vrsqrt.f32 %v567_v12  ;;  %vm610_vm11 = vcmp.gt.f32.partialorder %v567_v12, 0.0 }
 0x339   :  { %v1128_v29 = vpop.eup %1127 }
 0x33a   :  { %v640_v32 = vsel %vm608_vm9, %v1128_v29, 0.0  ;;  %v565_v58 = vpop.xlane.xlu1 %564 }
 0x33b   :  { %v659_v10 = vmul.f32 %v640_v32, %v1508_v26  ;;  %1133 = vrsqrt.f32 %v565_v58  ;;  %vm609_vm12 = vcmp.gt.f32.partialorder %v565_v58, 0.0  ;;  %v793_v58 = vmax.f32 %v1679_v0, 1e-16 }
 0x33d   :  { %v1130_v34 = vpop.eup %1129  ;;  %v675_v47 = vmul.f32 %v659_v10, %v1636_v13 }
 0x33e   :  { %v639_v50 = vsel %vm607_vm10, %v1130_v34, 0.0  ;;  %v571_v35 = vpop.xlane.xlu1 %570 }
 0x33f   :  { %v658_v56 = vmul.f32 %v639_v50, %v1514_v28  ;;  %1135 = vrsqrt.f32 %v571_v35  ;;  %v691_v46 = vand.u32 2147483647, %v675_v47  ;;  %vm612_vm13 = vcmp.gt.f32.partialorder %v571_v35, 0.0 }
 0x341   :  { %v1132_v52 = vpop.eup %1131  ;;  %v674_v54 = vmul.f32 %v658_v56, %v1636_v13  ;;  %v707_v7 = vsel %vm523_vm14, 0.0, %v691_v46  ;;  %v794_v56 = vmax.f32 %v1681_v53, 1e-16 }
 0x342   :  { %v642_v2 = vsel %vm610_vm11, %v1132_v52, 0.0  ;;  %v569_v60 = vpop.xlane.xlu1 %568 }
 0x343   :  { %v690_v37 = vand.u32 2147483647, %v674_v54  ;;  %v661_v26 = vmul.f32 %v642_v2, %v1541_v36  ;;  %1137 = vrsqrt.f32 %v569_v60  ;;  %vm611_vm14 = vcmp.gt.f32.partialorder %v569_v60, 0.0 }
 0x345   :  { %v1134_v59 = vpop.eup %1133  ;;  %v706_v8 = vsel %vm522_vm15, 0.0, %v690_v37  ;;  %v677_v57 = vmul.f32 %v661_v26, %v1636_v13 }
 0x346   :  { %v721_v11 = vadd.f32 %v720_v3, %v706_v8  ;;  %v641_v28 = vsel %vm609_vm12, %v1134_v59, 0.0  ;;  %v575_v62 = vpop.xlane.xlu1 %574 }
 0x347   :  { %v660_v61 = vmul.f32 %v641_v28, %v1545_v49  ;;  %1139 = vrsqrt.f32 %v575_v62  ;;  %v693_v16 = vand.u32 2147483647, %v677_v57  ;;  %v791_v49 = vmax.f32 %v1664_v4, 1e-16 }
 0x348   :  { %v722_v36 = vadd.f32 %v721_v11, %v707_v7 }
 0x349   :  { %v1136_v5 = vpop.eup %1135  ;;  %v676_v63 = vmul.f32 %v660_v61, %v1636_v13 }
 0x34a   :  { %v644_v14 = vsel %vm612_vm13, %v1136_v5, 0.0  ;;  %v573_v15 = vpop.xlane.xlu1 %572 }
 0x34b   :  { %v692_v17 = vand.u32 2147483647, %v676_v63  ;;  %v663_v18 = vmul.f32 %v644_v14, %v1565_v6  ;;  %1141 = vrsqrt.f32 %v573_v15  ;;  %v709_v6 = vsel %vm525_vm0, 0.0, %v693_v16 }
 0x34c   :  { %1143 = vrsqrt.f32 %v779_v22  ;;  %vm613_vm15 = vcmp.gt.f32.partialorder %v573_v15, 0.0  ;;  %vm805_vm0 = vcmask 7168  }
 0x34d   :  { %v1138_v20 = vpop.eup %1137  ;;  %v708_v3 = vsel %vm524_vm1, 0.0, %v692_v17  ;;  %v679_v51 = vmul.f32 %v663_v18, %v1636_v13  ;;  %vm614_vm1 = vcmp.gt.f32.partialorder %v575_v62, 0.0 }
 0x34e   :  { %v723_v25 = vadd.f32 %v722_v36, %v708_v3  ;;  %v643_v48 = vsel %vm611_vm14, %v1138_v20, 0.0  ;;  %v579_v12 = vpop.xlane.xlu1 %578 }
 0x34f   :  { %v662_v29 = vmul.f32 %v643_v48, %v1567_v9  ;;  %1145 = vrsqrt.f32 %v579_v12  ;;  %v695_v34 = vand.u32 2147483647, %v679_v51  ;;  %v782_v9 = vmax.f32 %v1677_v24, 1e-16 }
 0x350   :  { %1147 = vrsqrt.f32 %v780_v21  ;;  %v724_v4 = vadd.f32 %v723_v25, %v709_v6 }
 0x351   :  { %v1140_v32 = vpop.eup %1139  ;;  %1149 = vrsqrt.f32 %v791_v49  ;;  %v678_v55 = vmul.f32 %v662_v29, %v1636_v13 }
 0x352   :  { %1151 = vrsqrt.f32 %v792_v27  ;;  %v646_v10 = vsel %vm614_vm1, %v1140_v32, 0.0  ;;  %v577_v31 = vpop.xlane.xlu1 %576 }
 0x353   :  { %v694_v50 = vand.u32 2147483647, %v678_v55  ;;  %v665_v35 = vmul.f32 %v646_v10, %v1589_v19  ;;  %1153 = vrsqrt.f32 %v577_v31  ;;  %v711_v19 = vsel %vm527_vm3, 0.0, %v695_v34 }
 0x354   :  { %1155 = vrsqrt.f32 %v781_v39  ;;  %vm615_vm3 = vcmp.gt.f32.partialorder %v577_v31, 0.0 }
 0x355   :  { %v1142_v1 = vpop.eup %1141  ;;  %v710_v47 = vsel %vm526_vm2, 0.0, %v694_v50  ;;  %1157 = vrsqrt.f32 %v793_v58  ;;  %v681_v2 = vmul.f32 %v665_v35, %v1636_v13  ;;  %vm616_vm2 = vcmp.gt.f32.partialorder %v579_v12, 0.0 }
 0x356   :  { %v725_v0 = vadd.f32 %v724_v4, %v710_v47  ;;  %v645_v52 = vsel %vm613_vm15, %v1142_v1, 0.0  ;;  %v772_v54 = vpop.xlane.xlu1 %771  ;;  %v1144_v60 = vpop.eup %1143  ;;  %1159 = vrsqrt.f32 %v782_v9 }
 0x357   :  { %v664_v24 = vmul.f32 %v645_v52, %v1591_v23  ;;  %1161 = vrsqrt.f32 %v794_v56  ;;  %v787_v59 = vmul.f32 %v1144_v60, %v772_v54  ;;  %v697_v28 = vand.u32 2147483647, %v681_v2 }
 0x358   :  { %v726_v46 = vadd.f32 %v725_v0, %v711_v19 }
 0x359   :  { %v1146_v40 = vpop.eup %1145  ;;  %v680_v37 = vmul.f32 %v664_v24, %v1636_v13  ;;  %v713_v18 = vsel %vm1755_vm7, 0.0, %v697_v28 }
 0x35a   :  { %v1148_v26 = vpop.eup %1147  ;;  %v648_v53 = vsel %vm616_vm2, %v1146_v40, 0.0  ;;  %v774_v8 = vpop.xlane.xlu1 %773 }
 0x35b   :  { %v1150_v11 = vpop.eup %1149  ;;  %v696_v41 = vand.u32 2147483647, %v680_v37  ;;  %v667_v62 = vmul.f32 %v648_v53, %v1611_v30  ;;  %v788_v7 = vmul.f32 %v1148_v26, %v774_v8 }
 0x35c   :  { %v1152_v57 = vpop.eup %1151  ;;  %v799_v22 = vmul.f32 %v1150_v11, %v787_v59 }
 0x35d   :  { %v1154_v23 = vpop.eup %1153  ;;  %v712_v61 = vsel %vm528_vm4, 0.0, %v696_v41  ;;  %v800_v36 = vmul.f32 %v1152_v57, %v788_v7  ;;  %v683_v30 = vmul.f32 %v667_v62, %v1636_v13  ;;  %vm1756_vm4 = vcmp.eq.s32.totalorder %v1404_v44, %v1376_v38 }
 0x35e   :  { %v1156_v5 = vpop.eup %1155  ;;  %v647_v63 = vsel %vm615_vm3, %v1154_v23, 0.0  ;;  %v776_v14 = vpop.xlane.xlu1 %775  ;;  %v727_v15 = vadd.f32 %v726_v46, %v712_v61  ;;  %v806_v25 = vsel %vm805_vm0, %v799_v22, 0.0 }
 0x35f   :  { %v666_v16 = vmul.f32 %v647_v63, %v1613_v33  ;;  %v789_v17 = vmul.f32 %v1156_v5, %v776_v14  ;;  %v1158_v21 = vpop.eup %1157  ;;  %v807_v49 = vsel %vm805_vm0, %v800_v36, 0.0  ;;  %v699_v51 = vand.u32 2147483647, %v683_v30 }
 0x360   :  { %v728_v42 = vadd.f32 %v727_v15, %v713_v18  ;;  %v1160_v27 = vpop.eup %1159  ;;  %v808_v39 = vadd.f32 %v807_v49, %v806_v25 }
 0x361   :  { %v682_v20 = vmul.f32 %v666_v16, %v1636_v13  ;;  %v801_v3 = vmul.f32 %v1158_v21, %v789_v17  ;;  %v1162_v29 = vpop.eup %1161  ;;  %v715_v58 = vsel %vm1757_vm5, 0.0, %v699_v51 }
 0x362   :  { %v778_v48 = vpop.xlane.xlu1 %777 }
 0x363   :  { %v698_v12 = vand.u32 2147483647, %v682_v20  ;;  %v790_v33 = vmul.f32 %v1160_v27, %v778_v48  ;;  %v809_v6 = vsel %vm805_vm0, %v801_v3, 0.0 }
 0x364   :  { %v810_v13 = vadd.f32 %v809_v6, %v808_v39 }
 0x365   :  { %v802_v43 = vmul.f32 %v1162_v29, %v790_v33  ;;  %v714_v4 = vsel %vm1756_vm4, 0.0, %v698_v12 }
 0x366   :  { %v729_v32 = vadd.f32 %v728_v42, %v714_v4 }
 0x367   :  { %v811_v55 = vsel %vm805_vm0, %v802_v43, 0.0 }
 0x368   :  { %v812_v10 = vadd.f32 %v811_v55, %v810_v13  ;;  %v730_v31 = vadd.f32 %v729_v32, %v715_v58 }
 0x36a   :  { %813 = vadd.xlane.f32.xlu0 %v812_v10  ;;  %731 = vadd.xlane.f32.xlu1 %v730_v31 }
 0x3f7   :  { %v814_v34 = vpop.xlane.xlu0 %813  ;;  %v732_v50 = vpop.xlane.xlu1 %731 }
 0x3f8   :  { %v815_v35 = vrot.slane %v814_v34, 4  ;;  %v733_v9 = vrot.slane %v732_v50, 4 }
 0x3fa   :  { %v816_v1 = vadd.f32 %v815_v35, %v814_v34  ;;  %v734_v47 = vadd.f32 %v733_v9, %v732_v50 }
 0x3fc   :  { %v817_v44 = vrot.slane %v816_v1, 2  ;;  %v735_v56 = vrot.slane %v734_v47, 2 }
 0x3fe   :  { %v818_v0 = vadd.f32 %v817_v44, %v816_v1  ;;  %v736_v52 = vadd.f32 %v735_v56, %v734_v47 }
 0x400   :  { %v737_v54 = vrot.slane %v736_v52, 1  ;;  %v819_v19 = vrot.slane %v818_v0, 1 }
 0x402   :  { %v738_v2 = vadd.f32 %v737_v54, %v736_v52  ;;  %v820_v24 = vadd.f32 %v819_v19, %v818_v0 }
 0x404   :  { %1107 = vpush %v738_v2 }
 0x405   :  { %1109 = vpush %v820_v24 }
 0x435   :  { %s1108_s2 = spop %1107 }
 0x436   :  { %s742_s15 = smul.f32 0.00390625, %s1108_s2  ;;  %s1110_s16 = spop %1109 }
 0x437   :  { %s822_s17 = ssub.f32 0.0, %s1110_s16 }
 0x438   :  { %804 = sst [smem:[#allocation2]] %s742_s15 }
 0x439   :  { %s825_s18 = smul.f32 0.03125, %s822_s17 }
 0x43b   :  { %827 = sst [smem:[#allocation2 + $0x1]] %s825_s18 }
 0x43c   :  { %1174 = shalt.err (!%p1171_p4)
}
 0x43d   :  { %s1177_s20 = smov [#allocation2]  }
 0x43e   :  { %839 = dma.smem_to_vmem %s1177_s20, 16, %s837_s14, [#allocation3]  }
 0x43f   :  { %1175 = dma.done.wait [#allocation3], 16  }
 0x440   :  { %1176 = vsyncadd [#allocation3], 4294967280 }
 0x441   :  { %845 = sfence }
 0x442   :  { %846 = vsyncpa [#allocation3], 1 }

// kernel: wmse_forward.2
= control target key start
LH: loop header
LB: loop body
LE: loop exit
PB: predicated region body
PF: predicated region fallthrough
CT: control target
= control target key end

     0   :  { %s2715_s30 = smov 0   ;;  %s3372_s0 = inlined_call_operand.vmem [shape: bf16[64,1024], index: 0, kind: input, shape index: {}]   ;;  %s3373_s1 = inlined_call_operand.vmem [shape: bf16[1024,128], index: 1, kind: input, shape index: {}]   ;;  %s3374_s2 = inlined_call_operand.vmem [shape: f32[1,128], index: 2, kind: input, shape index: {}]   ;;  %s3375_s3 = inlined_call_operand.vmem [shape: f32[128,128], index: 3, kind: input, shape index: {}]   ;;  %s3376_s4 = inlined_call_operand.vmem [shape: f32[1,128], index: 4, kind: input, shape index: {}]   ;;  %s3377_s5 = inlined_call_operand.vmem [shape: f32[128,128], index: 5, kind: input, shape index: {}]   ;;  %s3378_s6 = inlined_call_operand.vmem [shape: f32[1,128], index: 6, kind: input, shape index: {}]   ;;  %s3379_s7 = inlined_call_operand.vmem [shape: f32[64,128], index: 7, kind: output, shape index: {0}]   ;;  %s3380_s8 = inlined_call_operand.vmem [shape: f32[256,128], index: 8, kind: output, shape index: {1}]   ;;  %s3381_s9 = inlined_call_operand.vmem [shape: f32[16,128], index: 9, kind: output, shape index: {2}]  }
   0x1 LB: > { %s2721_s10 = sadd.s32 4294967295, %s2663_s30   ;;  %p2079_p0 = scmp.ge.s32.totalorder %s2663_s30, 1  ;;  %s2663_s30 = sphi %s2715_s30, %s20_s30  }
   0x2   : > { %p294_p1 = scmp.lt.s32.totalorder %s2663_s30, 3 }
   0x4   : > { %p295_p2 = pnand %p2079_p0, %p294_p1 }
   0x5   : > { %v2557_v0 = vld [vmem:[%s3373_s1 + $0x40] sm:$0xff] (!%p295_p2)   ;;  %v2561_v4 = vld [vmem:[%s3373_s1 + $0x48] sm:$0xff] (!%p295_p2)   ;;  %v2565_v8 = vld [vmem:[%s3373_s1 + $0x50] sm:$0xff] (!%p295_p2)   ;;  %s2080_s24 = sshll.u32 (!%p295_p2), %s2721_s10, 2  ;;  %vm1480_vm0 = vcmask (!%p295_p2), 261120   ;;  %p359_p5 = scmp.lt.s32.totalorder (!%p295_p2), %s2721_s10, 1 }
   0x6   : > { %298 = sbr.rel (%p295_p2) target bundleno = 1594 (0x63a), region = 48  ;;  %v2558_v1 = vld [vmem:[%s3373_s1 + $0xc0] sm:$0xff] (!%p295_p2)   ;;  %2190 = vmatprep.subr.bf16.mxu0 (!%p295_p2), %v2557_v0  ;;  %v2562_v5 = vld [vmem:[%s3373_s1 + $0xc8] sm:$0xff] (!%p295_p2)   ;;  %v2566_v9 = vld [vmem:[%s3373_s1 + $0xd0] sm:$0xff] (!%p295_p2)   ;;  %p341_p3 = scmp.lt.s32.totalorder (!%p295_p2), %s2080_s24, 7 }
   0x7   : > { %v2559_v2 = vld [vmem:[%s3373_s1] sm:$0xff] (!%p295_p2)   ;;  %2218 = vmatprep.subr.bf16.mxu1 (!%p295_p2), %v2558_v1  ;;  %v2563_v6 = vld [vmem:[%s3373_s1 + $0x8] sm:$0xff] (!%p295_p2)   ;;  %v2567_v10 = vld [vmem:[%s3373_s1 + $0x10] sm:$0xff] (!%p295_p2)  }
   0x8   : > { %v2560_v3 = vld [vmem:[%s3373_s1 + $0x80] sm:$0xff] (!%p295_p2)   ;;  %2191 = vmatpush3.bf16.msra.mxu0 (!%p295_p2), %v2559_v2  ;;  %v2564_v7 = vld [vmem:[%s3373_s1 + $0x88] sm:$0xff] (!%p295_p2)   ;;  %v2568_v11 = vld [vmem:[%s3373_s1 + $0x90] sm:$0xff] (!%p295_p2)  }
   0x9   : > { %2219 = vmatpush3.bf16.msra.mxu1 (!%p295_p2), %v2560_v3  ;;  %2192 = vmatprep.subr.bf16.mxu0 (!%p295_p2), %v2561_v4  ;;  %v2569_v12 = vld [vmem:[%s3373_s1 + $0x58] sm:$0xff] (!%p295_p2)   ;;  %v2573_v16 = vld [vmem:[%s3373_s1 + $0x60] sm:$0xff] (!%p295_p2)   ;;  %v2577_v20 = vld [vmem:[%s3373_s1 + $0x68] sm:$0xff] (!%p295_p2)  }
   0xa   : > { %2220 = vmatprep.subr.bf16.mxu1 (!%p295_p2), %v2562_v5  ;;  %v2570_v13 = vld [vmem:[%s3373_s1 + $0xd8] sm:$0xff] (!%p295_p2)   ;;  %v2574_v17 = vld [vmem:[%s3373_s1 + $0xe0] sm:$0xff] (!%p295_p2)   ;;  %v2578_v21 = vld [vmem:[%s3373_s1 + $0xe8] sm:$0xff] (!%p295_p2)  }
   0xb   : > { %v2571_v14 = vld [vmem:[%s3373_s1 + $0x18] sm:$0xff] (!%p295_p2)   ;;  %v2575_v18 = vld [vmem:[%s3373_s1 + $0x20] sm:$0xff] (!%p295_p2)   ;;  %v2579_v22 = vld [vmem:[%s3373_s1 + $0x28] sm:$0xff] (!%p295_p2)  }
   0xc   : > { %2193 = vmatpush3.bf16.msra.mxu0 (!%p295_p2), %v2563_v6  ;;  %v2572_v15 = vld [vmem:[%s3373_s1 + $0x98] sm:$0xff] (!%p295_p2)   ;;  %v2576_v19 = vld [vmem:[%s3373_s1 + $0xa0] sm:$0xff] (!%p295_p2)   ;;  %v2580_v23 = vld [vmem:[%s3373_s1 + $0xa8] sm:$0xff] (!%p295_p2)  }
   0xd   : > { %2221 = vmatpush3.bf16.msra.mxu1 %v2564_v7  ;;  %2194 = vmatprep.subr.bf16.mxu0 %v2565_v8  ;;  %s3391_s24 = smov (!%p341_p3, %s2080_s24), 7  ;;  %v2581_v24 = vld [vmem:[%s3373_s1 + $0x70] sm:$0xff]   ;;  %v2585_v28 = vld [vmem:[%s3373_s1 + $0x78] sm:$0xff]   ;;  %v2589_v40 = vld [vmem:[%s3373_s1 + $0x140] sm:$0xff]  }
   0xe   : > { %2222 = vmatprep.subr.bf16.mxu1 %v2566_v9  ;;  %v2582_v25 = vld [vmem:[%s3373_s1 + $0xf0] sm:$0xff]   ;;  %s2189_s29 = sshll.u32 %s3391_s24, 5  ;;  %v2586_v29 = vld [vmem:[%s3373_s1 + $0xf8] sm:$0xff]   ;;  %v2590_v41 = vld [vmem:[%s3373_s1 + $0x1c0] sm:$0xff]   ;;  %s2084_s17 = sshll.u32 %s3391_s24, 3 }
   0xf   : > { %v2583_v26 = vld [vmem:[%s3373_s1 + $0x30] sm:$0xff]   ;;  %s2822_s19 = scalar_lea.vmem %s3372_s0, %s2189_s29  ;;  %v2587_v30 = vld [vmem:[%s3373_s1 + $0x38] sm:$0xff]   ;;  %v2591_v42 = vld [vmem:[%s3373_s1 + $0x100] sm:$0xff]   ;;  %s351_s21 = scalar_lea.vmem %s3379_s7, %s2084_s17 }
  0x10   : > { %2195 = vmatpush3.bf16.msra.mxu0 %v2567_v10  ;;  %v2584_v27 = vld [vmem:[%s3373_s1 + $0xb0] sm:$0xff]   ;;  %v2588_v31 = vld [vmem:[%s3373_s1 + $0xb8] sm:$0xff]   ;;  %v364_v32 = vld [vmem:[%s2822_s19] sm:$0xff]  ;;  %s2085_s24 = sshll.u32 %s2721_s10, 4  ;;  %s3395_s10 = smov (!%p359_p5, %s2721_s10), 1 }
  0x11   : > { %2223 = vmatpush3.bf16.msra.mxu1 %v2568_v11  ;;  %2196 = vmatprep.subr.bf16.mxu0 %v2569_v12  ;;  %v368_v33 = vld [vmem:[%s2822_s19 + $0x20] sm:$0xff]  ;;  %v365_v34 = vld [vmem:[%s2822_s19 + $0x8] sm:$0xff]  ;;  %v2597_v48 = vld [vmem:[%s3373_s1 + $0x150] sm:$0xff]   ;;  %p354_p4 = scmp.lt.s32.totalorder %s2085_s24, 31  ;;  %s2087_s26 = sshll.u32 %s3395_s10, 3 }
  0x12   : > { %2224 = vmatprep.subr.bf16.mxu1 %v2570_v13  ;;  %v2089_v35 = vcombine.low %v364_v32, %v368_v33  ;;  %v2090_v36 = vcombine.high %v364_v32, %v368_v33  ;;  %v369_v37 = vld [vmem:[%s2822_s19 + $0x28] sm:$0xff]  ;;  %v2592_v43 = vld [vmem:[%s3373_s1 + $0x180] sm:$0xff]   ;;  %v2598_v49 = vld [vmem:[%s3373_s1 + $0x1d0] sm:$0xff]   ;;  %s362_s11 = scalar_lea.vmem %s3381_s9, %s2087_s26 }
  0x13   : > { %v2091_v38 = vcombine.low %v365_v34, %v369_v37  ;;  %v2092_v39 = vcombine.high %v365_v34, %v369_v37  ;;  %v2593_v44 = vld [vmem:[%s3373_s1 + $0x148] sm:$0xff]   ;;  %v2599_v50 = vld [vmem:[%s3373_s1 + $0x110] sm:$0xff]   ;;  %v2601_v52 = vld [vmem:[%s3373_s1 + $0x158] sm:$0xff]   ;;  %s3393_s24 = smov (!%p354_p4, %s2085_s24), 31 }
  0x14   : > { %2197 = vmatpush3.bf16.msra.mxu0 %v2571_v14  ;;  %1011 = vmatprep.mubr.bf16.mxu0 %v2090_v36  ;;  %v2594_v45 = vld [vmem:[%s3373_s1 + $0x1c8] sm:$0xff]   ;;  %v2600_v51 = vld [vmem:[%s3373_s1 + $0x190] sm:$0xff]   ;;  %v2602_v53 = vld [vmem:[%s3373_s1 + $0x1d8] sm:$0xff]   ;;  %s2086_s22 = sshll.u32 %s3393_s24, 3 }
  0x15   : > { %2225 = vmatpush3.bf16.msra.mxu1 %v2572_v15  ;;  %2198 = vmatprep.subr.bf16.mxu0 %v2573_v16  ;;  %v2595_v46 = vld [vmem:[%s3373_s1 + $0x108] sm:$0xff]   ;;  %v2603_v54 = vld [vmem:[%s3373_s1 + $0x118] sm:$0xff]   ;;  %v2605_v56 = vld [vmem:[%s3373_s1 + $0x160] sm:$0xff]   ;;  %s3078_s25 = scalar_lea.vmem %s3380_s8, %s2086_s22 }
  0x16   : > { %2226 = vmatprep.subr.bf16.mxu1 %v2574_v17  ;;  %1060 = vmatprep.mubr.bf16.mxu1 %v2092_v39  ;;  %v2596_v47 = vld [vmem:[%s3373_s1 + $0x188] sm:$0xff]   ;;  %v2604_v55 = vld [vmem:[%s3373_s1 + $0x198] sm:$0xff]   ;;  %v2606_v57 = vld [vmem:[%s3373_s1 + $0x1e0] sm:$0xff]  }
  0x17   : > { %v2607_v58 = vld [vmem:[%s3373_s1 + $0x120] sm:$0xff]   ;;  %v2609_v63 = vld [vmem:[%s3373_s1 + $0x168] sm:$0xff]   ;;  %v2613_v8 = vld [vmem:[%s3373_s1 + $0x170] sm:$0xff]  }
  0x18   : > { %2199 = vmatpush3.bf16.msra.mxu0 %v2575_v18  ;;  %v2608_v59 = vld [vmem:[%s3373_s1 + $0x1a0] sm:$0xff]   ;;  %v2610_v1 = vld [vmem:[%s3373_s1 + $0x1e8] sm:$0xff]   ;;  %v2614_v9 = vld [vmem:[%s3373_s1 + $0x1f0] sm:$0xff]  }
  0x19   : > { %2227 = vmatpush3.bf16.msra.mxu1 %v2576_v19  ;;  %2200 = vmatprep.subr.bf16.mxu0 %v2577_v20  ;;  %v372_v60 = vld [vmem:[%s2822_s19 + $0x40] sm:$0xff]  ;;  %v2611_v2 = vld [vmem:[%s3373_s1 + $0x128] sm:$0xff]   ;;  %v2615_v10 = vld [vmem:[%s3373_s1 + $0x130] sm:$0xff]  }
  0x1a   : > { %2228 = vmatprep.subr.bf16.mxu1 %v2578_v21  ;;  %v376_v61 = vld [vmem:[%s2822_s19 + $0x60] sm:$0xff]  ;;  %v2612_v3 = vld [vmem:[%s3373_s1 + $0x1a8] sm:$0xff]   ;;  %v2616_v11 = vld [vmem:[%s3373_s1 + $0x1b0] sm:$0xff]  }
  0x1b   : > { %v2098_v62 = vcombine.high %v372_v60, %v376_v61  ;;  %v2097_v0 = vcombine.low %v372_v60, %v376_v61  ;;  %v373_v4 = vld [vmem:[%s2822_s19 + $0x48] sm:$0xff]  ;;  %v2617_v12 = vld [vmem:[%s3373_s1 + $0x178] sm:$0xff]   ;;  %v366_v16 = vld [vmem:[%s2822_s19 + $0x10] sm:$0xff] }
  0x1c   : > { %2201 = vmatpush3.bf16.msra.mxu0 %v2579_v22  ;;  %v377_v5 = vld [vmem:[%s2822_s19 + $0x68] sm:$0xff]  ;;  %v2618_v13 = vld [vmem:[%s3373_s1 + $0x1f8] sm:$0xff]   ;;  %v370_v17 = vld [vmem:[%s2822_s19 + $0x30] sm:$0xff] }
  0x1d   : > { %2229 = vmatpush3.bf16.msra.mxu1 %v2580_v23  ;;  %2202 = vmatprep.subr.bf16.mxu0 %v2581_v24  ;;  %v2100_v6 = vcombine.high %v373_v4, %v377_v5  ;;  %v2099_v7 = vcombine.low %v373_v4, %v377_v5  ;;  %v2619_v14 = vld [vmem:[%s3373_s1 + $0x138] sm:$0xff]   ;;  %v2093_v20 = vcombine.low %v366_v16, %v370_v17  ;;  %v374_v24 = vld [vmem:[%s2822_s19 + $0x50] sm:$0xff]  ;;  %v1175_v32 = vld [vmem:[%s3375_s3] sm:$0xff] }
  0x1e   : > { %2230 = vmatprep.subr.bf16.mxu1 %v2582_v25  ;;  %v2620_v15 = vld [vmem:[%s3373_s1 + $0x1b8] sm:$0xff]   ;;  %v2094_v21 = vcombine.high %v366_v16, %v370_v17  ;;  %v378_v25 = vld [vmem:[%s2822_s19 + $0x70] sm:$0xff]  ;;  %v1176_v33 = vld [vmem:[%s3375_s3 + $0x8] sm:$0xff] }
  0x1f   : > { %v367_v18 = vld [vmem:[%s2822_s19 + $0x18] sm:$0xff]  ;;  %v1177_v34 = vld [vmem:[%s3375_s3 + $0x10] sm:$0xff]  ;;  %v1180_v39 = vld [vmem:[%s3375_s3 + $0x28] sm:$0xff] }
  0x20   : > { %2203 = vmatpush3.bf16.msra.mxu0 %v2583_v26  ;;  %v371_v19 = vld [vmem:[%s2822_s19 + $0x38] sm:$0xff] }
  0x21   : > { %2231 = vmatpush3.bf16.msra.mxu1 %v2584_v27  ;;  %2204 = vmatprep.subr.bf16.mxu0 %v2585_v28  ;;  %v2095_v22 = vcombine.low %v367_v18, %v371_v19  ;;  %v2096_v23 = vcombine.high %v367_v18, %v371_v19  ;;  %v375_v26 = vld [vmem:[%s2822_s19 + $0x58] sm:$0xff]  ;;  %v2102_v27 = vcombine.high %v374_v24, %v378_v25 }
  0x22   : > { %2232 = vmatprep.subr.bf16.mxu1 %v2586_v29  ;;  %v379_v28 = vld [vmem:[%s2822_s19 + $0x78] sm:$0xff] }
  0x23   : > { %v2104_v29 = vcombine.high %v375_v26, %v379_v28  ;;  %v1178_v36 = vld [vmem:[%s3375_s3 + $0x18] sm:$0xff] }
  0x24   : > { %2205 = vmatpush3.bf16.msra.mxu0 %v2587_v30  ;;  %v2101_v30 = vcombine.low %v374_v24, %v378_v25  ;;  %v2474_v37 = vpack.c.bf16 %v1178_v36, %v1177_v34 }
  0x25   : > { %2233 = vmatpush3.bf16.msra.mxu1 %v2588_v31  ;;  %2246 = vmatprep.subr.bf16.mxu0 %v2589_v40  ;;  %v2103_v31 = vcombine.low %v375_v26, %v379_v28 }
  0x26   : > { %2274 = vmatprep.subr.bf16.mxu1 %v2590_v41  ;;  %v1181_v41 = vld [vmem:[%s3375_s3 + $0x30] sm:$0xff] }
  0x27   : > { %1012 = vmatmul.mubr.bf16.vlgmr.msra.gmra.mrb[0].mxu0 %v2089_v35  ;;  %v2470_v35 = vpack.c.bf16 %v1176_v33, %v1175_v32 }
  0x28   : > { %1061 = vmatmul.mubr.bf16.vlgmr.msra.gmra.mrb[0].mxu1 %v2091_v38  ;;  %2247 = vmatpush3.bf16.msra.mxu0 %v2591_v42  ;;  %v1179_v38 = vld [vmem:[%s3375_s3 + $0x20] sm:$0xff]  ;;  %v1182_v42 = vld [vmem:[%s3375_s3 + $0x38] sm:$0xff] }
  0x29   : > { %2275 = vmatpush3.bf16.msra.mxu1 %v2592_v43  ;;  %2248 = vmatprep.subr.bf16.mxu0 %v2593_v44  ;;  %v2478_v40 = vpack.c.bf16 %v1180_v39, %v1179_v38  ;;  %v2482_v43 = vpack.c.bf16 %v1182_v42, %v1181_v41  ;;  %v1183_v44 = vld [vmem:[%s3375_s3 + $0x40] sm:$0xff] }
  0x2a   : > { %2276 = vmatprep.subr.bf16.mxu1 %v2594_v45  ;;  %1019 = vmatprep.mubr.bf16.mxu0 %v2098_v62  ;;  %v1184_v45 = vld [vmem:[%s3375_s3 + $0x48] sm:$0xff] }
  0x2b   : > { %1068 = vmatprep.mubr.bf16.mxu1 %v2100_v6 }
  0x2c   : > { %2249 = vmatpush3.bf16.msra.mxu0 %v2595_v46  ;;  %v2486_v46 = vpack.c.bf16 %v1184_v45, %v1183_v44 }
  0x2d   : > { %2277 = vmatpush3.bf16.msra.mxu1 %v2596_v47  ;;  %2250 = vmatprep.subr.bf16.mxu0 %v2597_v48  ;;  %v1185_v47 = vld [vmem:[%s3375_s3 + $0x50] sm:$0xff]  ;;  %v1186_v48 = vld [vmem:[%s3375_s3 + $0x58] sm:$0xff] }
  0x2e   : > { %2278 = vmatprep.subr.bf16.mxu1 %v2598_v49  ;;  %v2490_v49 = vpack.c.bf16 %v1186_v48, %v1185_v47 }
  0x2f   : > { %1020 = vmatmul.mubr.bf16.gmra.mrb[4].mxu0 %v2097_v0 }
  0x30   : > { %2251 = vmatpush3.bf16.msra.mxu0 %v2599_v50  ;;  %1069 = vmatmul.mubr.bf16.gmra.mrb[4].mxu1 %v2099_v7  ;;  %v1187_v50 = vld [vmem:[%s3375_s3 + $0x60] sm:$0xff] }
  0x31   : > { %2279 = vmatpush3.bf16.msra.mxu1 %v2600_v51  ;;  %2252 = vmatprep.subr.bf16.mxu0 %v2601_v52  ;;  %v1188_v51 = vld [vmem:[%s3375_s3 + $0x68] sm:$0xff] }
  0x32   : > { %2280 = vmatprep.subr.bf16.mxu1 %v2602_v53  ;;  %1109 = vmatprep.mubr.bf16.mxu0 %v2094_v21  ;;  %v2494_v52 = vpack.c.bf16 %v1188_v51, %v1187_v50  ;;  %v1189_v53 = vld [vmem:[%s3375_s3 + $0x70] sm:$0xff] }
  0x33   : > { %1158 = vmatprep.mubr.bf16.mxu1 %v2096_v23 }
  0x34   : > { %2253 = vmatpush3.bf16.msra.mxu0 %v2603_v54  ;;  %v1190_v54 = vld [vmem:[%s3375_s3 + $0x78] sm:$0xff] }
  0x35   : > { %2281 = vmatpush3.bf16.msra.mxu1 %v2604_v55  ;;  %2254 = vmatprep.subr.bf16.mxu0 %v2605_v56  ;;  %v2498_v55 = vpack.c.bf16 %v1190_v54, %v1189_v53 }
  0x36   : > { %2282 = vmatprep.subr.bf16.mxu1 %v2606_v57 }
  0x38   : > { %2255 = vmatpush3.bf16.msra.mxu0 %v2607_v58  ;;  %v2088_v58 = vld [vmem:[%s3374_s2] ss:$0 sm:$0xff] }
  0x39   : > { %2283 = vmatpush3.bf16.msra.mxu1 %v2608_v59  ;;  %2256 = vmatprep.subr.bf16.mxu0 %v2609_v63 }
  0x3a   : > { %2284 = vmatprep.subr.bf16.mxu1 %v2610_v1 }
  0x3c   : > { %2257 = vmatpush3.bf16.msra.mxu0 %v2611_v2 }
  0x3d   : > { %2285 = vmatpush3.bf16.msra.mxu1 %v2612_v3  ;;  %2258 = vmatprep.subr.bf16.mxu0 %v2613_v8 }
  0x3e   : > { %2286 = vmatprep.subr.bf16.mxu1 %v2614_v9 }
  0x40   : > { %2259 = vmatpush3.bf16.msra.mxu0 %v2615_v10 }
  0x41   : > { %2287 = vmatpush3.bf16.msra.mxu1 %v2616_v11  ;;  %2260 = vmatprep.subr.bf16.mxu0 %v2617_v12 }
  0x42   : > { %2288 = vmatprep.subr.bf16.mxu1 %v2618_v13 }
  0x44   : > { %2261 = vmatpush3.bf16.msra.mxu0 %v2619_v14 }
  0x45   : > { %2289 = vmatpush3.bf16.msra.mxu1 %v2620_v15  ;;  %2471 = vmatprep.subr.bf16.mxu0 %v2470_v35 }
  0x47   : > { %1110 = vmatmul.mubr.bf16.vlgmr.msra.gmra.mrb[8].mxu0 %v2093_v20 }
  0x48   : > { %1159 = vmatmul.mubr.bf16.vlgmr.msra.gmra.mrb[8].mxu1 %v2095_v22  ;;  %1117 = vmatprep.mubr.bf16.mxu0 %v2102_v27 }
  0x49   : > { %1166 = vmatprep.mubr.bf16.mxu1 %v2104_v29  ;;  %2473 = vmatpush3.bf16.msra.mxu0 %v2470_v35 }
  0x4a   : > { %2475 = vmatprep.subr.bf16.mxu0 %v2474_v37 }
  0x4d   : > { %2477 = vmatpush3.bf16.msra.mxu0 %v2474_v37 }
  0x4e   : > { %2479 = vmatprep.subr.bf16.mxu0 %v2478_v40 }
  0x4f   : > { %1118 = vmatmul.mubr.bf16.gmra.mrb[12].mxu0 %v2101_v30 }
  0x50   : > { %1167 = vmatmul.mubr.bf16.gmra.mrb[12].mxu1 %v2103_v31 }
  0x51   : > { %2481 = vmatpush3.bf16.msra.mxu0 %v2478_v40 }
  0x52   : > { %2483 = vmatprep.subr.bf16.mxu0 %v2482_v43 }
  0x55   : > { %2485 = vmatpush3.bf16.msra.mxu0 %v2482_v43 }
  0x56   : > { %2487 = vmatprep.subr.bf16.mxu0 %v2486_v46 }
  0x59   : > { %2489 = vmatpush3.bf16.msra.mxu0 %v2486_v46 }
  0x5a   : > { %2491 = vmatprep.subr.bf16.mxu0 %v2490_v49 }
  0x5d   : > { %2493 = vmatpush3.bf16.msra.mxu0 %v2490_v49 }
  0x5e   : > { %2495 = vmatprep.subr.bf16.mxu0 %v2494_v52 }
  0x61   : > { %2497 = vmatpush3.bf16.msra.mxu0 %v2494_v52 }
  0x62   : > { %2499 = vmatprep.subr.bf16.mxu0 %v2498_v55 }
  0x65   : > { %2501 = vmatpush3.bf16.msra.mxu0 %v2498_v55 }
  0xfa   : > { %v2206_v56 = vpop.f32.mrb[0].mxu0 }
  0xfb   : > { %v2234_v57 = vpop.f32.mrb[0].mxu1  ;;  %v2207_v59 = vpop.f32.mrb[1].mxu0 }
  0xfc   : > { %v2208_v60 = vadd.f32 %v2207_v59, %v2206_v56  ;;  %v2235_v61 = vpop.f32.mrb[1].mxu1  ;;  %v2209_v62 = vpop.f32.mrb[2].mxu0 }
  0xfd   : > { %v2236_v63 = vadd.f32 %v2235_v61, %v2234_v57  ;;  %v2237_v0 = vpop.f32.mrb[2].mxu1  ;;  %v2210_v1 = vpop.f32.mrb[3].mxu0  ;;  %v1322_v57 = vld [vmem:[%s3377_s5] sm:$0xff]  ;;  %v1325_v61 = vld [vmem:[%s3377_s5 + $0x18] sm:$0xff] }
  0xfe   : > { %v1014_v2 = vadd.f32 %v2208_v60, %v2088_v58  ;;  %v2211_v3 = vadd.f32 %v2210_v1, %v2209_v62  ;;  %v2238_v4 = vpop.f32.mrb[3].mxu1  ;;  %v1324_v60 = vld [vmem:[%s3377_s5 + $0x10] sm:$0xff] }
  0xff   : > { %v2239_v5 = vadd.f32 %v2238_v4, %v2237_v0  ;;  %v2506_v62 = vpack.c.bf16 %v1325_v61, %v1324_v60  ;;  %v1327_v0 = vld [vmem:[%s3377_s5 + $0x28] sm:$0xff] }
 0x100   : > { %v1063_v6 = vadd.f32 %v2236_v63, %v1014_v2  ;;  %v1017_v7 = vadd.f32 %v2211_v3, %v2088_v58  ;;  %v1326_v63 = vld [vmem:[%s3377_s5 + $0x20] sm:$0xff]  ;;  %v1328_v2 = vld [vmem:[%s3377_s5 + $0x30] sm:$0xff]  ;;  %v1329_v3 = vld [vmem:[%s3377_s5 + $0x38] sm:$0xff] }
 0x101   : > { %v2510_v1 = vpack.c.bf16 %v1327_v0, %v1326_v63  ;;  %v2514_v4 = vpack.c.bf16 %v1329_v3, %v1328_v2  ;;  %v2170_v0 = vld [vmem:[%s3378_s6] ss:$0 sm:$0xff] }
 0x102   : > { %v1066_v8 = vadd.f32 %v2239_v5, %v1017_v7  ;;  %v2212_v9 = vpop.f32.mrb[4].mxu0  ;;  %v1330_v5 = vld [vmem:[%s3377_s5 + $0x40] sm:$0xff] }
 0x103   : > { %v2213_v10 = vpop.f32.mrb[5].mxu0  ;;  %v2240_v16 = vpop.f32.mrb[4].mxu1 }
 0x104   : > { %v2214_v11 = vadd.f32 %v2213_v10, %v2212_v9  ;;  %v2215_v12 = vpop.f32.mrb[6].mxu0  ;;  %v2241_v17 = vpop.f32.mrb[5].mxu1  ;;  %v1333_v9 = vld [vmem:[%s3377_s5 + $0x58] sm:$0xff]  ;;  %v1334_v10 = vld [vmem:[%s3377_s5 + $0x60] sm:$0xff] }
 0x105   : > { %v2216_v13 = vpop.f32.mrb[7].mxu0  ;;  %v2242_v19 = vadd.f32 %v2241_v17, %v2240_v16  ;;  %v2243_v20 = vpop.f32.mrb[6].mxu1  ;;  %v2169_v17 = vld [vmem:[%s3376_s4] ss:$0 sm:$0xff] }
 0x106   : > { %v2217_v14 = vadd.f32 %v2216_v13, %v2215_v12  ;;  %v1022_v15 = vadd.f32 %v2214_v11, %v2088_v58  ;;  %v2244_v21 = vpop.f32.mrb[7].mxu1  ;;  %v1335_v12 = vld [vmem:[%s3377_s5 + $0x68] sm:$0xff] }
 0x107   : > { %v2245_v23 = vadd.f32 %v2244_v21, %v2243_v20  ;;  %v2526_v13 = vpack.c.bf16 %v1335_v12, %v1334_v10 }
 0x108   : > { %v1025_v18 = vadd.f32 %v2217_v14, %v2088_v58  ;;  %v1071_v22 = vadd.f32 %v2242_v19, %v1022_v15  ;;  %v1323_v58 = vld [vmem:[%s3377_s5 + $0x8] sm:$0xff]  ;;  %v1336_v14 = vld [vmem:[%s3377_s5 + $0x70] sm:$0xff]  ;;  %v1337_v15 = vld [vmem:[%s3377_s5 + $0x78] sm:$0xff] }
 0x109   : > { %v2502_v59 = vpack.c.bf16 %v1323_v58, %v1322_v57  ;;  %v2530_v16 = vpack.c.bf16 %v1337_v15, %v1336_v14 }
 0x10a   : > { %v1074_v24 = vadd.f32 %v2245_v23, %v1025_v18 }
 0x10b   : > { %2503 = vmatprep.subr.bf16.mxu1 %v2502_v59 }
 0x10c   : > { %2505 = vmatpush3.bf16.msra.mxu1 %v2502_v59 }
 0x10d   : > { %2507 = vmatprep.subr.bf16.mxu1 %v2506_v62 }
 0x110   : > { %2509 = vmatpush3.bf16.msra.mxu1 %v2506_v62 }
 0x111   : > { %2511 = vmatprep.subr.bf16.mxu1 %v2510_v1 }
 0x114   : > { %2513 = vmatpush3.bf16.msra.mxu1 %v2510_v1 }
 0x115   : > { %2515 = vmatprep.subr.bf16.mxu1 %v2514_v4 }
 0x118   : > { %2517 = vmatpush3.bf16.msra.mxu1 %v2514_v4 }
 0x11a   : > { %v2262_v25 = vpop.f32.mrb[8].mxu0 }
 0x11b   : > { %v2290_v26 = vpop.f32.mrb[8].mxu1  ;;  %v2263_v27 = vpop.f32.mrb[9].mxu0 }
 0x11c   : > { %v2291_v28 = vpop.f32.mrb[9].mxu1  ;;  %v2264_v29 = vadd.f32 %v2263_v27, %v2262_v25  ;;  %v2265_v31 = vpop.f32.mrb[10].mxu0 }
 0x11d   : > { %v2292_v30 = vadd.f32 %v2291_v28, %v2290_v26  ;;  %v2293_v32 = vpop.f32.mrb[10].mxu1  ;;  %v2266_v33 = vpop.f32.mrb[11].mxu0 }
 0x11e   : > { %v2294_v34 = vpop.f32.mrb[11].mxu1  ;;  %v1112_v35 = vadd.f32 %v2264_v29, %v1063_v6  ;;  %v2267_v36 = vadd.f32 %v2266_v33, %v2265_v31  ;;  %v1331_v6 = vld [vmem:[%s3377_s5 + $0x48] sm:$0xff] }
 0x11f   : > { %v2295_v37 = vadd.f32 %v2294_v34, %v2293_v32  ;;  %v2518_v7 = vpack.c.bf16 %v1331_v6, %v1330_v5 }
 0x120   : > { %v1161_v38 = vadd.f32 %v2292_v30, %v1112_v35  ;;  %v1115_v39 = vadd.f32 %v2267_v36, %v1066_v8  ;;  %v1332_v8 = vld [vmem:[%s3377_s5 + $0x50] sm:$0xff] }
 0x121   : > { %2519 = vmatprep.subr.bf16.mxu1 %v2518_v7  ;;  %v2522_v11 = vpack.c.bf16 %v1333_v9, %v1332_v8 }
 0x122   : > { %v1164_v40 = vadd.f32 %v2295_v37, %v1115_v39  ;;  %v2268_v41 = vpop.f32.mrb[12].mxu0  ;;  %2394 = vmatprep.mubr.f32.mxu0 %v1161_v38  ;;  %2521 = vmatpush3.bf16.msra.mxu1 %v2518_v7 }
 0x123   : > { %v2296_v42 = vpop.f32.mrb[12].mxu1  ;;  %v2269_v43 = vpop.f32.mrb[13].mxu0  ;;  %2523 = vmatprep.subr.bf16.mxu1 %v2522_v11 }
 0x124   : > { %v2297_v44 = vpop.f32.mrb[13].mxu1  ;;  %v2270_v45 = vadd.f32 %v2269_v43, %v2268_v41  ;;  %v2271_v47 = vpop.f32.mrb[14].mxu0  ;;  %2395 = vmatmul.mubr.f32.vlgmr.msra.gmra.mrb[16].mxu0 %v1164_v40 }
 0x125   : > { %v2298_v46 = vadd.f32 %v2297_v44, %v2296_v42  ;;  %v2299_v48 = vpop.f32.mrb[14].mxu1  ;;  %v2272_v49 = vpop.f32.mrb[15].mxu0 }
 0x126   : > { %v2300_v50 = vpop.f32.mrb[15].mxu1  ;;  %v1120_v51 = vadd.f32 %v2270_v45, %v1071_v22  ;;  %v2273_v52 = vadd.f32 %v2272_v49, %v2271_v47  ;;  %2525 = vmatpush3.bf16.msra.mxu1 %v2522_v11 }
 0x127   : > { %v2301_v53 = vadd.f32 %v2300_v50, %v2299_v48  ;;  %2527 = vmatprep.subr.bf16.mxu1 %v2526_v13 }
 0x128   : > { %v1169_v54 = vadd.f32 %v2298_v46, %v1120_v51  ;;  %v1123_v55 = vadd.f32 %v2273_v52, %v1074_v24 }
 0x12a   : > { %v1172_v56 = vadd.f32 %v2301_v53, %v1123_v55  ;;  %2397 = vmatprep.mubr.f32.mxu0 %v1169_v54  ;;  %2529 = vmatpush3.bf16.msra.mxu1 %v2526_v13 }
 0x12b   : > { %2531 = vmatprep.subr.bf16.mxu1 %v2530_v16 }
 0x12c   : > { %2398 = vmatmul.mubr.f32.gmra.mrb[18].mxu0 %v1172_v56 }
 0x12e   : > { %2533 = vmatpush3.bf16.msra.mxu1 %v2530_v16 }
 0x1f7   : > { %v2396_v18 = vpop.f32.mrb[16].mxu0 }
 0x1f8   : > { %v1270_v19 = vadd.f32 %v2396_v18, %v2169_v17  ;;  %v1264_v20 = vpop.f32.mrb[17].mxu0 }
 0x1f9   : > { %v1265_v21 = vadd.f32 %v2169_v17, %v1264_v20 }
 0x1fb   : > { %v1283_v22 = vadd.f32 %v1270_v19, %v1265_v21 }
 0x1ff   : > { %v2399_v23 = vpop.f32.mrb[18].mxu0 }
 0x200   : > { %v1274_v24 = vpop.f32.mrb[19].mxu0  ;;  %v1280_v26 = vadd.f32 %v2399_v23, %v2169_v17 }
 0x201   : > { %v1275_v25 = vadd.f32 %v2169_v17, %v1274_v24 }
 0x203   : > { %v1284_v27 = vadd.f32 %v1283_v22, %v1275_v25 }
 0x205   : > { %v1285_v28 = vadd.f32 %v1284_v27, %v1280_v26 }
 0x207   : > { %v1286_v29 = vrot.slane %v1285_v28, 4 }
 0x209   : > { %v1287_v30 = vadd.f32 %v1286_v29, %v1285_v28 }
 0x20b   : > { %v1288_v31 = vrot.slane %v1287_v30, 2 }
 0x20d   : > { %v1289_v32 = vadd.f32 %v1288_v31, %v1287_v30 }
 0x20f   : > { %v1290_v33 = vrot.slane %v1289_v32, 1 }
 0x211   : > { %v1291_v34 = vadd.f32 %v1290_v33, %v1289_v32 }
 0x213   : > { %v1293_v35 = vmul.f32 0.03125, %v1291_v34 }
 0x215   : > { %v1294_v36 = vsub.f32 %v1265_v21, %v1293_v35  ;;  %v1295_v37 = vsub.f32 %v1270_v19, %v1293_v35  ;;  %v1296_v38 = vsub.f32 %v1275_v25, %v1293_v35  ;;  %v1297_v39 = vsub.f32 %v1280_v26, %v1293_v35 }
 0x217   : > { %v1298_v40 = vmul.f32 %v1294_v36, %v1294_v36  ;;  %v1299_v41 = vmul.f32 %v1295_v37, %v1295_v37  ;;  %v1300_v42 = vmul.f32 %v1296_v38, %v1296_v38  ;;  %v1301_v44 = vmul.f32 %v1297_v39, %v1297_v39 }
 0x219   : > { %v1302_v43 = vadd.f32 %v1299_v41, %v1298_v40  ;;  %v1706_v41 = vlaneseq }
 0x21b   : > { %v1303_v45 = vadd.f32 %v1302_v43, %v1300_v42  ;;  %v3068_v42 = vshrl.u32 %v1706_v41, 7 }
 0x21d   : > { %v1304_v46 = vadd.f32 %v1303_v45, %v1301_v44  ;;  %v3071_v43 = vadd.s32 8, %v3068_v42  ;;  %v3073_v44 = vand.u32 127, %v1706_v41 }
 0x21f   : > { %v1305_v47 = vrot.slane %v1304_v46, 4  ;;  %vm1726_vm1 = vcmp.eq.s32.totalorder %v3071_v43, %v3073_v44  ;;  %vm1725_vm2 = vcmp.eq.s32.totalorder %v3068_v42, %v3073_v44 }
 0x221   : > { %v1306_v48 = vadd.f32 %v1305_v47, %v1304_v46 }
 0x223   : > { %v1307_v49 = vrot.slane %v1306_v48, 2 }
 0x225   : > { %v1308_v50 = vadd.f32 %v1307_v49, %v1306_v48 }
 0x227   : > { %v1309_v51 = vrot.slane %v1308_v50, 1 }
 0x229   : > { %v1310_v52 = vadd.f32 %v1309_v51, %v1308_v50  ;;  %v3101_v51 = vadd.s32 24, %v3068_v42 }
 0x22b   : > { %v1311_v53 = vmul.f32 0.03125, %v1310_v52  ;;  %vm1728_vm3 = vcmp.eq.s32.totalorder %v3101_v51, %v3073_v44 }
 0x22d   : > { %v1312_v54 = vadd.f32 1e-05, %v1311_v53  ;;  %v3104_v53 = vadd.s32 16, %v3068_v42 }
 0x22f   : > { %2621 = vrsqrt.f32 %v1312_v54  ;;  %vm1727_vm4 = vcmp.eq.s32.totalorder %v3104_v53, %v3073_v44 }
 0x239   : > { %v2622_v55 = vpop.eup %2621 }
 0x23a   : > { %v1314_v56 = vmul.f32 %v2622_v55, %v1294_v36  ;;  %v1315_v57 = vmul.f32 %v2622_v55, %v1295_v37  ;;  %v1316_v58 = vmul.f32 %v2622_v55, %v1296_v38  ;;  %v1317_v59 = vmul.f32 %v2622_v55, %v1297_v39 }
 0x23c   : > { %v1318_v60 = vmax.f32 %v1314_v56, 0.0  ;;  %v1319_v61 = vmax.f32 %v1315_v57, 0.0  ;;  %v1320_v62 = vmax.f32 %v1316_v58, 0.0  ;;  %v1321_v63 = vmax.f32 %v1317_v59, 0.0 }
 0x23e   : > { %2432 = vmatprep.mubr.f32.mxu1 %v1318_v60  ;;  %v3127_v60 = vadd.s32 40, %v3068_v42 }
 0x23f   : > { %2433 = vmatmul.mubr.f32.vlgmr.msra.gmra.mrb[16].mxu1 %v1319_v61 }
 0x240   : > { %2435 = vmatprep.mubr.f32.mxu1 %v1320_v62  ;;  %v3130_v62 = vadd.s32 32, %v3068_v42  ;;  %vm1730_vm5 = vcmp.eq.s32.totalorder %v3127_v60, %v3073_v44 }
 0x242   : > { %vm1729_vm6 = vcmp.eq.s32.totalorder %v3130_v62, %v3073_v44 }
 0x243   : > { %2436 = vmatmul.mubr.f32.gmra.mrb[18].mxu1 %v1321_v63 }
 0x312   : > { %v2434_v1 = vpop.f32.mrb[16].mxu1 }
 0x313   : > { %v1417_v2 = vadd.f32 %v2434_v1, %v2170_v0  ;;  %v1411_v3 = vpop.f32.mrb[17].mxu1 }
 0x314   : > { %v1412_v4 = vadd.f32 %v2170_v0, %v1411_v3 }
 0x316   : > { %v1430_v5 = vadd.f32 %v1417_v2, %v1412_v4  ;;  %v2437_v6 = vpop.f32.mrb[18].mxu1 }
 0x317   : > { %v1421_v7 = vpop.f32.mrb[19].mxu1  ;;  %v1427_v9 = vadd.f32 %v2437_v6, %v2170_v0  ;;  %v3153_v6 = vadd.s32 56, %v3068_v42 }
 0x318   : > { %v1422_v8 = vadd.f32 %v2170_v0, %v1421_v7 }
 0x319   : > { %vm1732_vm7 = vcmp.eq.s32.totalorder %v3153_v6, %v3073_v44 }
 0x31a   : > { %v1431_v10 = vadd.f32 %v1430_v5, %v1422_v8 }
 0x31c   : > { %v1432_v11 = vadd.f32 %v1431_v10, %v1427_v9 }
 0x31e   : > { %v1433_v12 = vrot.slane %v1432_v11, 4 }
 0x320   : > { %v1434_v13 = vadd.f32 %v1433_v12, %v1432_v11 }
 0x322   : > { %v1435_v14 = vrot.slane %v1434_v13, 2 }
 0x324   : > { %v1436_v15 = vadd.f32 %v1435_v14, %v1434_v13 }
 0x326   : > { %v1437_v16 = vrot.slane %v1436_v15, 1 }
 0x328   : > { %v1438_v17 = vadd.f32 %v1437_v16, %v1436_v15  ;;  %v3179_v16 = vadd.s32 72, %v3068_v42 }
 0x32a   : > { %v1439_v18 = vmul.f32 0.03125, %v1438_v17  ;;  %vm1734_vm9 = vcmp.eq.s32.totalorder %v3179_v16, %v3073_v44 }
 0x32c   : > { %v1442_v19 = vsub.f32 %v1422_v8, %v1439_v18  ;;  %v1443_v20 = vsub.f32 %v1427_v9, %v1439_v18  ;;  %v1440_v21 = vsub.f32 %v1412_v4, %v1439_v18  ;;  %v1441_v22 = vsub.f32 %v1417_v2, %v1439_v18 }
 0x32d   : > { %v3156_v8 = vadd.s32 48, %v3068_v42  ;;  %v3182_v18 = vadd.s32 64, %v3068_v42 }
 0x32e   : > { %v2538_v23 = vpack.c.bf16 %v1443_v20, %v1442_v19  ;;  %1448 = vxpose.xlu0.b32.start [1/4] (short) %v1440_v21, 128  ;;  %1444 = vst [vmem:[%s351_s21] sm:$0xff] %v1440_v21  ;;  %v2534_v24 = vpack.c.bf16 %v1441_v22, %v1440_v21  ;;  %1445 = vst [vmem:[%s351_s21 + $0x8] sm:$0xff] %v1441_v22 }
 0x32f   : > { %1446 = vst [vmem:[%s351_s21 + $0x10] sm:$0xff] %v1442_v19  ;;  %1447 = vst [vmem:[%s351_s21 + $0x18] sm:$0xff] %v1443_v20  ;;  %vm1731_vm8 = vcmp.eq.s32.totalorder %v3156_v8, %v3073_v44  ;;  %vm1733_vm10 = vcmp.eq.s32.totalorder %v3182_v18, %v3073_v44 }
 0x330   : > { %2535 = vmatprep.subr.bf16.mxu0 %v2534_v24  ;;  %2542 = vmatprep.subr.bf16.mxu1 %v2534_v24 }
 0x331   : > { %2537 = vmatpush3.bf16.msra.mxu0 %v2534_v24  ;;  %2544 = vmatpush3.bf16.msra.mxu1 %v2534_v24 }
 0x332   : > { %1449 = vxpose.xlu0.b32.cont [2/4] (short) %v1441_v22, 128  ;;  %2539 = vmatprep.subr.bf16.mxu0 %v2538_v23 }
 0x333   : > { %2543 = vmatprep.subr.bf16.mxu1 %v2538_v23 }
 0x335   : > { %2541 = vmatpush3.bf16.msra.mxu0 %v2538_v23  ;;  %2545 = vmatpush3.bf16.msra.mxu1 %v2538_v23 }
 0x336   : > { %1450 = vxpose.xlu0.b32.cont [3/4] (short) %v1442_v19, 128 }
 0x33a   : > { %1451 = vxpose.xlu0.b32.end [4/4] (short) %v1443_v20, 128 }
 0x3ae   : > { %v1464_v25 = vpop.trf.xlu0 }
 0x3af   : > { %2446 = vmatprep.mubr.msk.f32.mxu0 %vm1480_vm0, %v1464_v25 }
 0x3b2   : > { %v1465_v26 = vpop.trf.xlu0 }
 0x3b3   : > { %2447 = vmatmul.mubr.msk.f32.vlgmr.msra.gmra.mrb[20].mxu0 %vm1480_vm0, %v1465_v26  ;;  %v3205_v26 = vadd.s32 88, %v3068_v42 }
 0x3b5   : > { %vm1736_vm11 = vcmp.eq.s32.totalorder %v3205_v26, %v3073_v44 }
 0x3b6   : > { %v1466_v27 = vpop.trf.xlu0 }
 0x3b7   : > { %2449 = vmatprep.mubr.msk.f32.mxu0 %vm1480_vm0, %v1466_v27 }
 0x3ba   : > { %v1467_v28 = vpop.trf.xlu0 }
 0x3bb   : > { %2450 = vmatmul.mubr.msk.f32.gmra.mrb[22].mxu0 %vm1480_vm0, %v1467_v28  ;;  %v3208_v28 = vadd.s32 80, %v3068_v42 }
 0x3bd   : > { %vm1735_vm12 = vcmp.eq.s32.totalorder %v3208_v28, %v3073_v44 }
 0x3be   : > { %v1468_v29 = vpop.trf.xlu0 }
 0x3bf   : > { %2452 = vmatprep.mubr.msk.f32.mxu0 %vm1480_vm0, %v1468_v29 }
 0x3c2   : > { %v1469_v30 = vpop.trf.xlu0 }
 0x3c3   : > { %2453 = vmatmul.mubr.msk.f32.gmra.mrb[24].mxu0 %vm1480_vm0, %v1469_v30 }
 0x3c6   : > { %v1470_v31 = vpop.trf.xlu0 }
 0x3c7   : > { %2455 = vmatprep.mubr.msk.f32.mxu0 %vm1480_vm0, %v1470_v31 }
 0x3ca   : > { %v1471_v32 = vpop.trf.xlu0 }
 0x3cb   : > { %2456 = vmatmul.mubr.msk.f32.gmra.mrb[26].mxu0 %vm1480_vm0, %v1471_v32 }
 0x3ce   : > { %v1472_v33 = vpop.trf.xlu0 }
 0x3cf   : > { %2458 = vmatprep.mubr.msk.f32.mxu1 %vm1480_vm0, %v1472_v33 }
 0x3d2   : > { %v1473_v34 = vpop.trf.xlu0 }
 0x3d3   : > { %2459 = vmatmul.mubr.msk.f32.vlgmr.msra.gmra.mrb[20].mxu1 %vm1480_vm0, %v1473_v34 }
 0x3d6   : > { %v1474_v35 = vpop.trf.xlu0 }
 0x3d7   : > { %2461 = vmatprep.mubr.msk.f32.mxu1 %vm1480_vm0, %v1474_v35 }
 0x3da   : > { %v1475_v36 = vpop.trf.xlu0 }
 0x3db   : > { %2462 = vmatmul.mubr.msk.f32.gmra.mrb[22].mxu1 %vm1480_vm0, %v1475_v36  ;;  %v3231_v36 = vadd.s32 104, %v3068_v42 }
 0x3dd   : > { %vm3384_vm13 = vcmp.eq.s32.totalorder %v3231_v36, %v3073_v44 }
 0x3de   : > { %v1476_v37 = vpop.trf.xlu0 }
 0x3df   : > { %2464 = vmatprep.mubr.msk.f32.mxu1 %vm1480_vm0, %v1476_v37 }
 0x3e2   : > { %v1477_v38 = vpop.trf.xlu0 }
 0x3e3   : > { %2465 = vmatmul.mubr.msk.f32.gmra.mrb[24].mxu1 %vm1480_vm0, %v1477_v38  ;;  %v3234_v38 = vadd.s32 96, %v3068_v42 }
 0x3e5   : > { %vm3385_vm14 = vcmp.eq.s32.totalorder %v3234_v38, %v3073_v44 }
 0x3e6   : > { %v1478_v39 = vpop.trf.xlu0 }
 0x3e7   : > { %2467 = vmatprep.mubr.msk.f32.mxu1 %vm1480_vm0, %v1478_v39 }
 0x3ea   : > { %v1479_v40 = vpop.trf.xlu0 }
 0x3eb   : > { %2468 = vmatmul.mubr.msk.f32.gmra.mrb[26].mxu1 %vm1480_vm0, %v1479_v40 }
 0x486   : > { %v2448_v45 = vpop.f32.mrb[20].mxu0 }
 0x487   : > { %v3082_v46 = vmul.f32 0.03125, %v2448_v45  ;;  %v1595_v47 = vpop.f32.mrb[21].mxu0 }
 0x488   : > { %v3086_v48 = vmul.f32 0.03125, %v1595_v47 }
 0x489   : > { %1691 = vst [vmem:[%s3078_s25 + $0x8] sm:$0xff] %v3082_v46  ;;  %v1742_v49 = vsel %vm1726_vm1, %v3082_v46, 0.0 }
 0x48a   : > { %1690 = vst [vmem:[%s3078_s25] sm:$0xff] %v3086_v48  ;;  %1759 = vadd.xlane.f32.xlu1 %v1742_v49  ;;  %v1741_v50 = vsel %vm1725_vm2, %v3086_v48, 0.0 }
 0x48b   : > { %v1789_v52 = vadd.f32 %v1742_v49, %v1741_v50 }
 0x48e   : > { %1757 = vadd.xlane.f32.xlu1 %v1741_v50  ;;  %v2451_v54 = vpop.f32.mrb[22].mxu0 }
 0x48f   : > { %v3108_v55 = vmul.f32 0.03125, %v2451_v54  ;;  %v1605_v56 = vpop.f32.mrb[23].mxu0  ;;  %v3257_v54 = vadd.s32 112, %v3068_v42 }
 0x490   : > { %v3112_v57 = vmul.f32 0.03125, %v1605_v56 }
 0x491   : > { %1693 = vst [vmem:[%s3078_s25 + $0x18] sm:$0xff] %v3108_v55  ;;  %v1744_v58 = vsel %vm1728_vm3, %v3108_v55, 0.0  ;;  %vm3383_vm15 = vcmp.eq.s32.totalorder %v3257_v54, %v3073_v44 }
 0x492   : > { %1692 = vst [vmem:[%s3078_s25 + $0x10] sm:$0xff] %v3112_v57  ;;  %1763 = vadd.xlane.f32.xlu1 %v1744_v58  ;;  %v1743_v59 = vsel %vm1727_vm4, %v3112_v57, 0.0 }
 0x493   : > { %v1790_v61 = vadd.f32 %v1789_v52, %v1743_v59 }
 0x495   : > { %v1791_v63 = vadd.f32 %v1790_v61, %v1744_v58  ;;  %v3260_v58 = vadd.s32 120, %v3068_v42 }
 0x496   : > { %1761 = vadd.xlane.f32.xlu1 %v1743_v59  ;;  %v2454_v0 = vpop.f32.mrb[24].mxu0 }
 0x497   : > { %v3134_v1 = vmul.f32 0.03125, %v2454_v0  ;;  %v1615_v2 = vpop.f32.mrb[25].mxu0  ;;  %vm3382_vm0 = vcmp.eq.s32.totalorder %v3260_v58, %v3073_v44 }
 0x498   : > { %v3138_v3 = vmul.f32 0.03125, %v1615_v2 }
 0x499   : > { %1695 = vst [vmem:[%s3078_s25 + $0x28] sm:$0xff] %v3134_v1  ;;  %v1746_v4 = vsel %vm1730_vm5, %v3134_v1, 0.0 }
 0x49a   : > { %1694 = vst [vmem:[%s3078_s25 + $0x20] sm:$0xff] %v3138_v3  ;;  %1767 = vadd.xlane.f32.xlu1 %v1746_v4  ;;  %v1745_v5 = vsel %vm1729_vm6, %v3138_v3, 0.0 }
 0x49b   : > { %1765 = vadd.xlane.f32.xlu0 %v1745_v5  ;;  %v1792_v7 = vadd.f32 %v1791_v63, %v1745_v5 }
 0x49d   : > { %v1793_v9 = vadd.f32 %v1792_v7, %v1746_v4 }
 0x49e   : > { %v2457_v10 = vpop.f32.mrb[26].mxu0 }
 0x49f   : > { %v3160_v11 = vmul.f32 0.03125, %v2457_v10  ;;  %v1625_v12 = vpop.f32.mrb[27].mxu0 }
 0x4a0   : > { %v3164_v13 = vmul.f32 0.03125, %v1625_v12 }
 0x4a1   : > { %1697 = vst [vmem:[%s3078_s25 + $0x38] sm:$0xff] %v3160_v11  ;;  %v1748_v14 = vsel %vm1732_vm7, %v3160_v11, 0.0 }
 0x4a2   : > { %1696 = vst [vmem:[%s3078_s25 + $0x30] sm:$0xff] %v3164_v13  ;;  %1771 = vadd.xlane.f32.xlu1 %v1748_v14  ;;  %v1747_v15 = vsel %vm1731_vm8, %v3164_v13, 0.0 }
 0x4a3   : > { %v1794_v17 = vadd.f32 %v1793_v9, %v1747_v15 }
 0x4a5   : > { %v1795_v19 = vadd.f32 %v1794_v17, %v1748_v14 }
 0x4a6   : > { %v2460_v20 = vpop.f32.mrb[20].mxu1  ;;  %1769 = vadd.xlane.f32.xlu1 %v1747_v15 }
 0x4a7   : > { %v3186_v21 = vmul.f32 0.03125, %v2460_v20  ;;  %v1635_v22 = vpop.f32.mrb[21].mxu1 }
 0x4a8   : > { %v3190_v23 = vmul.f32 0.03125, %v1635_v22 }
 0x4a9   : > { %1699 = vst [vmem:[%s3078_s25 + $0x48] sm:$0xff] %v3186_v21  ;;  %v1750_v24 = vsel %vm1734_vm9, %v3186_v21, 0.0 }
 0x4aa   : > { %1698 = vst [vmem:[%s3078_s25 + $0x40] sm:$0xff] %v3190_v23  ;;  %1775 = vadd.xlane.f32.xlu1 %v1750_v24  ;;  %v1749_v25 = vsel %vm1733_vm10, %v3190_v23, 0.0 }
 0x4ab   : > { %v1796_v27 = vadd.f32 %v1795_v19, %v1749_v25 }
 0x4ad   : > { %v1797_v29 = vadd.f32 %v1796_v27, %v1750_v24 }
 0x4ae   : > { %v2463_v30 = vpop.f32.mrb[22].mxu1  ;;  %1773 = vadd.xlane.f32.xlu1 %v1749_v25 }
 0x4af   : > { %v3212_v31 = vmul.f32 0.03125, %v2463_v30  ;;  %v1645_v32 = vpop.f32.mrb[23].mxu1 }
 0x4b0   : > { %v3216_v33 = vmul.f32 0.03125, %v1645_v32 }
 0x4b1   : > { %1701 = vst [vmem:[%s3078_s25 + $0x58] sm:$0xff] %v3212_v31  ;;  %v1752_v34 = vsel %vm1736_vm11, %v3212_v31, 0.0 }
 0x4b2   : > { %1700 = vst [vmem:[%s3078_s25 + $0x50] sm:$0xff] %v3216_v33  ;;  %1779 = vadd.xlane.f32.xlu1 %v1752_v34  ;;  %v1751_v35 = vsel %vm1735_vm12, %v3216_v33, 0.0 }
 0x4b3   : > { %v1798_v37 = vadd.f32 %v1797_v29, %v1751_v35 }
 0x4b5   : > { %v1799_v39 = vadd.f32 %v1798_v37, %v1752_v34 }
 0x4b6   : > { %v2466_v40 = vpop.f32.mrb[24].mxu1  ;;  %1777 = vadd.xlane.f32.xlu1 %v1751_v35 }
 0x4b7   : > { %v3238_v41 = vmul.f32 0.03125, %v2466_v40  ;;  %v1655_v45 = vpop.f32.mrb[25].mxu1 }
 0x4b8   : > { %v3242_v47 = vmul.f32 0.03125, %v1655_v45 }
 0x4b9   : > { %1703 = vst [vmem:[%s3078_s25 + $0x68] sm:$0xff] %v3238_v41  ;;  %v1754_v49 = vsel %vm3384_vm13, %v3238_v41, 0.0 }
 0x4ba   : > { %1702 = vst [vmem:[%s3078_s25 + $0x60] sm:$0xff] %v3242_v47  ;;  %1783 = vadd.xlane.f32.xlu1 %v1754_v49  ;;  %v1753_v50 = vsel %vm3385_vm14, %v3242_v47, 0.0 }
 0x4bb   : > { %v1800_v52 = vadd.f32 %v1799_v39, %v1753_v50 }
 0x4bd   : > { %v1801_v56 = vadd.f32 %v1800_v52, %v1754_v49 }
 0x4be   : > { %v2469_v59 = vpop.f32.mrb[26].mxu1  ;;  %1781 = vadd.xlane.f32.xlu1 %v1753_v50 }
 0x4bf   : > { %v3262_v61 = vmul.f32 0.03125, %v2469_v59  ;;  %v1665_v63 = vpop.f32.mrb[27].mxu1 }
 0x4c0   : > { %v3266_v0 = vmul.f32 0.03125, %v1665_v63 }
 0x4c1   : > { %1705 = vst [vmem:[%s3078_s25 + $0x78] sm:$0xff] %v3262_v61  ;;  %v1756_v5 = vsel %vm3382_vm0, %v3262_v61, 0.0 }
 0x4c2   : > { %1704 = vst [vmem:[%s3078_s25 + $0x70] sm:$0xff] %v3266_v0  ;;  %v1755_v2 = vsel %vm3383_vm15, %v3266_v0, 0.0 }
 0x4c3   : > { %1785 = vadd.xlane.f32.xlu1 %v1755_v2  ;;  %v1802_v4 = vadd.f32 %v1801_v56, %v1755_v2 }
 0x4c5   : > { %v1803_v7 = vadd.f32 %v1802_v4, %v1756_v5 }
 0x4c7   : > { %1787 = vadd.xlane.f32.xlu1 %v1756_v5  ;;  %v1804_v9 = vrot.slane %v1803_v7, 4 }
 0x4c9   : > { %v1805_v10 = vadd.f32 %v1804_v9, %v1803_v7 }
 0x4cb   : > { %v1806_v12 = vrot.slane %v1805_v10, 2 }
 0x4cd   : > { %v1807_v14 = vadd.f32 %v1806_v12, %v1805_v10 }
 0x4cf   : > { %v1808_v17 = vrot.slane %v1807_v14, 1 }
 0x4d1   : > { %v1809_v20 = vadd.f32 %v1808_v17, %v1807_v14 }
 0x4d3   : > { %vm1858_vm14 = vcmp.gt.f32.partialorder %v1809_v20, 0.0 }
 0x517   : > { %v1760_v15 = vpop.xlane.xlu1 %1759 }
 0x518   : > { %vm1811_vm15 = vcmp.gt.f32.partialorder %v1760_v15, 0.0 }
 0x51b   : > { %v1758_v19 = vpop.xlane.xlu1 %1757 }
 0x51c   : > { %2623 = vrsqrt.f32 %v1758_v19  ;;  %vm1810_vm0 = vcmp.gt.f32.partialorder %v1758_v19, 0.0 }
 0x51d   : > { %2625 = vrsqrt.f32 %v1760_v15 }
 0x51e   : > { %2627 = vrsqrt.f32 %v1809_v20 }
 0x51f   : > { %v1764_v22 = vpop.xlane.xlu1 %1763 }
 0x523   : > { %v1762_v24 = vpop.xlane.xlu1 %1761 }
 0x524   : > { %2629 = vrsqrt.f32 %v1762_v24  ;;  %vm1812_vm13 = vcmp.gt.f32.partialorder %v1762_v24, 0.0 }
 0x525   : > { %2631 = vrsqrt.f32 %v1764_v22 }
 0x526   : > { %v2624_v25 = vpop.eup %2623 }
 0x527   : > { %v2626_v29 = vpop.eup %2625  ;;  %v1842_v30 = vsel %vm1810_vm0, %v2624_v25, 0.0  ;;  %v1768_v32 = vpop.xlane.xlu1 %1767  ;;  %vm1813_vm0 = vcmp.gt.f32.partialorder %v1764_v22, 0.0 }
 0x528   : > { %v1766_v27 = vpop.xlane.xlu0 %1765  ;;  %v2628_v34 = vpop.eup %2627  ;;  %v1843_v35 = vsel %vm1811_vm15, %v2626_v29, 0.0  ;;  %v1861_v39 = vmul.f32 %v1842_v30, %v3086_v48 }
 0x529   : > { %2633 = vrsqrt.f32 %v1766_v27  ;;  %v1862_v50 = vmul.f32 %v1843_v35, %v3082_v46  ;;  %v3285_v56 = vsel %vm1858_vm14, %v2628_v34, 0.0  ;;  %vm1815_vm14 = vcmp.gt.f32.partialorder %v1768_v32, 0.0 }
 0x52a   : > { %2635 = vrsqrt.f32 %v1768_v32  ;;  %v1877_v59 = vmul.f32 %v1861_v39, %v3285_v56 }
 0x52b   : > { %v1878_v48 = vmul.f32 %v1862_v50, %v3285_v56 }
 0x52c   : > { %v1893_v9 = vand.u32 2147483647, %v1877_v59 }
 0x52d   : > { %v1894_v12 = vand.u32 2147483647, %v1878_v48 }
 0x52e   : > { %v2630_v37 = vpop.eup %2629  ;;  %v1909_v17 = vsel %vm1725_vm2, 0.0, %v1893_v9 }
 0x52f   : > { %v1844_v40 = vsel %vm1812_vm13, %v2630_v37, 0.0  ;;  %v1772_v45 = vpop.xlane.xlu1 %1771  ;;  %v2632_v49 = vpop.eup %2631  ;;  %vm1814_vm13 = vcmp.gt.f32.partialorder %v1766_v27, 0.0 }
 0x530   : > { %v1863_v52 = vmul.f32 %v1844_v40, %v3112_v57  ;;  %v1845_v2 = vsel %vm1813_vm0, %v2632_v49, 0.0  ;;  %2637 = vrsqrt.f32 %v1772_v45  ;;  %vm1817_vm15 = vcmp.gt.f32.partialorder %v1772_v45, 0.0 }
 0x531   : > { %v1864_v46 = vmul.f32 %v1845_v2, %v3108_v55  ;;  %v1910_v55 = vsel %vm1726_vm1, 0.0, %v1894_v12  ;;  %vm3389_vm0 = vcmp.eq.s32.totalorder %v3260_v58, %v3073_v44 }
 0x532   : > { %v1879_v5 = vmul.f32 %v1863_v52, %v3285_v56  ;;  %v1925_v25 = vadd.f32 %v1910_v55, %v1909_v17 }
 0x533   : > { %v2634_v63 = vpop.eup %2633  ;;  %v1770_v4 = vpop.xlane.xlu1 %1769  ;;  %v1880_v19 = vmul.f32 %v1864_v46, %v3285_v56 }
 0x534   : > { %v1846_v7 = vsel %vm1814_vm13, %v2634_v63, 0.0  ;;  %2639 = vrsqrt.f32 %v1770_v4  ;;  %v2636_v10 = vpop.eup %2635  ;;  %v1895_v14 = vand.u32 2147483647, %v1879_v5  ;;  %vm1816_vm2 = vcmp.gt.f32.partialorder %v1770_v4, 0.0 }
 0x535   : > { %v1865_v15 = vmul.f32 %v1846_v7, %v3138_v3  ;;  %v1847_v20 = vsel %vm1815_vm14, %v2636_v10, 0.0  ;;  %v1896_v27 = vand.u32 2147483647, %v1880_v19 }
 0x536   : > { %v1911_v24 = vsel %vm1727_vm4, 0.0, %v1895_v14  ;;  %v1866_v29 = vmul.f32 %v1847_v20, %v3134_v1 }
 0x537   : > { %v1776_v57 = vpop.xlane.xlu1 %1775  ;;  %v1881_v3 = vmul.f32 %v1865_v15, %v3285_v56  ;;  %v1926_v32 = vadd.f32 %v1925_v25, %v1911_v24  ;;  %v1912_v39 = vsel %vm1728_vm3, 0.0, %v1896_v27 }
 0x538   : > { %2641 = vrsqrt.f32 %v1776_v57  ;;  %v1882_v40 = vmul.f32 %v1866_v29, %v3285_v56  ;;  %vm1819_vm1 = vcmp.gt.f32.partialorder %v1776_v57, 0.0 }
 0x539   : > { %v1897_v35 = vand.u32 2147483647, %v1881_v3  ;;  %v1927_v49 = vadd.f32 %v1926_v32, %v1912_v39 }
 0x53a   : > { %v2638_v42 = vpop.eup %2637 }
 0x53b   : > { %v1774_v22 = vpop.xlane.xlu1 %1773  ;;  %v1849_v37 = vsel %vm1817_vm15, %v2638_v42, 0.0  ;;  %v1913_v45 = vsel %vm1729_vm6, 0.0, %v1897_v35 }
 0x53c   : > { %2643 = vrsqrt.f32 %v1774_v22  ;;  %v1868_v59 = vmul.f32 %v1849_v37, %v3160_v11  ;;  %vm1818_vm4 = vcmp.gt.f32.partialorder %v1774_v22, 0.0  ;;  %v1928_v51 = vadd.f32 %v1927_v49, %v1913_v45 }
 0x53e   : > { %v2640_v30 = vpop.eup %2639  ;;  %v1884_v7 = vmul.f32 %v1868_v59, %v3285_v56 }
 0x53f   : > { %v1780_v34 = vpop.xlane.xlu1 %1779  ;;  %v1848_v43 = vsel %vm1816_vm2, %v2640_v30, 0.0 }
 0x540   : > { %2645 = vrsqrt.f32 %v1780_v34  ;;  %v1867_v53 = vmul.f32 %v1848_v43, %v3164_v13  ;;  %v1898_v13 = vand.u32 2147483647, %v1882_v40  ;;  %v1900_v15 = vand.u32 2147483647, %v1884_v7 }
 0x541   : > { %vm1821_vm3 = vcmp.gt.f32.partialorder %v1780_v34, 0.0 }
 0x542   : > { %v1883_v1 = vmul.f32 %v1867_v53, %v3285_v56  ;;  %v2642_v52 = vpop.eup %2641  ;;  %v1914_v62 = vsel %vm1730_vm5, 0.0, %v1898_v13  ;;  %v1916_v8 = vsel %vm1732_vm7, 0.0, %v1900_v15 }
 0x543   : > { %v1778_v50 = vpop.xlane.xlu1 %1777  ;;  %v1851_v4 = vsel %vm1819_vm1, %v2642_v52, 0.0  ;;  %v1929_v12 = vadd.f32 %v1928_v51, %v1914_v62 }
 0x544   : > { %2647 = vrsqrt.f32 %v1778_v50  ;;  %v1899_v2 = vand.u32 2147483647, %v1883_v1  ;;  %v1870_v57 = vmul.f32 %v1851_v4, %v3186_v21  ;;  %vm1820_vm5 = vcmp.gt.f32.partialorder %v1778_v50, 0.0 }
 0x546   : > { %v2644_v63 = vpop.eup %2643  ;;  %v1915_v11 = vsel %vm1731_vm8, 0.0, %v1899_v2  ;;  %v1886_v60 = vmul.f32 %v1870_v57, %v3285_v56 }
 0x547   : > { %v1850_v48 = vsel %vm1818_vm4, %v2644_v63, 0.0  ;;  %v1784_v5 = vpop.xlane.xlu1 %1783 }
 0x548   : > { %v1869_v9 = vmul.f32 %v1850_v48, %v3190_v23  ;;  %2649 = vrsqrt.f32 %v1784_v5  ;;  %v1930_v23 = vadd.f32 %v1929_v12, %v1915_v11  ;;  %v1902_v42 = vand.u32 2147483647, %v1886_v60 }
 0x549   : > { %vm1823_vm6 = vcmp.gt.f32.partialorder %v1784_v5, 0.0 }
 0x54a   : > { %v2646_v46 = vpop.eup %2645  ;;  %v1885_v10 = vmul.f32 %v1869_v9, %v3285_v56  ;;  %v1931_v25 = vadd.f32 %v1930_v23, %v1916_v8 }
 0x54b   : > { %v1782_v14 = vpop.xlane.xlu1 %1781  ;;  %v1853_v19 = vsel %vm1821_vm3, %v2646_v46, 0.0 }
 0x54c   : > { %v1901_v17 = vand.u32 2147483647, %v1885_v10  ;;  %2651 = vrsqrt.f32 %v1782_v14  ;;  %v1872_v55 = vmul.f32 %v1853_v19, %v3212_v31  ;;  %vm1822_vm7 = vcmp.gt.f32.partialorder %v1782_v14, 0.0 }
 0x54e   : > { %v2648_v20 = vpop.eup %2647  ;;  %v1917_v21 = vsel %vm1733_vm10, 0.0, %v1901_v17  ;;  %v1888_v6 = vmul.f32 %v1872_v55, %v3285_v56 }
 0x54f   : > { %v1852_v22 = vsel %vm1820_vm5, %v2648_v20, 0.0  ;;  %v1932_v30 = vadd.f32 %v1931_v25, %v1917_v21 }
 0x550   : > { %v1871_v24 = vmul.f32 %v1852_v22, %v3216_v33  ;;  %v1786_v3 = vpop.xlane.xlu1 %1785  ;;  %v1918_v33 = vsel %vm1734_vm9, 0.0, %v1902_v42  ;;  %v1904_v39 = vand.u32 2147483647, %v1888_v6  ;;  %vm3386_vm9 = vcmp.eq.s32.totalorder %v3234_v38, %v3073_v44 }
 0x551   : > { %2653 = vrsqrt.f32 %v1786_v3  ;;  %v1933_v37 = vadd.f32 %v1932_v30, %v1918_v33  ;;  %vm1824_vm8 = vcmp.gt.f32.partialorder %v1786_v3, 0.0 }
 0x552   : > { %v1887_v27 = vmul.f32 %v1871_v24, %v3285_v56  ;;  %v2650_v29 = vpop.eup %2649  ;;  %v1920_v16 = vsel %vm1736_vm11, 0.0, %v1904_v39  ;;  %vm3387_vm11 = vcmp.eq.s32.totalorder %v3231_v36, %v3073_v44 }
 0x553   : > { %v1855_v34 = vsel %vm1823_vm6, %v2650_v29, 0.0 }
 0x554   : > { %v1903_v32 = vand.u32 2147483647, %v1887_v27  ;;  %v1788_v35 = vpop.xlane.xlu1 %1787  ;;  %v1874_v18 = vmul.f32 %v1855_v34, %v3238_v41 }
 0x555   : > { %2655 = vrsqrt.f32 %v1788_v35  ;;  %vm1825_vm10 = vcmp.gt.f32.partialorder %v1788_v35, 0.0 }
 0x556   : > { %v2652_v31 = vpop.eup %2651  ;;  %v1919_v43 = vsel %vm1735_vm12, 0.0, %v1903_v32  ;;  %v1890_v1 = vmul.f32 %v1874_v18, %v3285_v56  ;;  %vm3388_vm12 = vcmp.eq.s32.totalorder %v3257_v54, %v3073_v44 }
 0x557   : > { %v1854_v53 = vsel %vm1822_vm7, %v2652_v31, 0.0  ;;  %v1934_v49 = vadd.f32 %v1933_v37, %v1919_v43 }
 0x558   : > { %v1873_v40 = vmul.f32 %v1854_v53, %v3242_v47  ;;  %v1906_v45 = vand.u32 2147483647, %v1890_v1 }
 0x559   : > { %v1935_v63 = vadd.f32 %v1934_v49, %v1920_v16 }
 0x55a   : > { %v1889_v41 = vmul.f32 %v1873_v40, %v3285_v56  ;;  %v1922_v5 = vsel %vm3387_vm11, 0.0, %v1906_v45 }
 0x55b   : > { %v2654_v50 = vpop.eup %2653 }
 0x55c   : > { %v1905_v52 = vand.u32 2147483647, %v1889_v41  ;;  %v1856_v28 = vsel %vm1824_vm8, %v2654_v50, 0.0 }
 0x55d   : > { %v1875_v59 = vmul.f32 %v1856_v28, %v3266_v0 }
 0x55e   : > { %v1921_v47 = vsel %vm3386_vm9, 0.0, %v1905_v52 }
 0x55f   : > { %v2656_v13 = vpop.eup %2655  ;;  %v1891_v2 = vmul.f32 %v1875_v59, %v3285_v56  ;;  %v1936_v51 = vadd.f32 %v1935_v63, %v1921_v47 }
 0x560   : > { %v1857_v4 = vsel %vm1825_vm10, %v2656_v13, 0.0 }
 0x561   : > { %v1907_v48 = vand.u32 2147483647, %v1891_v2  ;;  %v1876_v26 = vmul.f32 %v1857_v4, %v3262_v61  ;;  %v1937_v7 = vadd.f32 %v1936_v51, %v1922_v5 }
 0x563   : > { %v1892_v0 = vmul.f32 %v1876_v26, %v3285_v56  ;;  %v1923_v38 = vsel %vm3388_vm12, 0.0, %v1907_v48 }
 0x564   : > { %v1938_v46 = vadd.f32 %v1937_v7, %v1923_v38 }
 0x565   : > { %v1908_v9 = vand.u32 2147483647, %v1892_v0 }
 0x567   : > { %v1924_v62 = vsel %vm3389_vm0, 0.0, %v1908_v9 }
 0x568   : > { %v1939_v61 = vadd.f32 %v1938_v46, %v1924_v62 }
 0x56a   : > { %1940 = vadd.xlane.f32.xlu1 %v1939_v61 }
 0x5f7   : > { %v1941_v11 = vpop.xlane.xlu1 %1940 }
 0x5f8   : > { %v1942_v36 = vrot.slane %v1941_v11, 4 }
 0x5fa   : > { %v1943_v57 = vadd.f32 %v1942_v36, %v1941_v11 }
 0x5fc   : > { %v1944_v10 = vrot.slane %v1943_v57, 2 }
 0x5fe   : > { %v1945_v12 = vadd.f32 %v1944_v10, %v1943_v57 }
 0x600   : > { %v1946_v14 = vrot.slane %v1945_v12, 1 }
 0x602   : > { %v1947_v56 = vadd.f32 %v1946_v14, %v1945_v12 }
 0x604   : > { %2546 = vpush %v1947_v56 }
 0x635   : > { %s2547_s27 = spop %2546 }
 0x636   : > { %s1951_s12 = smul.f32 0.00390625, %s2547_s27 }
 0x638   : > { %v1952_v44 = vstv %s1951_s12 }
 0x639   : > { %1953 = vst [vmem:[%s362_s11] sm:$0xff] %v1952_v44 }
 0x63a PF: > { %s20_s30 = sadd.s32 1, %s2663_s30  }
 0x63b   : > { %p17_p6 = scmp.ge.s32.totalorder %s20_s30, 4  }
 0x63d   :  { %19 = sbr.rel (!%p17_p6) target bundleno = 1 (0x1), region = 102 }

</bundles_post_ra>
